<compile_context>
chip_gen: v7x
topology: tpu7x:2x2x1
jax: 0.10.0
libtpu: 0.0.40
codegen_flags: <defaults>
</compile_context>

<pallas_src>
import math
import functools

import jax
import jax.numpy as jnp
from jax import lax
from jax.experimental import pallas as pl
from jax.experimental.pallas import tpu as pltpu


N_LAYER_PARAMS = 11   # wqkv, wo, bo, g1, b1, wff1, bff1, wff2, bff2, g2, b2
N_HEAD_PARAMS = 5     # w1, b1, prelu_a, w2, b2


# ----------------------------- fused Pallas kernel -------------------------- #

def encoder_fused_kernel(*refs, n_batch, seq_len, embed_size, heads, head_dim,
                         num_layers, eps=1e-5):
    """Full Encoder forward for the whole batch in a single kernel invocation."""
    x_ref, pos_ref = refs[0], refs[1]
    o_ref = refs[-1]
    params = refs[2:-1]

    N, S, E, H, D = n_batch, seq_len, embed_size, heads, head_dim
    NS = N * S
    scale = 1.0 / math.sqrt(E)   # reference scales by sqrt(embed_size), not sqrt(head_dim)

    # word embeddings (gathered in the wrapper) + positional embeddings (fused here)
    x = x_ref[...].astype(jnp.float32)                       # (N*S, E)
    pos = pos_ref[...].astype(jnp.float32)                   # (S, E)
    x = (x.reshape(N, S, E) + pos[None, :, :]).reshape(NS, E)
    # dropout == identity (inference)

    for l in range(num_layers):                              # static unroll
        base = l * N_LAYER_PARAMS
        wqkv = params[base + 0][...]    # (E, 3E)  block-diag per head, pre-transposed
        wo_t = params[base + 1][...]    # (E, E)
        bo   = params[base + 2][...]    # (1, E)
        g1   = params[base + 3][...]    # (1, E)
        b1   = params[base + 4][...]    # (1, E)
        wff1 = params[base + 5][...]    # (E, hidden)
        bff1 = params[base + 6][...]    # (1, hidden)
        wff2 = params[base + 7][...]    # (hidden, E)
        bff2 = params[base + 8][...]    # (1, E)
        g2   = params[base + 9][...]    # (1, E)
        b2   = params[base + 10][...]   # (1, E)

        # ---- fused Q/K/V projection: one matmul for all heads & all of q,k,v ----
        qkv = jnp.dot(x, wqkv, preferred_element_type=jnp.float32)   # (NS, 3E)
        q = qkv[:, 0 * E:1 * E].reshape(N, S, E)
        k = qkv[:, 1 * E:2 * E].reshape(N, S, E)
        v = qkv[:, 2 * E:3 * E].reshape(N, S, E)

        # ---- attention, batched over N; fc_out folded per head (no concat) ----
        acc = jnp.zeros((NS, E), jnp.float32)
        for h in range(H):                                    # static head loop (H small)
            lo, hi = h * D, (h + 1) * D
            qh = q[:, :, lo:hi]                               # (N, S, D)
            kh = k[:, :, lo:hi]
            vh = v[:, :, lo:hi]
            s = jnp.einsum('nqd,nkd->nqk', qh, kh,
                           preferred_element_type=jnp.float32) * scale   # (N, S, S)
            s = s - jnp.max(s, axis=-1, keepdims=True)
            p = jnp.exp(s)
            p = p * pl.reciprocal(jnp.sum(p, axis=-1, keepdims=True), approx=True)
            ctx = jnp.einsum('nqk,nkd->nqd', p, vh,
                             preferred_element_type=jnp.float32)          # (N, S, D)
            acc = acc + jnp.dot(ctx.reshape(NS, D), wo_t[lo:hi, :],
                                preferred_element_type=jnp.float32)
        attn = acc + bo                                       # (NS, E)

        # ---- residual + LayerNorm 1 (dropout == identity) ----
        h1 = attn + x
        mu1 = jnp.mean(h1, axis=-1, keepdims=True)
        var1 = jnp.mean((h1 - mu1) ** 2, axis=-1, keepdims=True)
        h1 = (h1 - mu1) * lax.rsqrt(var1 + eps) * g1 + b1

        # ---- feed-forward: Linear -> ReLU -> Linear ----
        ff = jnp.dot(h1, wff1, preferred_element_type=jnp.float32) + bff1
        ff = jnp.maximum(ff, 0.0)
        ff = jnp.dot(ff, wff2, preferred_element_type=jnp.float32) + bff2

        # ---- residual + LayerNorm 2 ----
        h2 = ff + h1
        mu2 = jnp.mean(h2, axis=-1, keepdims=True)
        var2 = jnp.mean((h2 - mu2) ** 2, axis=-1, keepdims=True)
        x = (h2 - mu2) * lax.rsqrt(var2 + eps) * g2 + b2

    # ---- classifier head: mean over seq -> fc1 -> PReLU -> fc2 -> softmax ----
    hb = num_layers * N_LAYER_PARAMS
    w1  = params[hb + 0][...]    # (E, 512)
    b1h = params[hb + 1][...]    # (1, 512)
    pa  = params[hb + 2][...]    # (1, 1)  PReLU single parameter
    w2  = params[hb + 3][...]    # (512, 3)
    b2h = params[hb + 4][...]    # (1, 3)

    pooled = jnp.mean(x.reshape(N, S, E), axis=1)                        # (N, E)
    hc = jnp.dot(pooled, w1, preferred_element_type=jnp.float32) + b1h   # (N, 512)
    hc = jnp.where(hc > 0.0, hc, pa * hc)                                # PReLU
    logits = jnp.dot(hc, w2, preferred_element_type=jnp.float32) + b2h   # (N, 3)
    m = jnp.max(logits, axis=-1, keepdims=True)
    e = jnp.exp(logits - m)
    o_ref[...] = (e / jnp.sum(e, axis=-1, keepdims=True)).astype(o_ref.dtype)


# ----------------------------- wrappers ------------------------------------- #

def _const_spec(shape):
    zeros = (0,) * len(shape)
    return pl.BlockSpec(shape, lambda *_, _z=zeros: _z)


def _prep_params(params, *, heads):
    """Pre-transpose weights to (in, out) and build the fused block-diag QKV weight."""
    flat = []
    for lp in params["layers"]:
        def bd(w):   # w is PyTorch-style (out, in) = (D, D); block-diag of w.T -> (E, E)
            return jax.scipy.linalg.block_diag(*([w.T] * heads))
        wqkv = jnp.concatenate([bd(lp["wq"]), bd(lp["wk"]), bd(lp["wv"])], axis=1)  # (E, 3E)
        flat += [wqkv, lp["wo"].T, lp["bo"], lp["g1"], lp["b1"],
                 lp["wff1"].T, lp["bff1"], lp["wff2"].T, lp["bff2"],
                 lp["g2"], lp["b2"]]
    hp = params["head"]
    flat += [hp["w1"].T, hp["b1"], hp["prelu_a"], hp["w2"].T, hp["b2"]]
    return flat


def encoder_forward(tokens, params, *, heads, head_dim, embed_size):
    N, S = tokens.shape
    E = embed_size
    # glue: embedding gather (data-dependent gather stays in plain JAX)
    word = params["word_emb"][tokens].reshape(N * S, E)       # (N*S, E)
    pos = params["pos_emb"][:S]                               # (S, E)
    flat = _prep_params(params, heads=heads)

    kernel = functools.partial(
        encoder_fused_kernel, n_batch=N, seq_len=S, embed_size=E,
        heads=heads, head_dim=head_dim, num_layers=len(params["layers"]))

    inputs = [word, pos] + flat
    in_specs = [_const_spec(a.shape) for a in inputs]
    return pl.pallas_call(
        kernel,
        out_shape=jax.ShapeDtypeStruct((N, 3), jnp.float32),
        grid=(1,),
        in_specs=in_specs,
        out_specs=_const_spec((N, 3)),
        compiler_params=pltpu.CompilerParams(dimension_semantics=("arbitrary",)),
    )(*inputs)


# ----------------------------- param init ----------------------------------- #

def init_params(key, *, vocab_size, embed_size, num_layers, heads,
                forward_expansion, max_length):
    head_dim = embed_size // heads
    hidden = forward_expansion * embed_size

    def nrm(k, shape, scale=0.05):
        return scale * jax.random.normal(k, shape, dtype=jnp.float32)

    keys = iter(jax.random.split(key, 8 + 16 * num_layers))

    word_emb = nrm(next(keys), (vocab_size, embed_size))
    word_emb = word_emb.at[0].set(0.0)                        # padding_idx=0
    pos_emb = nrm(next(keys), (max_length, embed_size))
    pos_emb = pos_emb.at[0].set(0.0)                          # padding_idx=0 (reference quirk)

    layers = []
    for _ in range(num_layers):
        layers.append(dict(
            wq=nrm(next(keys), (head_dim, head_dim)),
            wk=nrm(next(keys), (head_dim, head_dim)),
            wv=nrm(next(keys), (head_dim, head_dim)),
            wo=nrm(next(keys), (embed_size, embed_size)),
            bo=nrm(next(keys), (1, embed_size)),
            g1=jnp.ones((1, embed_size), jnp.float32),
            b1=jnp.zeros((1, embed_size), jnp.float32),
            wff1=nrm(next(keys), (hidden, embed_size)),
            bff1=nrm(next(keys), (1, hidden)),
            wff2=nrm(next(keys), (embed_size, hidden)),
            bff2=nrm(next(keys), (1, embed_size)),
            g2=jnp.ones((1, embed_size), jnp.float32),
            b2=jnp.zeros((1, embed_size), jnp.float32),
        ))

    head = dict(
        w1=nrm(next(keys), (512, embed_size)),
        b1=nrm(next(keys), (1, 512)),
        prelu_a=jnp.full((1, 1), 0.25, jnp.float32),          # nn.PReLU() default
        w2=nrm(next(keys), (3, 512)),
        b2=nrm(next(keys), (1, 3)),
    )
    return dict(word_emb=word_emb, pos_emb=pos_emb, layers=layers, head=head)


# ----------------------------- main ------------------------------------------ #

if __name__ == "__main__":
    vocab_size = 50
    embed_size = 32
    num_layers = 2
    heads = 4
    head_dim = embed_size // heads
    forward_expansion = 4
    max_length = 16
    batch = 2
    seq_len = 8

    key = jax.random.PRNGKey(0)
    k_tok, k_par = jax.random.split(key)

    tokens = jax.random.randint(k_tok, (batch, seq_len), 0, vocab_size, dtype=jnp.int32)
    params = init_params(k_par, vocab_size=vocab_size, embed_size=embed_size,
                         num_layers=num_layers, heads=heads,
                         forward_expansion=forward_expansion, max_length=max_length)

    probs = encoder_forward(tokens, params, heads=heads, head_dim=head_dim,
                            embed_size=embed_size)
    probs = jax.block_until_ready(probs)

    assert probs.shape == (batch, 3)
    assert bool(jnp.all(jnp.isfinite(probs)))
    assert bool(jnp.allclose(jnp.sum(probs, axis=1), 1.0, atol=1e-5))
    print("KERNEL_OK")
</pallas_src>

<mosaic_0001>
module attributes {stable_mosaic.version = 11 : i64} {
  func.func @encoder_fused_kernel(%arg0: i32, %arg1: memref<16x32xf32, #tpu.memory_space<vmem>>, %arg2: memref<8x32xf32, #tpu.memory_space<vmem>>, %arg3: memref<32x96xf32, #tpu.memory_space<vmem>>, %arg4: memref<32x32xf32, #tpu.memory_space<vmem>>, %arg5: memref<1x32xf32, #tpu.memory_space<vmem>>, %arg6: memref<1x32xf32, #tpu.memory_space<vmem>>, %arg7: memref<1x32xf32, #tpu.memory_space<vmem>>, %arg8: memref<32x128xf32, #tpu.memory_space<vmem>>, %arg9: memref<1x128xf32, #tpu.memory_space<vmem>>, %arg10: memref<128x32xf32, #tpu.memory_space<vmem>>, %arg11: memref<1x32xf32, #tpu.memory_space<vmem>>, %arg12: memref<1x32xf32, #tpu.memory_space<vmem>>, %arg13: memref<1x32xf32, #tpu.memory_space<vmem>>, %arg14: memref<32x96xf32, #tpu.memory_space<vmem>>, %arg15: memref<32x32xf32, #tpu.memory_space<vmem>>, %arg16: memref<1x32xf32, #tpu.memory_space<vmem>>, %arg17: memref<1x32xf32, #tpu.memory_space<vmem>>, %arg18: memref<1x32xf32, #tpu.memory_space<vmem>>, %arg19: memref<32x128xf32, #tpu.memory_space<vmem>>, %arg20: memref<1x128xf32, #tpu.memory_space<vmem>>, %arg21: memref<128x32xf32, #tpu.memory_space<vmem>>, %arg22: memref<1x32xf32, #tpu.memory_space<vmem>>, %arg23: memref<1x32xf32, #tpu.memory_space<vmem>>, %arg24: memref<1x32xf32, #tpu.memory_space<vmem>>, %arg25: memref<32x512xf32, #tpu.memory_space<vmem>>, %arg26: memref<1x512xf32, #tpu.memory_space<vmem>>, %arg27: memref<1x1xf32, #tpu.memory_space<vmem>>, %arg28: memref<512x3xf32, #tpu.memory_space<vmem>>, %arg29: memref<1x3xf32, #tpu.memory_space<vmem>>, %arg30: memref<2x3xf32, #tpu.memory_space<vmem>>) attributes {dimension_semantics = [#tpu.dimension_semantics<arbitrary>], iteration_bounds = array<i64: 1>, scalar_prefetch = 0 : i64, scratch_operands = 0 : i64, tpu.core_type = #tpu.core_type<tc>, window_params = [{pipeline_mode = #tpu.pipeline_mode<synchronous>, transform_indices = @transform_0, window_bounds = array<i64: 16, 32>}, {pipeline_mode = #tpu.pipeline_mode<synchronous>, transform_indices = @transform_1, window_bounds = array<i64: 8, 32>}, {pipeline_mode = #tpu.pipeline_mode<synchronous>, transform_indices = @transform_2, window_bounds = array<i64: 32, 96>}, {pipeline_mode = #tpu.pipeline_mode<synchronous>, transform_indices = @transform_3, window_bounds = array<i64: 32, 32>}, {pipeline_mode = #tpu.pipeline_mode<synchronous>, transform_indices = @transform_4, window_bounds = array<i64: 1, 32>}, {pipeline_mode = #tpu.pipeline_mode<synchronous>, transform_indices = @transform_5, window_bounds = array<i64: 1, 32>}, {pipeline_mode = #tpu.pipeline_mode<synchronous>, transform_indices = @transform_6, window_bounds = array<i64: 1, 32>}, {pipeline_mode = #tpu.pipeline_mode<synchronous>, transform_indices = @transform_7, window_bounds = array<i64: 32, 128>}, {pipeline_mode = #tpu.pipeline_mode<synchronous>, transform_indices = @transform_8, window_bounds = array<i64: 1, 128>}, {pipeline_mode = #tpu.pipeline_mode<synchronous>, transform_indices = @transform_9, window_bounds = array<i64: 128, 32>}, {pipeline_mode = #tpu.pipeline_mode<synchronous>, transform_indices = @transform_10, window_bounds = array<i64: 1, 32>}, {pipeline_mode = #tpu.pipeline_mode<synchronous>, transform_indices = @transform_11, window_bounds = array<i64: 1, 32>}, {pipeline_mode = #tpu.pipeline_mode<synchronous>, transform_indices = @transform_12, window_bounds = array<i64: 1, 32>}, {pipeline_mode = #tpu.pipeline_mode<synchronous>, transform_indices = @transform_13, window_bounds = array<i64: 32, 96>}, {pipeline_mode = #tpu.pipeline_mode<synchronous>, transform_indices = @transform_14, window_bounds = array<i64: 32, 32>}, {pipeline_mode = #tpu.pipeline_mode<synchronous>, transform_indices = @transform_15, window_bounds = array<i64: 1, 32>}, {pipeline_mode = #tpu.pipeline_mode<synchronous>, transform_indices = @transform_16, window_bounds = array<i64: 1, 32>}, {pipeline_mode = #tpu.pipeline_mode<synchronous>, transform_indices = @transform_17, window_bounds = array<i64: 1, 32>}, {pipeline_mode = #tpu.pipeline_mode<synchronous>, transform_indices = @transform_18, window_bounds = array<i64: 32, 128>}, {pipeline_mode = #tpu.pipeline_mode<synchronous>, transform_indices = @transform_19, window_bounds = array<i64: 1, 128>}, {pipeline_mode = #tpu.pipeline_mode<synchronous>, transform_indices = @transform_20, window_bounds = array<i64: 128, 32>}, {pipeline_mode = #tpu.pipeline_mode<synchronous>, transform_indices = @transform_21, window_bounds = array<i64: 1, 32>}, {pipeline_mode = #tpu.pipeline_mode<synchronous>, transform_indices = @transform_22, window_bounds = array<i64: 1, 32>}, {pipeline_mode = #tpu.pipeline_mode<synchronous>, transform_indices = @transform_23, window_bounds = array<i64: 1, 32>}, {pipeline_mode = #tpu.pipeline_mode<synchronous>, transform_indices = @transform_24, window_bounds = array<i64: 32, 512>}, {pipeline_mode = #tpu.pipeline_mode<synchronous>, transform_indices = @transform_25, window_bounds = array<i64: 1, 512>}, {pipeline_mode = #tpu.pipeline_mode<synchronous>, transform_indices = @transform_26, window_bounds = array<i64: 1, 1>}, {pipeline_mode = #tpu.pipeline_mode<synchronous>, transform_indices = @transform_27, window_bounds = array<i64: 512, 3>}, {pipeline_mode = #tpu.pipeline_mode<synchronous>, transform_indices = @transform_28, window_bounds = array<i64: 1, 3>}, {pipeline_mode = #tpu.pipeline_mode<synchronous>, transform_indices = @transform_29, window_bounds = array<i64: 2, 3>}]} {
    %c0 = arith.constant 0 : index
    %c0_0 = arith.constant 0 : index
    %0 = vector.load %arg1[%c0, %c0_0] : memref<16x32xf32, #tpu.memory_space<vmem>>, vector<16x32xf32>
    %c0_1 = arith.constant 0 : index
    %c0_2 = arith.constant 0 : index
    %1 = vector.load %arg2[%c0_1, %c0_2] : memref<8x32xf32, #tpu.memory_space<vmem>>, vector<8x32xf32>
    %2 = vector.shape_cast %0 : vector<16x32xf32> to vector<2x8x32xf32>
    %3 = vector.shape_cast %1 : vector<8x32xf32> to vector<1x8x32xf32>
    %4 = vector.broadcast %3 : vector<1x8x32xf32> to vector<2x8x32xf32>
    %5 = arith.addf %2, %4 : vector<2x8x32xf32>
    %6 = vector.shape_cast %5 : vector<2x8x32xf32> to vector<16x32xf32>
    %c0_3 = arith.constant 0 : index
    %c0_4 = arith.constant 0 : index
    %7 = vector.load %arg3[%c0_3, %c0_4] : memref<32x96xf32, #tpu.memory_space<vmem>>, vector<32x96xf32>
    %c0_5 = arith.constant 0 : index
    %c0_6 = arith.constant 0 : index
    %8 = vector.load %arg4[%c0_5, %c0_6] : memref<32x32xf32, #tpu.memory_space<vmem>>, vector<32x32xf32>
    %c0_7 = arith.constant 0 : index
    %c0_8 = arith.constant 0 : index
    %9 = vector.load %arg5[%c0_7, %c0_8] : memref<1x32xf32, #tpu.memory_space<vmem>>, vector<1x32xf32>
    %c0_9 = arith.constant 0 : index
    %c0_10 = arith.constant 0 : index
    %10 = vector.load %arg6[%c0_9, %c0_10] : memref<1x32xf32, #tpu.memory_space<vmem>>, vector<1x32xf32>
    %c0_11 = arith.constant 0 : index
    %c0_12 = arith.constant 0 : index
    %11 = vector.load %arg7[%c0_11, %c0_12] : memref<1x32xf32, #tpu.memory_space<vmem>>, vector<1x32xf32>
    %c0_13 = arith.constant 0 : index
    %c0_14 = arith.constant 0 : index
    %12 = vector.load %arg8[%c0_13, %c0_14] : memref<32x128xf32, #tpu.memory_space<vmem>>, vector<32x128xf32>
    %c0_15 = arith.constant 0 : index
    %c0_16 = arith.constant 0 : index
    %13 = vector.load %arg9[%c0_15, %c0_16] : memref<1x128xf32, #tpu.memory_space<vmem>>, vector<1x128xf32>
    %c0_17 = arith.constant 0 : index
    %c0_18 = arith.constant 0 : index
    %14 = vector.load %arg10[%c0_17, %c0_18] : memref<128x32xf32, #tpu.memory_space<vmem>>, vector<128x32xf32>
    %c0_19 = arith.constant 0 : index
    %c0_20 = arith.constant 0 : index
    %15 = vector.load %arg11[%c0_19, %c0_20] : memref<1x32xf32, #tpu.memory_space<vmem>>, vector<1x32xf32>
    %c0_21 = arith.constant 0 : index
    %c0_22 = arith.constant 0 : index
    %16 = vector.load %arg12[%c0_21, %c0_22] : memref<1x32xf32, #tpu.memory_space<vmem>>, vector<1x32xf32>
    %c0_23 = arith.constant 0 : index
    %c0_24 = arith.constant 0 : index
    %17 = vector.load %arg13[%c0_23, %c0_24] : memref<1x32xf32, #tpu.memory_space<vmem>>, vector<1x32xf32>
    %cst = arith.constant dense<0.000000e+00> : vector<16x96xf32>
    %18 = tpu.matmul %6, %7, %cst {dimension_numbers = #tpu.dot_dimension_numbers<[1], [0], [0], [1], [0, 0, 1, 1], [], []>} : vector<16x32xf32>, vector<32x96xf32>, vector<16x96xf32> -> vector<16x96xf32>
    %19 = vector.extract_strided_slice %18 {offsets = [0, 0], sizes = [16, 32], strides = [1, 1]} : vector<16x96xf32> to vector<16x32xf32>
    %20 = vector.shape_cast %19 : vector<16x32xf32> to vector<2x8x32xf32>
    %21 = vector.extract_strided_slice %18 {offsets = [0, 32], sizes = [16, 32], strides = [1, 1]} : vector<16x96xf32> to vector<16x32xf32>
    %22 = vector.shape_cast %21 : vector<16x32xf32> to vector<2x8x32xf32>
    %23 = vector.extract_strided_slice %18 {offsets = [0, 64], sizes = [16, 32], strides = [1, 1]} : vector<16x96xf32> to vector<16x32xf32>
    %24 = vector.shape_cast %23 : vector<16x32xf32> to vector<2x8x32xf32>
    %cst_25 = arith.constant 0.000000e+00 : f32
    %25 = vector.broadcast %cst_25 : f32 to vector<16x32xf32>
    %26 = vector.extract_strided_slice %20 {offsets = [0, 0, 0], sizes = [2, 8, 8], strides = [1, 1, 1]} : vector<2x8x32xf32> to vector<2x8x8xf32>
    %27 = vector.extract_strided_slice %22 {offsets = [0, 0, 0], sizes = [2, 8, 8], strides = [1, 1, 1]} : vector<2x8x32xf32> to vector<2x8x8xf32>
    %28 = vector.extract_strided_slice %24 {offsets = [0, 0, 0], sizes = [2, 8, 8], strides = [1, 1, 1]} : vector<2x8x32xf32> to vector<2x8x8xf32>
    "tpu.trace_start"() <{level = 10 : i32, message = "nqd,nkd->nqk"}> : () -> ()
    %cst_26 = arith.constant dense<0.000000e+00> : vector<2x8x8xf32>
    %29 = tpu.matmul %26, %27, %cst_26 {dimension_numbers = #tpu.dot_dimension_numbers<[2], [2], [1], [1], [0, 0, 0, 1, 1, 1], [0], [0]>} : vector<2x8x8xf32>, vector<2x8x8xf32>, vector<2x8x8xf32> -> vector<2x8x8xf32>
    "tpu.trace_stop"() : () -> ()
    %cst_27 = arith.constant 0.176776692 : f32
    %30 = vector.broadcast %cst_27 : f32 to vector<2x8x8xf32>
    %31 = arith.mulf %29, %30 : vector<2x8x8xf32>
    %cst_28 = arith.constant dense<0xFF800000> : vector<2x8xf32>
    %32 = vector.multi_reduction <maximumf>, %31, %cst_28 [2] : vector<2x8x8xf32> to vector<2x8xf32>
    %33 = vector.shape_cast %32 : vector<2x8xf32> to vector<2x8x1xf32>
    %34 = vector.broadcast %33 : vector<2x8x1xf32> to vector<2x8x8xf32>
    %35 = arith.subf %31, %34 : vector<2x8x8xf32>
    %36 = math.exp %35 : vector<2x8x8xf32>
    %cst_29 = arith.constant dense<0.000000e+00> : vector<2x8xf32>
    %37 = vector.multi_reduction <add>, %36, %cst_29 [2] : vector<2x8x8xf32> to vector<2x8xf32>
    %38 = vector.shape_cast %37 : vector<2x8xf32> to vector<2x8x1xf32>
    %39 = tpu.reciprocal %38 {approx = true} : vector<2x8x1xf32> -> vector<2x8x1xf32>
    %40 = vector.broadcast %39 : vector<2x8x1xf32> to vector<2x8x8xf32>
    %41 = arith.mulf %36, %40 : vector<2x8x8xf32>
    "tpu.trace_start"() <{level = 10 : i32, message = "nqk,nkd->nqd"}> : () -> ()
    %cst_30 = arith.constant dense<0.000000e+00> : vector<2x8x8xf32>
    %42 = tpu.matmul %41, %28, %cst_30 {dimension_numbers = #tpu.dot_dimension_numbers<[2], [1], [1], [2], [0, 0, 0, 1, 1, 2], [0], [0]>} : vector<2x8x8xf32>, vector<2x8x8xf32>, vector<2x8x8xf32> -> vector<2x8x8xf32>
    "tpu.trace_stop"() : () -> ()
    %43 = vector.shape_cast %42 : vector<2x8x8xf32> to vector<16x8xf32>
    %44 = vector.extract_strided_slice %8 {offsets = [0, 0], sizes = [8, 32], strides = [1, 1]} : vector<32x32xf32> to vector<8x32xf32>
    %cst_31 = arith.constant dense<0.000000e+00> : vector<16x32xf32>
    %45 = tpu.matmul %43, %44, %cst_31 {dimension_numbers = #tpu.dot_dimension_numbers<[1], [0], [0], [1], [0, 0, 1, 1], [], []>} : vector<16x8xf32>, vector<8x32xf32>, vector<16x32xf32> -> vector<16x32xf32>
    %46 = arith.addf %25, %45 : vector<16x32xf32>
    %47 = vector.extract_strided_slice %20 {offsets = [0, 0, 8], sizes = [2, 8, 8], strides = [1, 1, 1]} : vector<2x8x32xf32> to vector<2x8x8xf32>
    %48 = vector.extract_strided_slice %22 {offsets = [0, 0, 8], sizes = [2, 8, 8], strides = [1, 1, 1]} : vector<2x8x32xf32> to vector<2x8x8xf32>
    %49 = vector.extract_strided_slice %24 {offsets = [0, 0, 8], sizes = [2, 8, 8], strides = [1, 1, 1]} : vector<2x8x32xf32> to vector<2x8x8xf32>
    "tpu.trace_start"() <{level = 10 : i32, message = "nqd,nkd->nqk"}> : () -> ()
    %cst_32 = arith.constant dense<0.000000e+00> : vector<2x8x8xf32>
    %50 = tpu.matmul %47, %48, %cst_32 {dimension_numbers = #tpu.dot_dimension_numbers<[2], [2], [1], [1], [0, 0, 0, 1, 1, 1], [0], [0]>} : vector<2x8x8xf32>, vector<2x8x8xf32>, vector<2x8x8xf32> -> vector<2x8x8xf32>
    "tpu.trace_stop"() : () -> ()
    %cst_33 = arith.constant 0.176776692 : f32
    %51 = vector.broadcast %cst_33 : f32 to vector<2x8x8xf32>
    %52 = arith.mulf %50, %51 : vector<2x8x8xf32>
    %cst_34 = arith.constant dense<0xFF800000> : vector<2x8xf32>
    %53 = vector.multi_reduction <maximumf>, %52, %cst_34 [2] : vector<2x8x8xf32> to vector<2x8xf32>
    %54 = vector.shape_cast %53 : vector<2x8xf32> to vector<2x8x1xf32>
    %55 = vector.broadcast %54 : vector<2x8x1xf32> to vector<2x8x8xf32>
    %56 = arith.subf %52, %55 : vector<2x8x8xf32>
    %57 = math.exp %56 : vector<2x8x8xf32>
    %cst_35 = arith.constant dense<0.000000e+00> : vector<2x8xf32>
    %58 = vector.multi_reduction <add>, %57, %cst_35 [2] : vector<2x8x8xf32> to vector<2x8xf32>
    %59 = vector.shape_cast %58 : vector<2x8xf32> to vector<2x8x1xf32>
    %60 = tpu.reciprocal %59 {approx = true} : vector<2x8x1xf32> -> vector<2x8x1xf32>
    %61 = vector.broadcast %60 : vector<2x8x1xf32> to vector<2x8x8xf32>
    %62 = arith.mulf %57, %61 : vector<2x8x8xf32>
    "tpu.trace_start"() <{level = 10 : i32, message = "nqk,nkd->nqd"}> : () -> ()
    %cst_36 = arith.constant dense<0.000000e+00> : vector<2x8x8xf32>
    %63 = tpu.matmul %62, %49, %cst_36 {dimension_numbers = #tpu.dot_dimension_numbers<[2], [1], [1], [2], [0, 0, 0, 1, 1, 2], [0], [0]>} : vector<2x8x8xf32>, vector<2x8x8xf32>, vector<2x8x8xf32> -> vector<2x8x8xf32>
    "tpu.trace_stop"() : () -> ()
    %64 = vector.shape_cast %63 : vector<2x8x8xf32> to vector<16x8xf32>
    %65 = vector.extract_strided_slice %8 {offsets = [8, 0], sizes = [8, 32], strides = [1, 1]} : vector<32x32xf32> to vector<8x32xf32>
    %cst_37 = arith.constant dense<0.000000e+00> : vector<16x32xf32>
    %66 = tpu.matmul %64, %65, %cst_37 {dimension_numbers = #tpu.dot_dimension_numbers<[1], [0], [0], [1], [0, 0, 1, 1], [], []>} : vector<16x8xf32>, vector<8x32xf32>, vector<16x32xf32> -> vector<16x32xf32>
    %67 = arith.addf %46, %66 : vector<16x32xf32>
    %68 = vector.extract_strided_slice %20 {offsets = [0, 0, 16], sizes = [2, 8, 8], strides = [1, 1, 1]} : vector<2x8x32xf32> to vector<2x8x8xf32>
    %69 = vector.extract_strided_slice %22 {offsets = [0, 0, 16], sizes = [2, 8, 8], strides = [1, 1, 1]} : vector<2x8x32xf32> to vector<2x8x8xf32>
    %70 = vector.extract_strided_slice %24 {offsets = [0, 0, 16], sizes = [2, 8, 8], strides = [1, 1, 1]} : vector<2x8x32xf32> to vector<2x8x8xf32>
    "tpu.trace_start"() <{level = 10 : i32, message = "nqd,nkd->nqk"}> : () -> ()
    %cst_38 = arith.constant dense<0.000000e+00> : vector<2x8x8xf32>
    %71 = tpu.matmul %68, %69, %cst_38 {dimension_numbers = #tpu.dot_dimension_numbers<[2], [2], [1], [1], [0, 0, 0, 1, 1, 1], [0], [0]>} : vector<2x8x8xf32>, vector<2x8x8xf32>, vector<2x8x8xf32> -> vector<2x8x8xf32>
    "tpu.trace_stop"() : () -> ()
    %cst_39 = arith.constant 0.176776692 : f32
    %72 = vector.broadcast %cst_39 : f32 to vector<2x8x8xf32>
    %73 = arith.mulf %71, %72 : vector<2x8x8xf32>
    %cst_40 = arith.constant dense<0xFF800000> : vector<2x8xf32>
    %74 = vector.multi_reduction <maximumf>, %73, %cst_40 [2] : vector<2x8x8xf32> to vector<2x8xf32>
    %75 = vector.shape_cast %74 : vector<2x8xf32> to vector<2x8x1xf32>
    %76 = vector.broadcast %75 : vector<2x8x1xf32> to vector<2x8x8xf32>
    %77 = arith.subf %73, %76 : vector<2x8x8xf32>
    %78 = math.exp %77 : vector<2x8x8xf32>
    %cst_41 = arith.constant dense<0.000000e+00> : vector<2x8xf32>
    %79 = vector.multi_reduction <add>, %78, %cst_41 [2] : vector<2x8x8xf32> to vector<2x8xf32>
    %80 = vector.shape_cast %79 : vector<2x8xf32> to vector<2x8x1xf32>
    %81 = tpu.reciprocal %80 {approx = true} : vector<2x8x1xf32> -> vector<2x8x1xf32>
    %82 = vector.broadcast %81 : vector<2x8x1xf32> to vector<2x8x8xf32>
    %83 = arith.mulf %78, %82 : vector<2x8x8xf32>
    "tpu.trace_start"() <{level = 10 : i32, message = "nqk,nkd->nqd"}> : () -> ()
    %cst_42 = arith.constant dense<0.000000e+00> : vector<2x8x8xf32>
    %84 = tpu.matmul %83, %70, %cst_42 {dimension_numbers = #tpu.dot_dimension_numbers<[2], [1], [1], [2], [0, 0, 0, 1, 1, 2], [0], [0]>} : vector<2x8x8xf32>, vector<2x8x8xf32>, vector<2x8x8xf32> -> vector<2x8x8xf32>
    "tpu.trace_stop"() : () -> ()
    %85 = vector.shape_cast %84 : vector<2x8x8xf32> to vector<16x8xf32>
    %86 = vector.extract_strided_slice %8 {offsets = [16, 0], sizes = [8, 32], strides = [1, 1]} : vector<32x32xf32> to vector<8x32xf32>
    %cst_43 = arith.constant dense<0.000000e+00> : vector<16x32xf32>
    %87 = tpu.matmul %85, %86, %cst_43 {dimension_numbers = #tpu.dot_dimension_numbers<[1], [0], [0], [1], [0, 0, 1, 1], [], []>} : vector<16x8xf32>, vector<8x32xf32>, vector<16x32xf32> -> vector<16x32xf32>
    %88 = arith.addf %67, %87 : vector<16x32xf32>
    %89 = vector.extract_strided_slice %20 {offsets = [0, 0, 24], sizes = [2, 8, 8], strides = [1, 1, 1]} : vector<2x8x32xf32> to vector<2x8x8xf32>
    %90 = vector.extract_strided_slice %22 {offsets = [0, 0, 24], sizes = [2, 8, 8], strides = [1, 1, 1]} : vector<2x8x32xf32> to vector<2x8x8xf32>
    %91 = vector.extract_strided_slice %24 {offsets = [0, 0, 24], sizes = [2, 8, 8], strides = [1, 1, 1]} : vector<2x8x32xf32> to vector<2x8x8xf32>
    "tpu.trace_start"() <{level = 10 : i32, message = "nqd,nkd->nqk"}> : () -> ()
    %cst_44 = arith.constant dense<0.000000e+00> : vector<2x8x8xf32>
    %92 = tpu.matmul %89, %90, %cst_44 {dimension_numbers = #tpu.dot_dimension_numbers<[2], [2], [1], [1], [0, 0, 0, 1, 1, 1], [0], [0]>} : vector<2x8x8xf32>, vector<2x8x8xf32>, vector<2x8x8xf32> -> vector<2x8x8xf32>
    "tpu.trace_stop"() : () -> ()
    %cst_45 = arith.constant 0.176776692 : f32
    %93 = vector.broadcast %cst_45 : f32 to vector<2x8x8xf32>
    %94 = arith.mulf %92, %93 : vector<2x8x8xf32>
    %cst_46 = arith.constant dense<0xFF800000> : vector<2x8xf32>
    %95 = vector.multi_reduction <maximumf>, %94, %cst_46 [2] : vector<2x8x8xf32> to vector<2x8xf32>
    %96 = vector.shape_cast %95 : vector<2x8xf32> to vector<2x8x1xf32>
    %97 = vector.broadcast %96 : vector<2x8x1xf32> to vector<2x8x8xf32>
    %98 = arith.subf %94, %97 : vector<2x8x8xf32>
    %99 = math.exp %98 : vector<2x8x8xf32>
    %cst_47 = arith.constant dense<0.000000e+00> : vector<2x8xf32>
    %100 = vector.multi_reduction <add>, %99, %cst_47 [2] : vector<2x8x8xf32> to vector<2x8xf32>
    %101 = vector.shape_cast %100 : vector<2x8xf32> to vector<2x8x1xf32>
    %102 = tpu.reciprocal %101 {approx = true} : vector<2x8x1xf32> -> vector<2x8x1xf32>
    %103 = vector.broadcast %102 : vector<2x8x1xf32> to vector<2x8x8xf32>
    %104 = arith.mulf %99, %103 : vector<2x8x8xf32>
    "tpu.trace_start"() <{level = 10 : i32, message = "nqk,nkd->nqd"}> : () -> ()
    %cst_48 = arith.constant dense<0.000000e+00> : vector<2x8x8xf32>
    %105 = tpu.matmul %104, %91, %cst_48 {dimension_numbers = #tpu.dot_dimension_numbers<[2], [1], [1], [2], [0, 0, 0, 1, 1, 2], [0], [0]>} : vector<2x8x8xf32>, vector<2x8x8xf32>, vector<2x8x8xf32> -> vector<2x8x8xf32>
    "tpu.trace_stop"() : () -> ()
    %106 = vector.shape_cast %105 : vector<2x8x8xf32> to vector<16x8xf32>
    %107 = vector.extract_strided_slice %8 {offsets = [24, 0], sizes = [8, 32], strides = [1, 1]} : vector<32x32xf32> to vector<8x32xf32>
    %cst_49 = arith.constant dense<0.000000e+00> : vector<16x32xf32>
    %108 = tpu.matmul %106, %107, %cst_49 {dimension_numbers = #tpu.dot_dimension_numbers<[1], [0], [0], [1], [0, 0, 1, 1], [], []>} : vector<16x8xf32>, vector<8x32xf32>, vector<16x32xf32> -> vector<16x32xf32>
    %109 = arith.addf %88, %108 : vector<16x32xf32>
    %110 = vector.broadcast %9 : vector<1x32xf32> to vector<16x32xf32>
    %111 = arith.addf %109, %110 : vector<16x32xf32>
    %112 = arith.addf %111, %6 : vector<16x32xf32>
    %cst_50 = arith.constant dense<0.000000e+00> : vector<16xf32>
    %113 = vector.multi_reduction <add>, %112, %cst_50 [1] : vector<16x32xf32> to vector<16xf32>
    %114 = vector.shape_cast %113 : vector<16xf32> to vector<16x1xf32>
    %cst_51 = arith.constant 3.200000e+01 : f32
    %115 = vector.broadcast %cst_51 : f32 to vector<16x1xf32>
    %116 = arith.divf %114, %115 : vector<16x1xf32>
    %117 = vector.broadcast %116 : vector<16x1xf32> to vector<16x32xf32>
    %118 = arith.subf %112, %117 : vector<16x32xf32>
    %119 = arith.mulf %118, %118 : vector<16x32xf32>
    %cst_52 = arith.constant dense<0.000000e+00> : vector<16xf32>
    %120 = vector.multi_reduction <add>, %119, %cst_52 [1] : vector<16x32xf32> to vector<16xf32>
    %121 = vector.shape_cast %120 : vector<16xf32> to vector<16x1xf32>
    %cst_53 = arith.constant 3.200000e+01 : f32
    %122 = vector.broadcast %cst_53 : f32 to vector<16x1xf32>
    %123 = arith.divf %121, %122 : vector<16x1xf32>
    %124 = vector.broadcast %116 : vector<16x1xf32> to vector<16x32xf32>
    %125 = arith.subf %112, %124 : vector<16x32xf32>
    %cst_54 = arith.constant 9.99999974E-6 : f32
    %126 = vector.broadcast %cst_54 : f32 to vector<16x1xf32>
    %127 = arith.addf %123, %126 : vector<16x1xf32>
    %128 = math.rsqrt %127 : vector<16x1xf32>
    %129 = vector.broadcast %128 : vector<16x1xf32> to vector<16x32xf32>
    %130 = arith.mulf %125, %129 : vector<16x32xf32>
    %131 = vector.broadcast %10 : vector<1x32xf32> to vector<16x32xf32>
    %132 = arith.mulf %130, %131 : vector<16x32xf32>
    %133 = vector.broadcast %11 : vector<1x32xf32> to vector<16x32xf32>
    %134 = arith.addf %132, %133 : vector<16x32xf32>
    %cst_55 = arith.constant dense<0.000000e+00> : vector<16x128xf32>
    %135 = tpu.matmul %134, %12, %cst_55 {dimension_numbers = #tpu.dot_dimension_numbers<[1], [0], [0], [1], [0, 0, 1, 1], [], []>} : vector<16x32xf32>, vector<32x128xf32>, vector<16x128xf32> -> vector<16x128xf32>
    %136 = vector.broadcast %13 : vector<1x128xf32> to vector<16x128xf32>
    %137 = arith.addf %135, %136 : vector<16x128xf32>
    %cst_56 = arith.constant 0.000000e+00 : f32
    %138 = vector.broadcast %cst_56 : f32 to vector<16x128xf32>
    %139 = arith.maximumf %137, %138 : vector<16x128xf32>
    %cst_57 = arith.constant dense<0.000000e+00> : vector<16x32xf32>
    %140 = tpu.matmul %139, %14, %cst_57 {dimension_numbers = #tpu.dot_dimension_numbers<[1], [0], [0], [1], [0, 0, 1, 1], [], []>} : vector<16x128xf32>, vector<128x32xf32>, vector<16x32xf32> -> vector<16x32xf32>
    %141 = vector.broadcast %15 : vector<1x32xf32> to vector<16x32xf32>
    %142 = arith.addf %140, %141 : vector<16x32xf32>
    %143 = arith.addf %142, %134 : vector<16x32xf32>
    %cst_58 = arith.constant dense<0.000000e+00> : vector<16xf32>
    %144 = vector.multi_reduction <add>, %143, %cst_58 [1] : vector<16x32xf32> to vector<16xf32>
    %145 = vector.shape_cast %144 : vector<16xf32> to vector<16x1xf32>
    %cst_59 = arith.constant 3.200000e+01 : f32
    %146 = vector.broadcast %cst_59 : f32 to vector<16x1xf32>
    %147 = arith.divf %145, %146 : vector<16x1xf32>
    %148 = vector.broadcast %147 : vector<16x1xf32> to vector<16x32xf32>
    %149 = arith.subf %143, %148 : vector<16x32xf32>
    %150 = arith.mulf %149, %149 : vector<16x32xf32>
    %cst_60 = arith.constant dense<0.000000e+00> : vector<16xf32>
    %151 = vector.multi_reduction <add>, %150, %cst_60 [1] : vector<16x32xf32> to vector<16xf32>
    %152 = vector.shape_cast %151 : vector<16xf32> to vector<16x1xf32>
    %cst_61 = arith.constant 3.200000e+01 : f32
    %153 = vector.broadcast %cst_61 : f32 to vector<16x1xf32>
    %154 = arith.divf %152, %153 : vector<16x1xf32>
    %155 = vector.broadcast %147 : vector<16x1xf32> to vector<16x32xf32>
    %156 = arith.subf %143, %155 : vector<16x32xf32>
    %cst_62 = arith.constant 9.99999974E-6 : f32
    %157 = vector.broadcast %cst_62 : f32 to vector<16x1xf32>
    %158 = arith.addf %154, %157 : vector<16x1xf32>
    %159 = math.rsqrt %158 : vector<16x1xf32>
    %160 = vector.broadcast %159 : vector<16x1xf32> to vector<16x32xf32>
    %161 = arith.mulf %156, %160 : vector<16x32xf32>
    %162 = vector.broadcast %16 : vector<1x32xf32> to vector<16x32xf32>
    %163 = arith.mulf %161, %162 : vector<16x32xf32>
    %164 = vector.broadcast %17 : vector<1x32xf32> to vector<16x32xf32>
    %165 = arith.addf %163, %164 : vector<16x32xf32>
    %c0_63 = arith.constant 0 : index
    %c0_64 = arith.constant 0 : index
    %166 = vector.load %arg14[%c0_63, %c0_64] : memref<32x96xf32, #tpu.memory_space<vmem>>, vector<32x96xf32>
    %c0_65 = arith.constant 0 : index
    %c0_66 = arith.constant 0 : index
    %167 = vector.load %arg15[%c0_65, %c0_66] : memref<32x32xf32, #tpu.memory_space<vmem>>, vector<32x32xf32>
    %c0_67 = arith.constant 0 : index
    %c0_68 = arith.constant 0 : index
    %168 = vector.load %arg16[%c0_67, %c0_68] : memref<1x32xf32, #tpu.memory_space<vmem>>, vector<1x32xf32>
    %c0_69 = arith.constant 0 : index
    %c0_70 = arith.constant 0 : index
    %169 = vector.load %arg17[%c0_69, %c0_70] : memref<1x32xf32, #tpu.memory_space<vmem>>, vector<1x32xf32>
    %c0_71 = arith.constant 0 : index
    %c0_72 = arith.constant 0 : index
    %170 = vector.load %arg18[%c0_71, %c0_72] : memref<1x32xf32, #tpu.memory_space<vmem>>, vector<1x32xf32>
    %c0_73 = arith.constant 0 : index
    %c0_74 = arith.constant 0 : index
    %171 = vector.load %arg19[%c0_73, %c0_74] : memref<32x128xf32, #tpu.memory_space<vmem>>, vector<32x128xf32>
    %c0_75 = arith.constant 0 : index
    %c0_76 = arith.constant 0 : index
    %172 = vector.load %arg20[%c0_75, %c0_76] : memref<1x128xf32, #tpu.memory_space<vmem>>, vector<1x128xf32>
    %c0_77 = arith.constant 0 : index
    %c0_78 = arith.constant 0 : index
    %173 = vector.load %arg21[%c0_77, %c0_78] : memref<128x32xf32, #tpu.memory_space<vmem>>, vector<128x32xf32>
    %c0_79 = arith.constant 0 : index
    %c0_80 = arith.constant 0 : index
    %174 = vector.load %arg22[%c0_79, %c0_80] : memref<1x32xf32, #tpu.memory_space<vmem>>, vector<1x32xf32>
    %c0_81 = arith.constant 0 : index
    %c0_82 = arith.constant 0 : index
    %175 = vector.load %arg23[%c0_81, %c0_82] : memref<1x32xf32, #tpu.memory_space<vmem>>, vector<1x32xf32>
    %c0_83 = arith.constant 0 : index
    %c0_84 = arith.constant 0 : index
    %176 = vector.load %arg24[%c0_83, %c0_84] : memref<1x32xf32, #tpu.memory_space<vmem>>, vector<1x32xf32>
    %cst_85 = arith.constant dense<0.000000e+00> : vector<16x96xf32>
    %177 = tpu.matmul %165, %166, %cst_85 {dimension_numbers = #tpu.dot_dimension_numbers<[1], [0], [0], [1], [0, 0, 1, 1], [], []>} : vector<16x32xf32>, vector<32x96xf32>, vector<16x96xf32> -> vector<16x96xf32>
    %178 = vector.extract_strided_slice %177 {offsets = [0, 0], sizes = [16, 32], strides = [1, 1]} : vector<16x96xf32> to vector<16x32xf32>
    %179 = vector.shape_cast %178 : vector<16x32xf32> to vector<2x8x32xf32>
    %180 = vector.extract_strided_slice %177 {offsets = [0, 32], sizes = [16, 32], strides = [1, 1]} : vector<16x96xf32> to vector<16x32xf32>
    %181 = vector.shape_cast %180 : vector<16x32xf32> to vector<2x8x32xf32>
    %182 = vector.extract_strided_slice %177 {offsets = [0, 64], sizes = [16, 32], strides = [1, 1]} : vector<16x96xf32> to vector<16x32xf32>
    %183 = vector.shape_cast %182 : vector<16x32xf32> to vector<2x8x32xf32>
    %cst_86 = arith.constant 0.000000e+00 : f32
    %184 = vector.broadcast %cst_86 : f32 to vector<16x32xf32>
    %185 = vector.extract_strided_slice %179 {offsets = [0, 0, 0], sizes = [2, 8, 8], strides = [1, 1, 1]} : vector<2x8x32xf32> to vector<2x8x8xf32>
    %186 = vector.extract_strided_slice %181 {offsets = [0, 0, 0], sizes = [2, 8, 8], strides = [1, 1, 1]} : vector<2x8x32xf32> to vector<2x8x8xf32>
    %187 = vector.extract_strided_slice %183 {offsets = [0, 0, 0], sizes = [2, 8, 8], strides = [1, 1, 1]} : vector<2x8x32xf32> to vector<2x8x8xf32>
    "tpu.trace_start"() <{level = 10 : i32, message = "nqd,nkd->nqk"}> : () -> ()
    %cst_87 = arith.constant dense<0.000000e+00> : vector<2x8x8xf32>
    %188 = tpu.matmul %185, %186, %cst_87 {dimension_numbers = #tpu.dot_dimension_numbers<[2], [2], [1], [1], [0, 0, 0, 1, 1, 1], [0], [0]>} : vector<2x8x8xf32>, vector<2x8x8xf32>, vector<2x8x8xf32> -> vector<2x8x8xf32>
    "tpu.trace_stop"() : () -> ()
    %cst_88 = arith.constant 0.176776692 : f32
    %189 = vector.broadcast %cst_88 : f32 to vector<2x8x8xf32>
    %190 = arith.mulf %188, %189 : vector<2x8x8xf32>
    %cst_89 = arith.constant dense<0xFF800000> : vector<2x8xf32>
    %191 = vector.multi_reduction <maximumf>, %190, %cst_89 [2] : vector<2x8x8xf32> to vector<2x8xf32>
    %192 = vector.shape_cast %191 : vector<2x8xf32> to vector<2x8x1xf32>
    %193 = vector.broadcast %192 : vector<2x8x1xf32> to vector<2x8x8xf32>
    %194 = arith.subf %190, %193 : vector<2x8x8xf32>
    %195 = math.exp %194 : vector<2x8x8xf32>
    %cst_90 = arith.constant dense<0.000000e+00> : vector<2x8xf32>
    %196 = vector.multi_reduction <add>, %195, %cst_90 [2] : vector<2x8x8xf32> to vector<2x8xf32>
    %197 = vector.shape_cast %196 : vector<2x8xf32> to vector<2x8x1xf32>
    %198 = tpu.reciprocal %197 {approx = true} : vector<2x8x1xf32> -> vector<2x8x1xf32>
    %199 = vector.broadcast %198 : vector<2x8x1xf32> to vector<2x8x8xf32>
    %200 = arith.mulf %195, %199 : vector<2x8x8xf32>
    "tpu.trace_start"() <{level = 10 : i32, message = "nqk,nkd->nqd"}> : () -> ()
    %cst_91 = arith.constant dense<0.000000e+00> : vector<2x8x8xf32>
    %201 = tpu.matmul %200, %187, %cst_91 {dimension_numbers = #tpu.dot_dimension_numbers<[2], [1], [1], [2], [0, 0, 0, 1, 1, 2], [0], [0]>} : vector<2x8x8xf32>, vector<2x8x8xf32>, vector<2x8x8xf32> -> vector<2x8x8xf32>
    "tpu.trace_stop"() : () -> ()
    %202 = vector.shape_cast %201 : vector<2x8x8xf32> to vector<16x8xf32>
    %203 = vector.extract_strided_slice %167 {offsets = [0, 0], sizes = [8, 32], strides = [1, 1]} : vector<32x32xf32> to vector<8x32xf32>
    %cst_92 = arith.constant dense<0.000000e+00> : vector<16x32xf32>
    %204 = tpu.matmul %202, %203, %cst_92 {dimension_numbers = #tpu.dot_dimension_numbers<[1], [0], [0], [1], [0, 0, 1, 1], [], []>} : vector<16x8xf32>, vector<8x32xf32>, vector<16x32xf32> -> vector<16x32xf32>
    %205 = arith.addf %184, %204 : vector<16x32xf32>
    %206 = vector.extract_strided_slice %179 {offsets = [0, 0, 8], sizes = [2, 8, 8], strides = [1, 1, 1]} : vector<2x8x32xf32> to vector<2x8x8xf32>
    %207 = vector.extract_strided_slice %181 {offsets = [0, 0, 8], sizes = [2, 8, 8], strides = [1, 1, 1]} : vector<2x8x32xf32> to vector<2x8x8xf32>
    %208 = vector.extract_strided_slice %183 {offsets = [0, 0, 8], sizes = [2, 8, 8], strides = [1, 1, 1]} : vector<2x8x32xf32> to vector<2x8x8xf32>
    "tpu.trace_start"() <{level = 10 : i32, message = "nqd,nkd->nqk"}> : () -> ()
    %cst_93 = arith.constant dense<0.000000e+00> : vector<2x8x8xf32>
    %209 = tpu.matmul %206, %207, %cst_93 {dimension_numbers = #tpu.dot_dimension_numbers<[2], [2], [1], [1], [0, 0, 0, 1, 1, 1], [0], [0]>} : vector<2x8x8xf32>, vector<2x8x8xf32>, vector<2x8x8xf32> -> vector<2x8x8xf32>
    "tpu.trace_stop"() : () -> ()
    %cst_94 = arith.constant 0.176776692 : f32
    %210 = vector.broadcast %cst_94 : f32 to vector<2x8x8xf32>
    %211 = arith.mulf %209, %210 : vector<2x8x8xf32>
    %cst_95 = arith.constant dense<0xFF800000> : vector<2x8xf32>
    %212 = vector.multi_reduction <maximumf>, %211, %cst_95 [2] : vector<2x8x8xf32> to vector<2x8xf32>
    %213 = vector.shape_cast %212 : vector<2x8xf32> to vector<2x8x1xf32>
    %214 = vector.broadcast %213 : vector<2x8x1xf32> to vector<2x8x8xf32>
    %215 = arith.subf %211, %214 : vector<2x8x8xf32>
    %216 = math.exp %215 : vector<2x8x8xf32>
    %cst_96 = arith.constant dense<0.000000e+00> : vector<2x8xf32>
    %217 = vector.multi_reduction <add>, %216, %cst_96 [2] : vector<2x8x8xf32> to vector<2x8xf32>
    %218 = vector.shape_cast %217 : vector<2x8xf32> to vector<2x8x1xf32>
    %219 = tpu.reciprocal %218 {approx = true} : vector<2x8x1xf32> -> vector<2x8x1xf32>
    %220 = vector.broadcast %219 : vector<2x8x1xf32> to vector<2x8x8xf32>
    %221 = arith.mulf %216, %220 : vector<2x8x8xf32>
    "tpu.trace_start"() <{level = 10 : i32, message = "nqk,nkd->nqd"}> : () -> ()
    %cst_97 = arith.constant dense<0.000000e+00> : vector<2x8x8xf32>
    %222 = tpu.matmul %221, %208, %cst_97 {dimension_numbers = #tpu.dot_dimension_numbers<[2], [1], [1], [2], [0, 0, 0, 1, 1, 2], [0], [0]>} : vector<2x8x8xf32>, vector<2x8x8xf32>, vector<2x8x8xf32> -> vector<2x8x8xf32>
    "tpu.trace_stop"() : () -> ()
    %223 = vector.shape_cast %222 : vector<2x8x8xf32> to vector<16x8xf32>
    %224 = vector.extract_strided_slice %167 {offsets = [8, 0], sizes = [8, 32], strides = [1, 1]} : vector<32x32xf32> to vector<8x32xf32>
    %cst_98 = arith.constant dense<0.000000e+00> : vector<16x32xf32>
    %225 = tpu.matmul %223, %224, %cst_98 {dimension_numbers = #tpu.dot_dimension_numbers<[1], [0], [0], [1], [0, 0, 1, 1], [], []>} : vector<16x8xf32>, vector<8x32xf32>, vector<16x32xf32> -> vector<16x32xf32>
    %226 = arith.addf %205, %225 : vector<16x32xf32>
    %227 = vector.extract_strided_slice %179 {offsets = [0, 0, 16], sizes = [2, 8, 8], strides = [1, 1, 1]} : vector<2x8x32xf32> to vector<2x8x8xf32>
    %228 = vector.extract_strided_slice %181 {offsets = [0, 0, 16], sizes = [2, 8, 8], strides = [1, 1, 1]} : vector<2x8x32xf32> to vector<2x8x8xf32>
    %229 = vector.extract_strided_slice %183 {offsets = [0, 0, 16], sizes = [2, 8, 8], strides = [1, 1, 1]} : vector<2x8x32xf32> to vector<2x8x8xf32>
    "tpu.trace_start"() <{level = 10 : i32, message = "nqd,nkd->nqk"}> : () -> ()
    %cst_99 = arith.constant dense<0.000000e+00> : vector<2x8x8xf32>
    %230 = tpu.matmul %227, %228, %cst_99 {dimension_numbers = #tpu.dot_dimension_numbers<[2], [2], [1], [1], [0, 0, 0, 1, 1, 1], [0], [0]>} : vector<2x8x8xf32>, vector<2x8x8xf32>, vector<2x8x8xf32> -> vector<2x8x8xf32>
    "tpu.trace_stop"() : () -> ()
    %cst_100 = arith.constant 0.176776692 : f32
    %231 = vector.broadcast %cst_100 : f32 to vector<2x8x8xf32>
    %232 = arith.mulf %230, %231 : vector<2x8x8xf32>
    %cst_101 = arith.constant dense<0xFF800000> : vector<2x8xf32>
    %233 = vector.multi_reduction <maximumf>, %232, %cst_101 [2] : vector<2x8x8xf32> to vector<2x8xf32>
    %234 = vector.shape_cast %233 : vector<2x8xf32> to vector<2x8x1xf32>
    %235 = vector.broadcast %234 : vector<2x8x1xf32> to vector<2x8x8xf32>
    %236 = arith.subf %232, %235 : vector<2x8x8xf32>
    %237 = math.exp %236 : vector<2x8x8xf32>
    %cst_102 = arith.constant dense<0.000000e+00> : vector<2x8xf32>
    %238 = vector.multi_reduction <add>, %237, %cst_102 [2] : vector<2x8x8xf32> to vector<2x8xf32>
    %239 = vector.shape_cast %238 : vector<2x8xf32> to vector<2x8x1xf32>
    %240 = tpu.reciprocal %239 {approx = true} : vector<2x8x1xf32> -> vector<2x8x1xf32>
    %241 = vector.broadcast %240 : vector<2x8x1xf32> to vector<2x8x8xf32>
    %242 = arith.mulf %237, %241 : vector<2x8x8xf32>
    "tpu.trace_start"() <{level = 10 : i32, message = "nqk,nkd->nqd"}> : () -> ()
    %cst_103 = arith.constant dense<0.000000e+00> : vector<2x8x8xf32>
    %243 = tpu.matmul %242, %229, %cst_103 {dimension_numbers = #tpu.dot_dimension_numbers<[2], [1], [1], [2], [0, 0, 0, 1, 1, 2], [0], [0]>} : vector<2x8x8xf32>, vector<2x8x8xf32>, vector<2x8x8xf32> -> vector<2x8x8xf32>
    "tpu.trace_stop"() : () -> ()
    %244 = vector.shape_cast %243 : vector<2x8x8xf32> to vector<16x8xf32>
    %245 = vector.extract_strided_slice %167 {offsets = [16, 0], sizes = [8, 32], strides = [1, 1]} : vector<32x32xf32> to vector<8x32xf32>
    %cst_104 = arith.constant dense<0.000000e+00> : vector<16x32xf32>
    %246 = tpu.matmul %244, %245, %cst_104 {dimension_numbers = #tpu.dot_dimension_numbers<[1], [0], [0], [1], [0, 0, 1, 1], [], []>} : vector<16x8xf32>, vector<8x32xf32>, vector<16x32xf32> -> vector<16x32xf32>
    %247 = arith.addf %226, %246 : vector<16x32xf32>
    %248 = vector.extract_strided_slice %179 {offsets = [0, 0, 24], sizes = [2, 8, 8], strides = [1, 1, 1]} : vector<2x8x32xf32> to vector<2x8x8xf32>
    %249 = vector.extract_strided_slice %181 {offsets = [0, 0, 24], sizes = [2, 8, 8], strides = [1, 1, 1]} : vector<2x8x32xf32> to vector<2x8x8xf32>
    %250 = vector.extract_strided_slice %183 {offsets = [0, 0, 24], sizes = [2, 8, 8], strides = [1, 1, 1]} : vector<2x8x32xf32> to vector<2x8x8xf32>
    "tpu.trace_start"() <{level = 10 : i32, message = "nqd,nkd->nqk"}> : () -> ()
    %cst_105 = arith.constant dense<0.000000e+00> : vector<2x8x8xf32>
    %251 = tpu.matmul %248, %249, %cst_105 {dimension_numbers = #tpu.dot_dimension_numbers<[2], [2], [1], [1], [0, 0, 0, 1, 1, 1], [0], [0]>} : vector<2x8x8xf32>, vector<2x8x8xf32>, vector<2x8x8xf32> -> vector<2x8x8xf32>
    "tpu.trace_stop"() : () -> ()
    %cst_106 = arith.constant 0.176776692 : f32
    %252 = vector.broadcast %cst_106 : f32 to vector<2x8x8xf32>
    %253 = arith.mulf %251, %252 : vector<2x8x8xf32>
    %cst_107 = arith.constant dense<0xFF800000> : vector<2x8xf32>
    %254 = vector.multi_reduction <maximumf>, %253, %cst_107 [2] : vector<2x8x8xf32> to vector<2x8xf32>
    %255 = vector.shape_cast %254 : vector<2x8xf32> to vector<2x8x1xf32>
    %256 = vector.broadcast %255 : vector<2x8x1xf32> to vector<2x8x8xf32>
    %257 = arith.subf %253, %256 : vector<2x8x8xf32>
    %258 = math.exp %257 : vector<2x8x8xf32>
    %cst_108 = arith.constant dense<0.000000e+00> : vector<2x8xf32>
    %259 = vector.multi_reduction <add>, %258, %cst_108 [2] : vector<2x8x8xf32> to vector<2x8xf32>
    %260 = vector.shape_cast %259 : vector<2x8xf32> to vector<2x8x1xf32>
    %261 = tpu.reciprocal %260 {approx = true} : vector<2x8x1xf32> -> vector<2x8x1xf32>
    %262 = vector.broadcast %261 : vector<2x8x1xf32> to vector<2x8x8xf32>
    %263 = arith.mulf %258, %262 : vector<2x8x8xf32>
    "tpu.trace_start"() <{level = 10 : i32, message = "nqk,nkd->nqd"}> : () -> ()
    %cst_109 = arith.constant dense<0.000000e+00> : vector<2x8x8xf32>
    %264 = tpu.matmul %263, %250, %cst_109 {dimension_numbers = #tpu.dot_dimension_numbers<[2], [1], [1], [2], [0, 0, 0, 1, 1, 2], [0], [0]>} : vector<2x8x8xf32>, vector<2x8x8xf32>, vector<2x8x8xf32> -> vector<2x8x8xf32>
    "tpu.trace_stop"() : () -> ()
    %265 = vector.shape_cast %264 : vector<2x8x8xf32> to vector<16x8xf32>
    %266 = vector.extract_strided_slice %167 {offsets = [24, 0], sizes = [8, 32], strides = [1, 1]} : vector<32x32xf32> to vector<8x32xf32>
    %cst_110 = arith.constant dense<0.000000e+00> : vector<16x32xf32>
    %267 = tpu.matmul %265, %266, %cst_110 {dimension_numbers = #tpu.dot_dimension_numbers<[1], [0], [0], [1], [0, 0, 1, 1], [], []>} : vector<16x8xf32>, vector<8x32xf32>, vector<16x32xf32> -> vector<16x32xf32>
    %268 = arith.addf %247, %267 : vector<16x32xf32>
    %269 = vector.broadcast %168 : vector<1x32xf32> to vector<16x32xf32>
    %270 = arith.addf %268, %269 : vector<16x32xf32>
    %271 = arith.addf %270, %165 : vector<16x32xf32>
    %cst_111 = arith.constant dense<0.000000e+00> : vector<16xf32>
    %272 = vector.multi_reduction <add>, %271, %cst_111 [1] : vector<16x32xf32> to vector<16xf32>
    %273 = vector.shape_cast %272 : vector<16xf32> to vector<16x1xf32>
    %cst_112 = arith.constant 3.200000e+01 : f32
    %274 = vector.broadcast %cst_112 : f32 to vector<16x1xf32>
    %275 = arith.divf %273, %274 : vector<16x1xf32>
    %276 = vector.broadcast %275 : vector<16x1xf32> to vector<16x32xf32>
    %277 = arith.subf %271, %276 : vector<16x32xf32>
    %278 = arith.mulf %277, %277 : vector<16x32xf32>
    %cst_113 = arith.constant dense<0.000000e+00> : vector<16xf32>
    %279 = vector.multi_reduction <add>, %278, %cst_113 [1] : vector<16x32xf32> to vector<16xf32>
    %280 = vector.shape_cast %279 : vector<16xf32> to vector<16x1xf32>
    %cst_114 = arith.constant 3.200000e+01 : f32
    %281 = vector.broadcast %cst_114 : f32 to vector<16x1xf32>
    %282 = arith.divf %280, %281 : vector<16x1xf32>
    %283 = vector.broadcast %275 : vector<16x1xf32> to vector<16x32xf32>
    %284 = arith.subf %271, %283 : vector<16x32xf32>
    %cst_115 = arith.constant 9.99999974E-6 : f32
    %285 = vector.broadcast %cst_115 : f32 to vector<16x1xf32>
    %286 = arith.addf %282, %285 : vector<16x1xf32>
    %287 = math.rsqrt %286 : vector<16x1xf32>
    %288 = vector.broadcast %287 : vector<16x1xf32> to vector<16x32xf32>
    %289 = arith.mulf %284, %288 : vector<16x32xf32>
    %290 = vector.broadcast %169 : vector<1x32xf32> to vector<16x32xf32>
    %291 = arith.mulf %289, %290 : vector<16x32xf32>
    %292 = vector.broadcast %170 : vector<1x32xf32> to vector<16x32xf32>
    %293 = arith.addf %291, %292 : vector<16x32xf32>
    %cst_116 = arith.constant dense<0.000000e+00> : vector<16x128xf32>
    %294 = tpu.matmul %293, %171, %cst_116 {dimension_numbers = #tpu.dot_dimension_numbers<[1], [0], [0], [1], [0, 0, 1, 1], [], []>} : vector<16x32xf32>, vector<32x128xf32>, vector<16x128xf32> -> vector<16x128xf32>
    %295 = vector.broadcast %172 : vector<1x128xf32> to vector<16x128xf32>
    %296 = arith.addf %294, %295 : vector<16x128xf32>
    %cst_117 = arith.constant 0.000000e+00 : f32
    %297 = vector.broadcast %cst_117 : f32 to vector<16x128xf32>
    %298 = arith.maximumf %296, %297 : vector<16x128xf32>
    %cst_118 = arith.constant dense<0.000000e+00> : vector<16x32xf32>
    %299 = tpu.matmul %298, %173, %cst_118 {dimension_numbers = #tpu.dot_dimension_numbers<[1], [0], [0], [1], [0, 0, 1, 1], [], []>} : vector<16x128xf32>, vector<128x32xf32>, vector<16x32xf32> -> vector<16x32xf32>
    %300 = vector.broadcast %174 : vector<1x32xf32> to vector<16x32xf32>
    %301 = arith.addf %299, %300 : vector<16x32xf32>
    %302 = arith.addf %301, %293 : vector<16x32xf32>
    %cst_119 = arith.constant dense<0.000000e+00> : vector<16xf32>
    %303 = vector.multi_reduction <add>, %302, %cst_119 [1] : vector<16x32xf32> to vector<16xf32>
    %304 = vector.shape_cast %303 : vector<16xf32> to vector<16x1xf32>
    %cst_120 = arith.constant 3.200000e+01 : f32
    %305 = vector.broadcast %cst_120 : f32 to vector<16x1xf32>
    %306 = arith.divf %304, %305 : vector<16x1xf32>
    %307 = vector.broadcast %306 : vector<16x1xf32> to vector<16x32xf32>
    %308 = arith.subf %302, %307 : vector<16x32xf32>
    %309 = arith.mulf %308, %308 : vector<16x32xf32>
    %cst_121 = arith.constant dense<0.000000e+00> : vector<16xf32>
    %310 = vector.multi_reduction <add>, %309, %cst_121 [1] : vector<16x32xf32> to vector<16xf32>
    %311 = vector.shape_cast %310 : vector<16xf32> to vector<16x1xf32>
    %cst_122 = arith.constant 3.200000e+01 : f32
    %312 = vector.broadcast %cst_122 : f32 to vector<16x1xf32>
    %313 = arith.divf %311, %312 : vector<16x1xf32>
    %314 = vector.broadcast %306 : vector<16x1xf32> to vector<16x32xf32>
    %315 = arith.subf %302, %314 : vector<16x32xf32>
    %cst_123 = arith.constant 9.99999974E-6 : f32
    %316 = vector.broadcast %cst_123 : f32 to vector<16x1xf32>
    %317 = arith.addf %313, %316 : vector<16x1xf32>
    %318 = math.rsqrt %317 : vector<16x1xf32>
    %319 = vector.broadcast %318 : vector<16x1xf32> to vector<16x32xf32>
    %320 = arith.mulf %315, %319 : vector<16x32xf32>
    %321 = vector.broadcast %175 : vector<1x32xf32> to vector<16x32xf32>
    %322 = arith.mulf %320, %321 : vector<16x32xf32>
    %323 = vector.broadcast %176 : vector<1x32xf32> to vector<16x32xf32>
    %324 = arith.addf %322, %323 : vector<16x32xf32>
    %c0_124 = arith.constant 0 : index
    %c0_125 = arith.constant 0 : index
    %325 = vector.load %arg25[%c0_124, %c0_125] : memref<32x512xf32, #tpu.memory_space<vmem>>, vector<32x512xf32>
    %c0_126 = arith.constant 0 : index
    %c0_127 = arith.constant 0 : index
    %326 = vector.load %arg26[%c0_126, %c0_127] : memref<1x512xf32, #tpu.memory_space<vmem>>, vector<1x512xf32>
    %c0_128 = arith.constant 0 : index
    %c0_129 = arith.constant 0 : index
    %327 = vector.load %arg27[%c0_128, %c0_129] : memref<1x1xf32, #tpu.memory_space<vmem>>, vector<1x1xf32>
    %c0_130 = arith.constant 0 : index
    %c0_131 = arith.constant 0 : index
    %328 = vector.load %arg28[%c0_130, %c0_131] : memref<512x3xf32, #tpu.memory_space<vmem>>, vector<512x3xf32>
    %c0_132 = arith.constant 0 : index
    %c0_133 = arith.constant 0 : index
    %329 = vector.load %arg29[%c0_132, %c0_133] : memref<1x3xf32, #tpu.memory_space<vmem>>, vector<1x3xf32>
    %330 = vector.shape_cast %324 : vector<16x32xf32> to vector<2x8x32xf32>
    %cst_134 = arith.constant dense<0.000000e+00> : vector<2x32xf32>
    %331 = vector.multi_reduction <add>, %330, %cst_134 [1] : vector<2x8x32xf32> to vector<2x32xf32>
    %cst_135 = arith.constant 8.000000e+00 : f32
    %332 = vector.broadcast %cst_135 : f32 to vector<2x32xf32>
    %333 = arith.divf %331, %332 : vector<2x32xf32>
    %cst_136 = arith.constant dense<0.000000e+00> : vector<2x512xf32>
    %334 = tpu.matmul %333, %325, %cst_136 {dimension_numbers = #tpu.dot_dimension_numbers<[1], [0], [0], [1], [0, 0, 1, 1], [], []>} : vector<2x32xf32>, vector<32x512xf32>, vector<2x512xf32> -> vector<2x512xf32>
    %335 = vector.broadcast %326 : vector<1x512xf32> to vector<2x512xf32>
    %336 = arith.addf %334, %335 : vector<2x512xf32>
    %cst_137 = arith.constant 0.000000e+00 : f32
    %337 = vector.broadcast %cst_137 : f32 to vector<2x512xf32>
    %338 = arith.cmpf ogt, %336, %337 : vector<2x512xf32>
    %339 = vector.broadcast %327 : vector<1x1xf32> to vector<2x512xf32>
    %340 = arith.mulf %339, %336 : vector<2x512xf32>
    %341 = arith.select %338, %336, %340 : vector<2x512xi1>, vector<2x512xf32>
    %cst_138 = arith.constant dense<0.000000e+00> : vector<2x3xf32>
    %342 = tpu.matmul %341, %328, %cst_138 {dimension_numbers = #tpu.dot_dimension_numbers<[1], [0], [0], [1], [0, 0, 1, 1], [], []>} : vector<2x512xf32>, vector<512x3xf32>, vector<2x3xf32> -> vector<2x3xf32>
    %343 = vector.broadcast %329 : vector<1x3xf32> to vector<2x3xf32>
    %344 = arith.addf %342, %343 : vector<2x3xf32>
    %cst_139 = arith.constant dense<0xFF800000> : vector<2xf32>
    %345 = vector.multi_reduction <maximumf>, %344, %cst_139 [1] : vector<2x3xf32> to vector<2xf32>
    %346 = vector.shape_cast %345 : vector<2xf32> to vector<2x1xf32>
    %347 = vector.broadcast %346 : vector<2x1xf32> to vector<2x3xf32>
    %348 = arith.subf %344, %347 : vector<2x3xf32>
    %349 = math.exp %348 : vector<2x3xf32>
    %cst_140 = arith.constant dense<0.000000e+00> : vector<2xf32>
    %350 = vector.multi_reduction <add>, %349, %cst_140 [1] : vector<2x3xf32> to vector<2xf32>
    %351 = vector.shape_cast %350 : vector<2xf32> to vector<2x1xf32>
    %352 = vector.broadcast %351 : vector<2x1xf32> to vector<2x3xf32>
    %353 = arith.divf %349, %352 : vector<2x3xf32>
    %c0_141 = arith.constant 0 : index
    %c0_142 = arith.constant 0 : index
    %354 = vector.load %arg30[%c0_141, %c0_142] : memref<2x3xf32, #tpu.memory_space<vmem>>, vector<2x3xf32>
    tpu.vector_store %arg30[%c0_141, %c0_142], %353 {strides = array<i32>} : memref<2x3xf32, #tpu.memory_space<vmem>>, vector<2x3xf32>,
    return
  }
  func.func @transform_0(%arg0: i32) -> (i32, i32) {
    %c0_i32 = arith.constant 0 : i32
    %c0_i32_0 = arith.constant 0 : i32
    %c0_i32_1 = arith.constant 0 : i32
    return %c0_i32, %c0_i32_0 : i32, i32
  }
  func.func @transform_1(%arg0: i32) -> (i32, i32) {
    %c0_i32 = arith.constant 0 : i32
    %c0_i32_0 = arith.constant 0 : i32
    %c0_i32_1 = arith.constant 0 : i32
    return %c0_i32, %c0_i32_0 : i32, i32
  }
  func.func @transform_2(%arg0: i32) -> (i32, i32) {
    %c0_i32 = arith.constant 0 : i32
    %c0_i32_0 = arith.constant 0 : i32
    %c0_i32_1 = arith.constant 0 : i32
    return %c0_i32, %c0_i32_0 : i32, i32
  }
  func.func @transform_3(%arg0: i32) -> (i32, i32) {
    %c0_i32 = arith.constant 0 : i32
    %c0_i32_0 = arith.constant 0 : i32
    %c0_i32_1 = arith.constant 0 : i32
    return %c0_i32, %c0_i32_0 : i32, i32
  }
  func.func @transform_4(%arg0: i32) -> (i32, i32) {
    %c0_i32 = arith.constant 0 : i32
    %c0_i32_0 = arith.constant 0 : i32
    %c0_i32_1 = arith.constant 0 : i32
    return %c0_i32, %c0_i32_0 : i32, i32
  }
  func.func @transform_5(%arg0: i32) -> (i32, i32) {
    %c0_i32 = arith.constant 0 : i32
    %c0_i32_0 = arith.constant 0 : i32
    %c0_i32_1 = arith.constant 0 : i32
    return %c0_i32, %c0_i32_0 : i32, i32
  }
  func.func @transform_6(%arg0: i32) -> (i32, i32) {
    %c0_i32 = arith.constant 0 : i32
    %c0_i32_0 = arith.constant 0 : i32
    %c0_i32_1 = arith.constant 0 : i32
    return %c0_i32, %c0_i32_0 : i32, i32
  }
  func.func @transform_7(%arg0: i32) -> (i32, i32) {
    %c0_i32 = arith.constant 0 : i32
    %c0_i32_0 = arith.constant 0 : i32
    %c0_i32_1 = arith.constant 0 : i32
    return %c0_i32, %c0_i32_0 : i32, i32
  }
  func.func @transform_8(%arg0: i32) -> (i32, i32) {
    %c0_i32 = arith.constant 0 : i32
    %c0_i32_0 = arith.constant 0 : i32
    %c0_i32_1 = arith.constant 0 : i32
    return %c0_i32, %c0_i32_0 : i32, i32
  }
  func.func @transform_9(%arg0: i32) -> (i32, i32) {
    %c0_i32 = arith.constant 0 : i32
    %c0_i32_0 = arith.constant 0 : i32
    %c0_i32_1 = arith.constant 0 : i32
    return %c0_i32, %c0_i32_0 : i32, i32
  }
  func.func @transform_10(%arg0: i32) -> (i32, i32) {
    %c0_i32 = arith.constant 0 : i32
    %c0_i32_0 = arith.constant 0 : i32
    %c0_i32_1 = arith.constant 0 : i32
    return %c0_i32, %c0_i32_0 : i32, i32
  }
  func.func @transform_11(%arg0: i32) -> (i32, i32) {
    %c0_i32 = arith.constant 0 : i32
    %c0_i32_0 = arith.constant 0 : i32
    %c0_i32_1 = arith.constant 0 : i32
    return %c0_i32, %c0_i32_0 : i32, i32
  }
  func.func @transform_12(%arg0: i32) -> (i32, i32) {
    %c0_i32 = arith.constant 0 : i32
    %c0_i32_0 = arith.constant 0 : i32
    %c0_i32_1 = arith.constant 0 : i32
    return %c0_i32, %c0_i32_0 : i32, i32
  }
  func.func @transform_13(%arg0: i32) -> (i32, i32) {
    %c0_i32 = arith.constant 0 : i32
    %c0_i32_0 = arith.constant 0 : i32
    %c0_i32_1 = arith.constant 0 : i32
    return %c0_i32, %c0_i32_0 : i32, i32
  }
  func.func @transform_14(%arg0: i32) -> (i32, i32) {
    %c0_i32 = arith.constant 0 : i32
    %c0_i32_0 = arith.constant 0 : i32
    %c0_i32_1 = arith.constant 0 : i32
    return %c0_i32, %c0_i32_0 : i32, i32
  }
  func.func @transform_15(%arg0: i32) -> (i32, i32) {
    %c0_i32 = arith.constant 0 : i32
    %c0_i32_0 = arith.constant 0 : i32
    %c0_i32_1 = arith.constant 0 : i32
    return %c0_i32, %c0_i32_0 : i32, i32
  }
  func.func @transform_16(%arg0: i32) -> (i32, i32) {
    %c0_i32 = arith.constant 0 : i32
    %c0_i32_0 = arith.constant 0 : i32
    %c0_i32_1 = arith.constant 0 : i32
    return %c0_i32, %c0_i32_0 : i32, i32
  }
  func.func @transform_17(%arg0: i32) -> (i32, i32) {
    %c0_i32 = arith.constant 0 : i32
    %c0_i32_0 = arith.constant 0 : i32
    %c0_i32_1 = arith.constant 0 : i32
    return %c0_i32, %c0_i32_0 : i32, i32
  }
  func.func @transform_18(%arg0: i32) -> (i32, i32) {
    %c0_i32 = arith.constant 0 : i32
    %c0_i32_0 = arith.constant 0 : i32
    %c0_i32_1 = arith.constant 0 : i32
    return %c0_i32, %c0_i32_0 : i32, i32
  }
  func.func @transform_19(%arg0: i32) -> (i32, i32) {
    %c0_i32 = arith.constant 0 : i32
    %c0_i32_0 = arith.constant 0 : i32
    %c0_i32_1 = arith.constant 0 : i32
    return %c0_i32, %c0_i32_0 : i32, i32
  }
  func.func @transform_20(%arg0: i32) -> (i32, i32) {
    %c0_i32 = arith.constant 0 : i32
    %c0_i32_0 = arith.constant 0 : i32
    %c0_i32_1 = arith.constant 0 : i32
    return %c0_i32, %c0_i32_0 : i32, i32
  }
  func.func @transform_21(%arg0: i32) -> (i32, i32) {
    %c0_i32 = arith.constant 0 : i32
    %c0_i32_0 = arith.constant 0 : i32
    %c0_i32_1 = arith.constant 0 : i32
    return %c0_i32, %c0_i32_0 : i32, i32
  }
  func.func @transform_22(%arg0: i32) -> (i32, i32) {
    %c0_i32 = arith.constant 0 : i32
    %c0_i32_0 = arith.constant 0 : i32
    %c0_i32_1 = arith.constant 0 : i32
    return %c0_i32, %c0_i32_0 : i32, i32
  }
  func.func @transform_23(%arg0: i32) -> (i32, i32) {
    %c0_i32 = arith.constant 0 : i32
    %c0_i32_0 = arith.constant 0 : i32
    %c0_i32_1 = arith.constant 0 : i32
    return %c0_i32, %c0_i32_0 : i32, i32
  }
  func.func @transform_24(%arg0: i32) -> (i32, i32) {
    %c0_i32 = arith.constant 0 : i32
    %c0_i32_0 = arith.constant 0 : i32
    %c0_i32_1 = arith.constant 0 : i32
    return %c0_i32, %c0_i32_0 : i32, i32
  }
  func.func @transform_25(%arg0: i32) -> (i32, i32) {
    %c0_i32 = arith.constant 0 : i32
    %c0_i32_0 = arith.constant 0 : i32
    %c0_i32_1 = arith.constant 0 : i32
    return %c0_i32, %c0_i32_0 : i32, i32
  }
  func.func @transform_26(%arg0: i32) -> (i32, i32) {
    %c0_i32 = arith.constant 0 : i32
    %c0_i32_0 = arith.constant 0 : i32
    %c0_i32_1 = arith.constant 0 : i32
    return %c0_i32, %c0_i32_0 : i32, i32
  }
  func.func @transform_27(%arg0: i32) -> (i32, i32) {
    %c0_i32 = arith.constant 0 : i32
    %c0_i32_0 = arith.constant 0 : i32
    %c0_i32_1 = arith.constant 0 : i32
    return %c0_i32, %c0_i32_0 : i32, i32
  }
  func.func @transform_28(%arg0: i32) -> (i32, i32) {
    %c0_i32 = arith.constant 0 : i32
    %c0_i32_0 = arith.constant 0 : i32
    %c0_i32_1 = arith.constant 0 : i32
    return %c0_i32, %c0_i32_0 : i32, i32
  }
  func.func @transform_29(%arg0: i32) -> (i32, i32) {
    %c0_i32 = arith.constant 0 : i32
    %c0_i32_0 = arith.constant 0 : i32
    %c0_i32_1 = arith.constant 0 : i32
    return %c0_i32, %c0_i32_0 : i32, i32
  }
}

</mosaic_0001>

<bundles_post_ra>
// kernel: tpu_custom_call.1
= control target key start
LH: loop header
LB: loop body
LE: loop exit
PB: predicated region body
PF: predicated region fallthrough
CT: control target
= control target key end

     0   :  { %s5660_s6 = smov 1   ;;  %s5661_s10 = smov 2   ;;  %s6399_s0 = inlined_call_operand.smem [shape: u32[30], index: -1, kind: input, shape index: {}] }
   0x1   :  { %s5712_s5 = sld [smem:[%s6399_s0]]   ;;  %s5662_s14 = smov 3  }
   0x2   :  { %s5717_s9 = sld [smem:[%s6399_s0 + %s5660_s6]]   ;;  %s5663_s18 = smov 4  }
   0x3   :  { %s5722_s13 = sld [smem:[%s6399_s0 + %s5661_s10]]   ;;  %s5664_s22 = smov 5  }
   0x4   :  { %s5727_s17 = sld [smem:[%s6399_s0 + %s5662_s14]]   ;;  %s5665_s26 = smov 6  }
   0x5   :  { %s5732_s21 = sld [smem:[%s6399_s0 + %s5663_s18]]   ;;  %s5666_s30 = smov 7  }
   0x6   :  { %s5737_s25 = sld [smem:[%s6399_s0 + %s5664_s22]]   ;;  %s5667_s4 = smov 8  }
   0x7   :  { %s5742_s29 = sld [smem:[%s6399_s0 + %s5665_s26]]   ;;  %s5668_s10 = smov 9  }
   0x8   :  { %s5747_s3 = sld [smem:[%s6399_s0 + %s5666_s30]]   ;;  %s5669_s15 = smov 10  }
   0x9   :  { %s5752_s8 = sld [smem:[%s6399_s0 + %s5667_s4]]   ;;  %s5670_s20 = smov 11  }
   0xa   :  { %s5757_s14 = sld [smem:[%s6399_s0 + %s5668_s10]]   ;;  %s5671_s26 = smov 12  }
   0xb   :  { %s5762_s19 = sld [smem:[%s6399_s0 + %s5669_s15]]   ;;  %s5672_s1 = smov 13  }
   0xc   :  { %s5767_s24 = sld [smem:[%s6399_s0 + %s5670_s20]]   ;;  %s5673_s7 = smov 14  }
   0xd   :  { %s5772_s30 = sld [smem:[%s6399_s0 + %s5671_s26]]   ;;  %s5674_s15 = smov 15  }
   0xe   :  { %s5777_s6 = sld [smem:[%s6399_s0 + %s5672_s1]]   ;;  %s5675_s22 = smov 16  }
   0xf   :  { %s5782_s12 = sld [smem:[%s6399_s0 + %s5673_s7]]   ;;  %s5676_s28 = smov 17  }
  0x10   :  { %s5787_s20 = sld [smem:[%s6399_s0 + %s5674_s15]]   ;;  %s5677_s7 = smov 18  }
  0x11   :  { %s5792_s27 = sld [smem:[%s6399_s0 + %s5675_s22]]   ;;  %s5678_s15 = smov 19  }
  0x12   :  { %s5797_s4 = sld [smem:[%s6399_s0 + %s5676_s28]]   ;;  %s5679_s22 = smov 20  }
  0x13   :  { %s5680_s28 = smov 21   ;;  %s5686_s16 = smov 27  }
  0x14   :  { %s5687_s23 = smov 28   ;;  %s5688_s1 = smov 29  }
  0x15   :  { %6404 = sst [smem:[#allocation6_spill]] %s5782_s12 }
  0x16   :  { %6405 = sst [smem:[#allocation7_spill]] %s5787_s20 }
  0x17   :  { %6406 = sst [smem:[#allocation8_spill]] %s5792_s27 }
  0x18   :  { %6407 = sst [smem:[#allocation9_spill]] %s5797_s4 }
  0x19   :  { %s5802_s12 = sld [smem:[%s6399_s0 + %s5677_s7]]   ;;  %s5681_s7 = smov 22  }
  0x1a   :  { %s5807_s20 = sld [smem:[%s6399_s0 + %s5678_s15]]   ;;  %s5682_s15 = smov 23  }
  0x1b   :  { %s5812_s27 = sld [smem:[%s6399_s0 + %s5679_s22]]   ;;  %s5683_s22 = smov 24  }
  0x1c   :  { %s5817_s4 = sld [smem:[%s6399_s0 + %s5680_s28]]   ;;  %s5684_s28 = smov 25  }
  0x1f   :  { %6408 = sst [smem:[#allocation10_spill]] %s5802_s12 }
  0x20   :  { %6409 = sst [smem:[#allocation11_spill]] %s5807_s20 }
  0x21   :  { %6410 = sst [smem:[#allocation12_spill]] %s5812_s27 }
  0x22   :  { %6411 = sst [smem:[#allocation13_spill]] %s5817_s4 }
  0x23   :  { %s5822_s12 = sld [smem:[%s6399_s0 + %s5681_s7]]   ;;  %s5685_s7 = smov 26  }
  0x24   :  { %s5827_s20 = sld [smem:[%s6399_s0 + %s5682_s15]]  }
  0x25   :  { %s5832_s27 = sld [smem:[%s6399_s0 + %s5683_s22]]  }
  0x26   :  { %s5837_s4 = sld [smem:[%s6399_s0 + %s5684_s28]]  }
  0x29   :  { %6412 = sst [smem:[#allocation14_spill]] %s5822_s12 }
  0x2a   :  { %6413 = sst [smem:[#allocation15_spill]] %s5827_s20 }
  0x2b   :  { %6414 = sst [smem:[#allocation16_spill]] %s5832_s27 }
  0x2c   :  { %6415 = sst [smem:[#allocation17_spill]] %s5837_s4 }
  0x2d   :  { %s4693_s12 = sld [smem:[%s6399_s0 + %s5685_s7]]  }
  0x2e   :  { %s5845_s20 = sld [smem:[%s6399_s0 + %s5686_s16]]  }
  0x2f   :  { %s5850_s27 = sld [smem:[%s6399_s0 + %s5687_s23]]  }
  0x30   :  { %s5855_s4 = sld [smem:[%s6399_s0 + %s5688_s1]]  }
  0x33   :  { %v64_v0 = vstv %s4693_s12 }
  0x34   :  { %65 = vst [vmem:[#allocation2] sm:$0x1] %v64_v0 }
  0x35   :  { %v130_v1 = vld [vmem:[%s5722_s13] sm:$0xff]  ;;  %v131_v2 = vld [vmem:[%s5722_s13 + $0x8] sm:$0xff]  ;;  %v132_v3 = vld [vmem:[%s5722_s13 + $0x10] sm:$0xff]  ;;  %vm165_vm0 = vcmask 261120  }
  0x36   :  { %v5319_v4 = vpack.c.bf16 %v131_v2, %v130_v1  ;;  %v133_v5 = vld [vmem:[%s5722_s13 + $0x18] sm:$0xff]  ;;  %v125_v6 = vld [vmem:[%s5712_s5] sm:$0xff] }
  0x37   :  { %v5323_v7 = vpack.c.bf16 %v133_v5, %v132_v3  ;;  %v127_v8 = vld [vmem:[%s5717_s9] sm:$0xff] }
  0x38   :  { %66 = vsyncpa [#allocation4], 0  ;;  %5320 = vmatprep.subr.bf16.mxu1 %v5319_v4  ;;  %v5863_v9 = vadd.f32 %v127_v8, %v125_v6  ;;  %v126_v10 = vld [vmem:[%s5712_s5 + $0x8] sm:$0xff]  ;;  %v5689_v12 = vmov 0.0   ;;  %vm5690_vm1 = vmmov 0   ;;  %s5691_s0 = smov 96  }
  0x39   :  { %5322 = vmatpush3.bf16.msra.mxu1 %v5319_v4  ;;  %v5868_v11 = vadd.f32 %v127_v8, %v126_v10  ;;  %5026 = vmatprep.subr.mxu0 %v5689_v12  ;;  %s5692_s5 = smov 64   ;;  %s5693_s9 = smov 120   ;;  %vm250_vm2 = vcmask 64512   ;;  %vm4328_vm3 = vcmask 1041409   ;;  %vm4641_vm8 = vcmask 17408  }
  0x3a   :  { %5324 = vmatprep.subr.bf16.mxu1 %v5323_v7  ;;  %5013 = vmatprep.mubr.msk.f32.mxu1 %vm165_vm0, %v5863_v9  ;;  %s5694_s13 = smov 88   ;;  %s5695_s12 = smov 80  }
  0x3b   :  { %5028 = vmatprep.mubr.msk.f32.mxu0 %vm5690_vm1, %v5689_v12  ;;  %s5696_s7 = smov 56   ;;  %s5697_s10 = smov 112  }
  0x3c   :  { %s5698_s11 = smov 48   ;;  %s5699_s16 = smov 72  }
  0x3d   :  { %5326 = vmatpush3.bf16.msra.mxu1 %v5323_v7  ;;  %s5700_s15 = smov 104   ;;  %s5701_s18 = smov 40  }
  0x3e   :  { %5016 = vmatprep.subr.mxu1 %v5689_v12  ;;  %s6427_s23 = sld [smem:[#allocation17_spill]] }
  0x40   :  { %5014 = vmatmul.mubr.msk.f32.vlgmr.msra.gmra.mrb[0].mxu1 %vm165_vm0, %v5868_v11 }
  0x41   :  { %5018 = vmatprep.mubr.msk.f32.mxu1 %vm5690_vm1, %v5689_v12 }
 0x113   :  { %v5878_v13 = vpop.f32.mrb[0].mxu1 }
 0x114   :  { %v5880_v14 = vpop.f32.mrb[1].mxu1 }
 0x115   :  { %248 = vrot.lane.b32.xlu0 %v5880_v14, %s5691_s0 }
 0x119   :  { %326 = vrot.lane.b32.xlu0 %v5878_v13, %s5691_s0 }
 0x11d   :  { %502 = vrot.lane.b32.xlu0 %v5878_v13, %s5692_s5 }
 0x121   :  { %656 = vrot.lane.b32.xlu0 %v5878_v13, %s5693_s9 }
 0x187   :  { %v249_v15 = vpop.permute.xlu0 %248 }
 0x188   :  { %5017 = vmatpush3.xpose.msk.msra.mxu1 %vm250_vm2, %v249_v15 }
 0x189   :  { %5021 = vmatprep.subr.mxu1 %v5689_v12 }
 0x18b   :  { %5019 = vmatmul.mubr.msk.f32.vlgmr.msra.gmra.mrb[2].mxu1 %vm250_vm2, %v5880_v14  ;;  %v327_v16 = vpop.permute.xlu0 %326 }
 0x18c   :  { %5022 = vmatpush3.xpose.msk.msra.mxu1 %vm250_vm2, %v327_v16  ;;  %5023 = vmatprep.mubr.msk.f32.mxu1 %vm5690_vm1, %v5689_v12 }
 0x18d   :  { %5031 = vmatprep.subr.mxu1 %v5689_v12 }
 0x18f   :  { %5024 = vmatmul.mubr.msk.f32.vlgmr.msra.gmra.mrb[4].mxu1 %vm250_vm2, %v5878_v13  ;;  %v503_v17 = vpop.permute.xlu0 %502 }
 0x190   :  { %5032 = vmatpush3.msra.mxu1 %v503_v17  ;;  %5033 = vmatprep.mubr.msk.f32.mxu1 %vm5690_vm1, %v5689_v12 }
 0x191   :  { %5041 = vmatprep.subr.mxu1 %v5689_v12 }
 0x193   :  { %v657_v26 = vpop.permute.xlu0 %656 }
 0x25e   :  { %v321_v18 = vpop.f32.mrb[2].mxu1 }
 0x25f   :  { %v402_v19 = vmul.f32 0.17677669, %v321_v18  ;;  %v5020_v20 = vpop.f32.mrb[3].mxu1 }
 0x261   :  { %v404_v21 = vsel %vm250_vm2, %v402_v19, -inf }
 0x262   :  { %405 = vmax.xlane.f32.xlu0 %v404_v21  ;;  %v398_v22 = vpop.f32.mrb[4].mxu1 }
 0x263   :  { %v403_v23 = vmul.f32 0.17677669, %v398_v22  ;;  %v5025_v24 = vpop.f32.mrb[5].mxu1  ;;  %v135_v22 = vld [vmem:[%s5727_s17 + $0x8] sm:$0xff] }
 0x265   :  { %v407_v25 = vsel %vm250_vm2, %v403_v23, -inf }
 0x266   :  { %408 = vmax.xlane.f32.xlu1 %v407_v25 }
 0x278   :  { %426 = vrot.lane.b32.xlu0 %v5880_v14, %s5692_s5 }
 0x27c   :  { %578 = vrot.lane.b32.xlu0 %v5880_v14, %s5693_s9 }
 0x2ef   :  { %v406_v27 = vpop.xlane.xlu0 %405 }
 0x2f0   :  { %v410_v34 = vsub.f32 %v402_v19, %v406_v27 }
 0x2f2   :  { %v412_v35 = vmul.f32 1.442695, %v410_v34 }
 0x2f3   :  { %v409_v28 = vpop.xlane.xlu1 %408  ;;  %v427_v29 = vpop.permute.xlu0 %426 }
 0x2f4   :  { %v411_v30 = vsub.f32 %v403_v23, %v409_v28  ;;  %5027 = vmatpush3.msra.mxu0 %v427_v29  ;;  %v134_v23 = vld [vmem:[%s5727_s17] sm:$0xff] }
 0x2f5   :  { %5036 = vmatprep.subr.mxu0 %v5689_v12 }
 0x2f6   :  { %v414_v31 = vmul.f32 1.442695, %v411_v30 }
 0x2f7   :  { %v579_v46 = vpop.permute.xlu0 %578 }
 0x2f8   :  { %5552 = vpow2.f32 %v414_v31 }
 0x2f9   :  { %5554 = vpow2.f32 %v412_v35 }
 0x302   :  { %v5553_v32 = vpop.eup %5552 }
 0x303   :  { %v419_v33 = vsel %vm250_vm2, %v5553_v32, 0.0  ;;  %v5555_v36 = vpop.eup %5554 }
 0x304   :  { %420 = vadd.xlane.f32.xlu1 %v419_v33  ;;  %v416_v37 = vsel %vm250_vm2, %v5555_v36, 0.0 }
 0x315   :  { %658 = vrot.lane.b32.xlu1 %v5878_v13, %s5694_s13 }
 0x339   :  { %417 = vadd.xlane.f32.xlu1 %v416_v37 }
 0x34a   :  { %580 = vrot.lane.b32.xlu1 %v5880_v14, %s5694_s13 }
 0x34e   :  { %1074 = vrot.lane.b32.xlu1 %v5880_v14, %s5695_s12 }
 0x391   :  { %v421_v38 = vpop.xlane.xlu1 %420 }
 0x392   :  { %5556 = vrcp.f32 %v421_v38 }
 0x395   :  { %v659_v41 = vpop.permute.xlu1 %658 }
 0x39c   :  { %v5557_v39 = vpop.eup %5556 }
 0x39d   :  { %v425_v40 = vmul.f32 %v5557_v39, %v5553_v32 }
 0x39f   :  { %5034 = vmatmul.mubr.msk.f32.vlgmr.msra.gmra.mrb[6].mxu1 %vm250_vm2, %v425_v40 }
 0x3a0   :  { %5042 = vmatpush3.xpose.msk.msra.mxu1 %vm250_vm2, %v659_v41  ;;  %5043 = vmatprep.mubr.msk.f32.mxu1 %vm5690_vm1, %v5689_v12 }
 0x3a1   :  { %5051 = vmatprep.subr.mxu1 %v5689_v12 }
 0x3a3   :  { %5044 = vmatmul.mubr.msk.f32.vlgmr.msra.gmra.mrb[8].mxu1 %vm250_vm2, %v657_v26 }
 0x3a4   :  { %5053 = vmatprep.mubr.msk.f32.mxu1 %vm5690_vm1, %v5689_v12 }
 0x3c6   :  { %v418_v42 = vpop.xlane.xlu1 %417 }
 0x3c7   :  { %5558 = vrcp.f32 %v418_v42 }
 0x3ca   :  { %v581_v45 = vpop.permute.xlu1 %580 }
 0x3ce   :  { %v1075_v10 = vpop.permute.xlu1 %1074 }
 0x3d1   :  { %v5559_v43 = vpop.eup %5558 }
 0x3d2   :  { %v424_v44 = vmul.f32 %v5559_v43, %v5555_v36 }
 0x3d4   :  { %5029 = vmatmul.mubr.msk.f32.vlgmr.msra.gmra.mrb[0].mxu0 %vm250_vm2, %v424_v44 }
 0x3d5   :  { %5037 = vmatpush3.xpose.msk.msra.mxu0 %vm250_vm2, %v581_v45  ;;  %5038 = vmatprep.mubr.msk.f32.mxu0 %vm5690_vm1, %v5689_v12 }
 0x3d6   :  { %5046 = vmatprep.subr.mxu0 %v5689_v12 }
 0x3d8   :  { %5039 = vmatmul.mubr.msk.f32.vlgmr.msra.gmra.mrb[2].mxu0 %vm250_vm2, %v579_v46 }
 0x3d9   :  { %5048 = vmatprep.mubr.msk.f32.mxu0 %vm5690_vm1, %v5689_v12 }
 0x472   :  { %v5934_v47 = vpop.f32.mrb[6].mxu1 }
 0x473   :  { %v5035_v48 = vpop.f32.mrb[7].mxu1 }
 0x476   :  { %v730_v49 = vpop.f32.mrb[8].mxu1 }
 0x477   :  { %v735_v50 = vmul.f32 0.17677669, %v730_v49  ;;  %v5045_v51 = vpop.f32.mrb[9].mxu1 }
 0x479   :  { %v739_v52 = vsel %vm250_vm2, %v735_v50, -inf }
 0x47a   :  { %740 = vmax.xlane.f32.xlu0 %v739_v52 }
 0x490   :  { %834 = vrot.lane.b32.xlu0 %v5878_v13, %s5696_s7 }
 0x494   :  { %1072 = vrot.lane.b32.xlu0 %v5880_v14, %s5697_s10 }
 0x498   :  { %1152 = vrot.lane.b32.xlu0 %v5878_v13, %s5695_s12 }
 0x4a7   :  { %v5943_v53 = vpop.f32.mrb[0].mxu0 }
 0x4a8   :  { %v5030_v54 = vpop.f32.mrb[1].mxu0 }
 0x4ab   :  { %v652_v55 = vpop.f32.mrb[2].mxu0 }
 0x4ac   :  { %v5040_v56 = vpop.f32.mrb[3].mxu0  ;;  %v734_v57 = vmul.f32 0.17677669, %v652_v55 }
 0x4ae   :  { %v736_v58 = vsel %vm250_vm2, %v734_v57, -inf }
 0x4b7   :  { %737 = vmax.xlane.f32.xlu0 %v736_v58 }
 0x4cd   :  { %758 = vrot.lane.b32.xlu0 %v5880_v14, %s5696_s7 }
 0x4d1   :  { %1252 = vrot.lane.b32.xlu0 %v5880_v14, %s5698_s11 }
 0x4d5   :  { %1489 = vrot.lane.b32.xlu0 %v5880_v14, %s5699_s16 }
 0x4d9   :  { %1567 = vrot.lane.b32.xlu0 %v5878_v13, %s5699_s16 }
 0x4dd   :  { %1487 = vrot.lane.b32.xlu0 %v5880_v14, %s5700_s15 }
 0x4e1   :  { %1565 = vrot.lane.b32.xlu0 %v5878_v13, %s5700_s15 }
 0x507   :  { %v741_v59 = vpop.xlane.xlu0 %740 }
 0x508   :  { %v743_v60 = vsub.f32 %v735_v50, %v741_v59 }
 0x50a   :  { %v746_v61 = vmul.f32 1.442695, %v743_v60 }
 0x50b   :  { %v835_v62 = vpop.permute.xlu0 %834 }
 0x50c   :  { %5560 = vpow2.f32 %v746_v61  ;;  %5052 = vmatpush3.msra.mxu1 %v835_v62 }
 0x50d   :  { %5066 = vmatprep.subr.mxu1 %v5689_v12 }
 0x50f   :  { %v1073_v1 = vpop.permute.xlu0 %1072 }
 0x513   :  { %v1153_v2 = vpop.permute.xlu0 %1152 }
 0x516   :  { %v5561_v63 = vpop.eup %5560 }
 0x517   :  { %v751_v0 = vsel %vm250_vm2, %v5561_v63, 0.0 }
 0x518   :  { %752 = vadd.xlane.f32.xlu1 %v751_v0 }
 0x529   :  { %1150 = vrot.lane.b32.xlu1 %v5878_v13, %s5697_s10 }
 0x544   :  { %v738_v3 = vpop.xlane.xlu0 %737 }
 0x545   :  { %v742_v4 = vsub.f32 %v734_v57, %v738_v3 }
 0x547   :  { %v744_v5 = vmul.f32 1.442695, %v742_v4 }
 0x548   :  { %v759_v6 = vpop.permute.xlu0 %758 }
 0x549   :  { %5562 = vpow2.f32 %v744_v5  ;;  %5047 = vmatpush3.msra.mxu0 %v759_v6 }
 0x54a   :  { %5056 = vmatprep.subr.mxu0 %v135_v22 }
 0x54c   :  { %v1253_v36 = vpop.permute.xlu0 %1252 }
 0x550   :  { %v1490_v51 = vpop.permute.xlu0 %1489 }
 0x553   :  { %v5563_v7 = vpop.eup %5562 }
 0x554   :  { %v748_v8 = vsel %vm250_vm2, %v5563_v7, 0.0  ;;  %v1568_v55 = vpop.permute.xlu0 %1567 }
 0x555   :  { %749 = vadd.xlane.f32.xlu1 %v748_v8 }
 0x558   :  { %v1488_v57 = vpop.permute.xlu0 %1487 }
 0x55c   :  { %v1566_v62 = vpop.permute.xlu0 %1565 }
 0x5a5   :  { %v753_v15 = vpop.xlane.xlu1 %752 }
 0x5a6   :  { %5564 = vrcp.f32 %v753_v15 }
 0x5a9   :  { %v1151_v18 = vpop.permute.xlu1 %1150 }
 0x5b0   :  { %v5565_v16 = vpop.eup %5564 }
 0x5b1   :  { %v757_v17 = vmul.f32 %v5565_v16, %v5561_v63 }
 0x5b3   :  { %5054 = vmatmul.mubr.msk.f32.vlgmr.msra.gmra.mrb[10].mxu1 %vm250_vm2, %v757_v17 }
 0x5b4   :  { %5067 = vmatpush3.xpose.msk.msra.mxu1 %vm250_vm2, %v1075_v10  ;;  %5068 = vmatprep.mubr.msk.f32.mxu1 %vm5690_vm1, %v5689_v12 }
 0x5b5   :  { %5071 = vmatprep.subr.mxu1 %v5689_v12 }
 0x5b7   :  { %5069 = vmatmul.mubr.msk.f32.vlgmr.msra.gmra.mrb[12].mxu1 %vm250_vm2, %v1073_v1 }
 0x5b8   :  { %5072 = vmatpush3.xpose.msk.msra.mxu1 %vm250_vm2, %v1153_v2  ;;  %5073 = vmatprep.mubr.msk.f32.mxu1 %vm5690_vm1, %v5689_v12 }
 0x5b9   :  { %5081 = vmatprep.subr.mxu1 %v5689_v12 }
 0x5bb   :  { %5074 = vmatmul.mubr.msk.f32.vlgmr.msra.gmra.mrb[14].mxu1 %vm250_vm2, %v1151_v18 }
 0x5bc   :  { %5083 = vmatprep.mubr.msk.f32.mxu1 %vm5690_vm1, %v5689_v12 }
 0x5e2   :  { %v750_v19 = vpop.xlane.xlu1 %749 }
 0x5e3   :  { %5566 = vrcp.f32 %v750_v19 }
 0x5ed   :  { %v5567_v20 = vpop.eup %5566 }
 0x5ee   :  { %v756_v21 = vmul.f32 %v5567_v20, %v5563_v7 }
 0x5f0   :  { %5049 = vmatmul.mubr.msk.f32.vlgmr.msra.gmra.mrb[4].mxu0 %vm250_vm2, %v756_v21 }
 0x5f1   :  { %5057 = vmatpush3.msra.mxu0 %v135_v22 }
 0x5f2   :  { %5061 = vmatprep.subr.mxu0 %v134_v23 }
 0x686   :  { %v906_v24 = vpop.f32.mrb[10].mxu1 }
 0x687   :  { %v5055_v25 = vpop.f32.mrb[11].mxu1 }
 0x68a   :  { %v1146_v26 = vpop.f32.mrb[12].mxu1 }
 0x68b   :  { %v1228_v27 = vmul.f32 0.17677669, %v1146_v26  ;;  %v5070_v28 = vpop.f32.mrb[13].mxu1  ;;  %v137_v26 = vld [vmem:[%s5727_s17 + $0x18] sm:$0xff] }
 0x68d   :  { %v1230_v29 = vsel %vm250_vm2, %v1228_v27, -inf }
 0x68e   :  { %v1224_v30 = vpop.f32.mrb[14].mxu1  ;;  %1231 = vmax.xlane.f32.xlu1 %v1230_v29 }
 0x68f   :  { %v1229_v31 = vmul.f32 0.17677669, %v1224_v30  ;;  %v5075_v32 = vpop.f32.mrb[15].mxu1 }
 0x691   :  { %v1233_v33 = vsel %vm250_vm2, %v1229_v31, -inf }
 0x692   :  { %1234 = vmax.xlane.f32.xlu1 %v1233_v33 }
 0x6c3   :  { %v830_v34 = vpop.f32.mrb[4].mxu0 }
 0x6c4   :  { %v5050_v35 = vpop.f32.mrb[5].mxu0  ;;  %5058 = vmatprep.mubr.msk.f32.mxu0 %vm250_vm2, %v830_v34 }
 0x6c5   :  { %5059 = vmatmul.mubr.msk.f32.vlgmr.msra.gmra.mrb[6].mxu0 %vm250_vm2, %v906_v24 }
 0x6c6   :  { %5063 = vmatprep.mubr.msk.f32.mxu0 %vm250_vm2, %v5943_v53  ;;  %5062 = vmatpush3.msra.mxu0 %v134_v23 }
 0x6c7   :  { %5076 = vmatprep.subr.mxu0 %v5689_v12 }
 0x6cd   :  { %5064 = vmatmul.mubr.msk.f32.vlgmr.msra.gmra.mrb[6].mxu0 %vm250_vm2, %v5934_v47  ;;  %v136_v47 = vld [vmem:[%s5727_s17 + $0x10] sm:$0xff]  ;;  %s6416_s17 = sld [smem:[#allocation6_spill]] }
 0x6ce   :  { %5077 = vmatpush3.msra.mxu0 %v1253_v36  ;;  %5078 = vmatprep.mubr.msk.f32.mxu0 %vm5690_vm1, %v5689_v12 }
 0x6cf   :  { %5086 = vmatprep.subr.mxu0 %v136_v47 }
 0x71b   :  { %v1232_v37 = vpop.xlane.xlu1 %1231 }
 0x71c   :  { %v1236_v38 = vsub.f32 %v1228_v27, %v1232_v37 }
 0x71e   :  { %v1238_v39 = vmul.f32 1.442695, %v1236_v38 }
 0x71f   :  { %v1235_v40 = vpop.xlane.xlu1 %1234 }
 0x720   :  { %5568 = vpow2.f32 %v1238_v39  ;;  %v1237_v41 = vsub.f32 %v1229_v31, %v1235_v40 }
 0x722   :  { %v1240_v42 = vmul.f32 1.442695, %v1237_v41 }
 0x724   :  { %5570 = vpow2.f32 %v1240_v42 }
 0x72a   :  { %v5569_v43 = vpop.eup %5568 }
 0x72b   :  { %v1242_v44 = vsel %vm250_vm2, %v5569_v43, 0.0 }
 0x72c   :  { %1243 = vadd.xlane.f32.xlu1 %v1242_v44 }
 0x72e   :  { %v5571_v45 = vpop.eup %5570 }
 0x72f   :  { %v1245_v46 = vsel %vm250_vm2, %v5571_v45, 0.0 }
 0x730   :  { %1246 = vadd.xlane.f32.xlu1 %v1245_v46 }
 0x741   :  { %1328 = vrot.lane.b32.xlu1 %v5878_v13, %s5698_s11 }
 0x7b9   :  { %v1244_v48 = vpop.xlane.xlu1 %1243 }
 0x7ba   :  { %5572 = vrcp.f32 %v1244_v48 }
 0x7bd   :  { %v1247_v49 = vpop.xlane.xlu1 %1246 }
 0x7be   :  { %5574 = vrcp.f32 %v1247_v49 }
 0x7c1   :  { %v1329_v50 = vpop.permute.xlu1 %1328 }
 0x7c2   :  { %5082 = vmatpush3.msra.mxu1 %v1329_v50  ;;  %v141_v50 = vld [vmem:[%s5747_s3] sm:$0xff] }
 0x7c3   :  { %5091 = vmatprep.subr.mxu1 %v5689_v12 }
 0x7c4   :  { %v5573_v52 = vpop.eup %5572 }
 0x7c5   :  { %v1250_v53 = vmul.f32 %v5573_v52, %v5569_v43 }
 0x7c7   :  { %5079 = vmatmul.mubr.msk.f32.vlgmr.msra.gmra.mrb[8].mxu0 %vm250_vm2, %v1250_v53  ;;  %v143_v53 = vld [vmem:[%s5747_s3 + $0x10] sm:$0xff] }
 0x7c8   :  { %v5575_v54 = vpop.eup %5574  ;;  %5087 = vmatpush3.msra.mxu0 %v136_v47 }
 0x7c9   :  { %v1251_v56 = vmul.f32 %v5575_v54, %v5571_v45  ;;  %5096 = vmatprep.subr.mxu0 %v5689_v12  ;;  %v144_v54 = vld [vmem:[%s5747_s3 + $0x18] sm:$0xff] }
 0x7cb   :  { %5084 = vmatmul.mubr.msk.f32.vlgmr.msra.gmra.mrb[16].mxu1 %vm250_vm2, %v1251_v56  ;;  %v146_v56 = vld [vmem:[%s5757_s14] sm:$0xff] }
 0x7cc   :  { %5092 = vmatpush3.xpose.msk.msra.mxu1 %vm250_vm2, %v1490_v51  ;;  %5093 = vmatprep.mubr.msk.f32.mxu1 %vm5690_vm1, %v5689_v12  ;;  %v142_v51 = vld [vmem:[%s5747_s3 + $0x8] sm:$0xff]  ;;  %s6420_s3 = sld [smem:[#allocation8_spill]] }
 0x7cd   :  { %5101 = vmatprep.subr.mxu1 %v5689_v12  ;;  %v5327_v52 = vpack.c.bf16 %v142_v51, %v141_v50 }
 0x7cf   :  { %5094 = vmatmul.mubr.msk.f32.vlgmr.msra.gmra.mrb[18].mxu1 %vm250_vm2, %v1488_v57  ;;  %v147_v57 = vld [vmem:[%s5757_s14 + $0x8] sm:$0xff] }
 0x7d0   :  { %5103 = vmatprep.mubr.msk.f32.mxu1 %vm5690_vm1, %v5689_v12 }
 0x89a   :  { %v1324_v58 = vpop.f32.mrb[8].mxu0 }
 0x89b   :  { %v5080_v59 = vpop.f32.mrb[9].mxu0  ;;  %5088 = vmatprep.mubr.msk.f32.mxu0 %vm250_vm2, %v1324_v58  ;;  %v148_v58 = vld [vmem:[%s5757_s14 + $0x10] sm:$0xff] }
 0x89c   :  { %v5335_v59 = vpack.c.bf16 %v147_v57, %v146_v56 }
 0x89e   :  { %v1400_v60 = vpop.f32.mrb[16].mxu1 }
 0x89f   :  { %v5085_v61 = vpop.f32.mrb[17].mxu1  ;;  %5089 = vmatmul.mubr.msk.f32.vlgmr.msra.gmra.mrb[6].mxu0 %vm250_vm2, %v1400_v60  ;;  %v149_v60 = vld [vmem:[%s5757_s14 + $0x18] sm:$0xff] }
 0x8a0   :  { %5097 = vmatpush3.xpose.msk.msra.mxu0 %vm250_vm2, %v1568_v55  ;;  %5098 = vmatprep.mubr.msk.f32.mxu0 %vm5690_vm1, %v5689_v12  ;;  %v5331_v55 = vpack.c.bf16 %v144_v54, %v143_v53  ;;  %v5339_v61 = vpack.c.bf16 %v149_v60, %v148_v58  ;;  %v2170_v60 = vld [vmem:[%s5777_s6 + $0x8] sm:$0xff] }
 0x8a1   :  { %5106 = vmatprep.subr.mxu0 %v5689_v12 }
 0x8a2   :  { %v1561_v63 = vpop.f32.mrb[18].mxu1 }
 0x8a3   :  { %v1643_v0 = vmul.f32 0.17677669, %v1561_v63  ;;  %v5095_v1 = vpop.f32.mrb[19].mxu1  ;;  %5099 = vmatmul.mubr.msk.f32.vlgmr.msra.gmra.mrb[10].mxu0 %vm250_vm2, %v1566_v62  ;;  %v150_v62 = vld [vmem:[%s5757_s14 + $0x20] sm:$0xff]  ;;  %v151_v63 = vld [vmem:[%s5757_s14 + $0x28] sm:$0xff] }
 0x8a4   :  { %5108 = vmatprep.mubr.msk.f32.mxu0 %vm5690_vm1, %v5689_v12  ;;  %v152_v1 = vld [vmem:[%s5757_s14 + $0x30] sm:$0xff] }
 0x8a5   :  { %v1645_v2 = vsel %vm250_vm2, %v1643_v0, -inf }
 0x8a6   :  { %1646 = vmax.xlane.f32.xlu1 %v1645_v2  ;;  %v153_v2 = vld [vmem:[%s5757_s14 + $0x38] sm:$0xff] }
 0x933   :  { %v1647_v3 = vpop.xlane.xlu1 %1646 }
 0x934   :  { %v1651_v4 = vsub.f32 %v1643_v0, %v1647_v3  ;;  %v5343_v0 = vpack.c.bf16 %v151_v63, %v150_v62  ;;  %v5347_v3 = vpack.c.bf16 %v153_v2, %v152_v1  ;;  %v2171_v62 = vld [vmem:[%s5777_s6 + $0x10] sm:$0xff]  ;;  %v2172_v63 = vld [vmem:[%s5777_s6 + $0x18] sm:$0xff] }
 0x936   :  { %v1653_v5 = vmul.f32 1.442695, %v1651_v4  ;;  %v154_v4 = vld [vmem:[%s5757_s14 + $0x40] sm:$0xff] }
 0x938   :  { %5576 = vpow2.f32 %v1653_v5  ;;  %v155_v5 = vld [vmem:[%s5757_s14 + $0x48] sm:$0xff] }
 0x942   :  { %v5577_v15 = vpop.eup %5576 }
 0x943   :  { %v1657_v16 = vsel %vm250_vm2, %v5577_v15, 0.0 }
 0x976   :  { %v1639_v6 = vpop.f32.mrb[10].mxu0 }
 0x977   :  { %v1644_v7 = vmul.f32 0.17677669, %v1639_v6  ;;  %v5100_v8 = vpop.f32.mrb[11].mxu0  ;;  %v5351_v6 = vpack.c.bf16 %v155_v5, %v154_v4 }
 0x978   :  { %v157_v8 = vld [vmem:[%s5757_s14 + $0x58] sm:$0xff] }
 0x979   :  { %v1648_v10 = vsel %vm250_vm2, %v1644_v7, -inf }
 0x97a   :  { %1649 = vmax.xlane.f32.xlu0 %v1648_v10 }
 0x97e   :  { %1658 = vadd.xlane.f32.xlu0 %v1657_v16  ;;  %v159_v16 = vld [vmem:[%s5757_s14 + $0x68] sm:$0xff] }
 0x994   :  { %1667 = vrot.lane.b32.xlu0 %v5880_v14, %s5701_s18 }
 0xa07   :  { %v1650_v17 = vpop.xlane.xlu0 %1649 }
 0xa08   :  { %v1652_v18 = vsub.f32 %v1644_v7, %v1650_v17  ;;  %v156_v7 = vld [vmem:[%s5757_s14 + $0x50] sm:$0xff] }
 0xa09   :  { %v5355_v10 = vpack.c.bf16 %v157_v8, %v156_v7  ;;  %v4738_v8 = vld [vmem:[%s5767_s24] ss:$0 sm:$0xff]  ;;  %s6424_s24 = sld [smem:[#allocation16_spill]] }
 0xa0a   :  { %v1655_v19 = vmul.f32 1.442695, %v1652_v18 }
 0xa0b   :  { %v1659_v20 = vpop.xlane.xlu0 %1658 }
 0xa0c   :  { %5578 = vpow2.f32 %v1655_v19 }
 0xa0d   :  { %5580 = vrcp.f32 %v1659_v20 }
 0xa0f   :  { %v1668_v21 = vpop.permute.xlu0 %1667 }
 0xa10   :  { %5102 = vmatpush3.msra.mxu1 %v1668_v21 }
 0xa11   :  { %5328 = vmatprep.subr.bf16.mxu1 %v5327_v52 }
 0xa16   :  { %v5579_v22 = vpop.eup %5578 }
 0xa17   :  { %v5581_v23 = vpop.eup %5580  ;;  %v1660_v24 = vsel %vm250_vm2, %v5579_v22, 0.0 }
 0xa18   :  { %v1665_v25 = vmul.f32 %v5581_v23, %v5577_v15  ;;  %1661 = vadd.xlane.f32.xlu1 %v1660_v24  ;;  %v158_v15 = vld [vmem:[%s5757_s14 + $0x60] sm:$0xff] }
 0xa19   :  { %v5359_v17 = vpack.c.bf16 %v159_v16, %v158_v15 }
 0xa1a   :  { %5104 = vmatmul.mubr.msk.f32.vlgmr.msra.gmra.mrb[20].mxu1 %vm250_vm2, %v1665_v25  ;;  %v4732_v25 = vld [vmem:[%s5737_s25] ss:$0 sm:$0xff]  ;;  %s6418_s25 = sld [smem:[#allocation10_spill]] }
 0xa1b   :  { %5330 = vmatpush3.bf16.msra.mxu1 %v5327_v52 }
 0xa1c   :  { %5332 = vmatprep.subr.bf16.mxu1 %v5331_v55 }
 0xa1f   :  { %5334 = vmatpush3.bf16.msra.mxu1 %v5331_v55 }
 0xa29   :  { %1743 = vrot.lane.b32.xlu1 %v5878_v13, %s5701_s18  ;;  %v4731_v13 = vld [vmem:[%s5732_s21] ss:$0 sm:$0xff]  ;;  %s6417_s21 = sld [smem:[#allocation7_spill]] }
 0xaa5   :  { %v1662_v14 = vpop.xlane.xlu1 %1661 }
 0xaa6   :  { %5582 = vrcp.f32 %v1662_v14 }
 0xaa9   :  { %v1744_v27 = vpop.permute.xlu1 %1743 }
 0xaaa   :  { %5107 = vmatpush3.msra.mxu0 %v1744_v27 }
 0xaab   :  { %5111 = vmatprep.subr.mxu0 %v137_v26 }
 0xab0   :  { %v5583_v28 = vpop.eup %5582 }
 0xab1   :  { %v1666_v29 = vmul.f32 %v5583_v28, %v5579_v22  ;;  %v4733_v28 = vld [vmem:[%s5742_s29] ss:$0 sm:$0xff]  ;;  %s6419_s29 = sld [smem:[#allocation12_spill]] }
 0xab3   :  { %5109 = vmatmul.mubr.msk.f32.vlgmr.msra.gmra.mrb[12].mxu0 %vm250_vm2, %v1666_v29 }
 0xab4   :  { %5112 = vmatpush3.msra.mxu0 %v137_v26 }
 0xab5   :  { %5336 = vmatprep.subr.bf16.mxu0 %v5335_v59 }
 0xaed   :  { %v1739_v30 = vpop.f32.mrb[20].mxu1 }
 0xaee   :  { %v5105_v31 = vpop.f32.mrb[21].mxu1  ;;  %5113 = vmatprep.mubr.msk.f32.mxu0 %vm250_vm2, %v1739_v30 }
 0xb86   :  { %v1815_v32 = vpop.f32.mrb[12].mxu0 }
 0xb87   :  { %v5110_v33 = vpop.f32.mrb[13].mxu0  ;;  %5114 = vmatmul.mubr.msk.f32.vlgmr.msra.gmra.mrb[6].mxu0 %vm250_vm2, %v1815_v32 }
 0xb88   :  { %5338 = vmatpush3.bf16.msra.mxu0 %v5335_v59  ;;  %v160_v33 = vld [vmem:[%s5757_s14 + $0x70] sm:$0xff]  ;;  %v2169_v59 = vld [vmem:[%s5777_s6] sm:$0xff]  ;;  %s6426_s6 = sld [smem:[#allocation15_spill]] }
 0xb89   :  { %5340 = vmatprep.subr.bf16.mxu0 %v5339_v61 }
 0xb8c   :  { %5342 = vmatpush3.bf16.msra.mxu0 %v5339_v61  ;;  %v5367_v61 = vpack.c.bf16 %v2170_v60, %v2169_v59 }
 0xb8d   :  { %5344 = vmatprep.subr.bf16.mxu0 %v5343_v0 }
 0xb8e   :  { %5368 = vmatprep.subr.bf16.mxu1 %v5367_v61 }
 0xb90   :  { %5346 = vmatpush3.bf16.msra.mxu0 %v5343_v0  ;;  %v5371_v0 = vpack.c.bf16 %v2172_v63, %v2171_v62 }
 0xb91   :  { %5348 = vmatprep.subr.bf16.mxu0 %v5347_v3 }
 0xb94   :  { %5350 = vmatpush3.bf16.msra.mxu0 %v5347_v3 }
 0xb95   :  { %5352 = vmatprep.subr.bf16.mxu0 %v5351_v6 }
 0xb98   :  { %5354 = vmatpush3.bf16.msra.mxu0 %v5351_v6 }
 0xb99   :  { %5356 = vmatprep.subr.bf16.mxu0 %v5355_v10 }
 0xb9c   :  { %5358 = vmatpush3.bf16.msra.mxu0 %v5355_v10 }
 0xb9d   :  { %5360 = vmatprep.subr.bf16.mxu0 %v5359_v17 }
 0xba0   :  { %5362 = vmatpush3.bf16.msra.mxu0 %v5359_v17  ;;  %v4739_v17 = vld [vmem:[%s5772_s30] ss:$0 sm:$0xff]  ;;  %s6425_s30 = sld [smem:[#allocation14_spill]] }
 0xc5a   :  { %v5115_v34 = vpop.f32.mrb[6].mxu0 }
 0xc5b   :  { %v1909_v35 = vadd.f32 %v5115_v34, %v4731_v13  ;;  %v1891_v36 = vpop.f32.mrb[7].mxu0 }
 0xc5c   :  { %v1908_v37 = vadd.f32 %v4731_v13, %v1891_v36  ;;  %v161_v13 = vld [vmem:[%s5757_s14 + $0x78] sm:$0xff]  ;;  %s6422_s14 = sld [smem:[#allocation11_spill]] }
 0xc5d   :  { %v1911_v38 = vadd.f32 %v1909_v35, %v5868_v11  ;;  %v5363_v34 = vpack.c.bf16 %v161_v13, %v160_v33  ;;  %v4734_v35 = vld [vmem:[%s5752_s8] ss:$0 sm:$0xff]  ;;  %s6421_s8 = sld [smem:[#allocation9_spill]] }
 0xc5e   :  { %v1910_v39 = vadd.f32 %v1908_v37, %v5863_v9 }
 0xc5f   :  { %v1915_v40 = vsel %vm165_vm0, %v1911_v38, 0.0  ;;  %5364 = vmatprep.subr.bf16.mxu0 %v5363_v34 }
 0xc60   :  { %1916 = vadd.xlane.f32.xlu0 %v1915_v40  ;;  %v1912_v41 = vsel %vm165_vm0, %v1910_v39, 0.0  ;;  %5366 = vmatpush3.bf16.msra.mxu0 %v5363_v34 }
 0xc61   :  { %1913 = vadd.xlane.f32.xlu1 %v1912_v41  ;;  %5203 = vmatprep.subr.mxu0 %v5689_v12 }
 0xced   :  { %v1917_v42 = vpop.xlane.xlu0 %1916 }
 0xcee   :  { %v1920_v43 = vmul.f32 0.03125, %v1917_v42  ;;  %v1914_v44 = vpop.xlane.xlu1 %1913  ;;  %v4737_v42 = vld [vmem:[%s5762_s19] ss:$0 sm:$0xff]  ;;  %s6423_s19 = sld [smem:[#allocation13_spill]] }
 0xcef   :  { %v1919_v45 = vmul.f32 0.03125, %v1914_v44 }
 0xcf0   :  { %v6033_v46 = vsub.f32 %v1911_v38, %v1920_v43 }
 0xcf1   :  { %v6035_v47 = vsub.f32 %v1910_v39, %v1919_v45 }
 0xcf2   :  { %v1924_v9 = vmul.f32 %v6033_v46, %v6033_v46 }
 0xcf3   :  { %v1923_v11 = vmul.f32 %v6035_v47, %v6035_v47 }
 0xcf4   :  { %v1928_v48 = vsel %vm165_vm0, %v1924_v9, 0.0 }
 0xcf5   :  { %1929 = vadd.xlane.f32.xlu1 %v1928_v48  ;;  %v1925_v49 = vsel %vm165_vm0, %v1923_v11, 0.0 }
 0xcf6   :  { %1926 = vadd.xlane.f32.xlu0 %v1925_v49 }
 0xd82   :  { %v1930_v18 = vpop.xlane.xlu1 %1929 }
 0xd83   :  { %v1932_v19 = vmul.f32 0.03125, %v1930_v18  ;;  %v1927_v20 = vpop.xlane.xlu0 %1926 }
 0xd84   :  { %v1931_v21 = vmul.f32 0.03125, %v1927_v20 }
 0xd85   :  { %v1934_v22 = vadd.f32 1e-05, %v1932_v19 }
 0xd86   :  { %v1933_v23 = vadd.f32 1e-05, %v1931_v21 }
 0xd87   :  { %5584 = vrsqrt.f32 %v1934_v22 }
 0xd88   :  { %5586 = vrsqrt.f32 %v1933_v23 }
 0xd91   :  { %v5585_v24 = vpop.eup %5584 }
 0xd92   :  { %v5587_v14 = vpop.eup %5586  ;;  %v1938_v26 = vmul.f32 %v5585_v24, %v6033_v46 }
 0xd93   :  { %v1937_v27 = vmul.f32 %v5587_v14, %v6035_v47 }
 0xd94   :  { %v1946_v29 = vmul.f32 %v4732_v25, %v1938_v26 }
 0xd95   :  { %v1945_v30 = vmul.f32 %v4732_v25, %v1937_v27 }
 0xd96   :  { %v1954_v32 = vadd.f32 %v4733_v28, %v1946_v29 }
 0xd97   :  { %v1953_v31 = vadd.f32 %v4733_v28, %v1945_v30 }
 0xd99   :  { %5124 = vmatprep.mubr.msk.f32.mxu1 %vm165_vm0, %v1953_v31 }
 0xd9a   :  { %5125 = vmatmul.mubr.msk.f32.vlgmr.msra.gmra.mrb[22].mxu1 %vm165_vm0, %v1954_v32 }
 0xd9b   :  { %5370 = vmatpush3.bf16.msra.mxu1 %v5367_v61 }
 0xd9c   :  { %5372 = vmatprep.subr.bf16.mxu1 %v5371_v0 }
 0xd9f   :  { %5374 = vmatpush3.bf16.msra.mxu1 %v5371_v0 }
 0xda0   :  { %5173 = vmatprep.subr.mxu1 %v5689_v12 }
 0xe6d   :  { %v5126_v36 = vpop.f32.mrb[22].mxu1 }
 0xe6e   :  { %v2039_v37 = vadd.f32 %v5126_v36, %v4734_v35  ;;  %v2033_v38 = vpop.f32.mrb[23].mxu1 }
 0xe6f   :  { %v2034_v39 = vadd.f32 %v4734_v35, %v2033_v38 }
 0xe70   :  { %v2043_v41 = vmax.f32 %v2039_v37, 0.0 }
 0xe71   :  { %v2042_v40 = vmax.f32 %v2034_v39, 0.0 }
 0xe73   :  { %5159 = vmatprep.mubr.f32.mxu0 %v2042_v40 }
 0xe74   :  { %5160 = vmatmul.mubr.f32.vlgmr.msra.gmra.mrb[14].mxu0 %v2043_v41 }
 0xe75   :  { %5205 = vmatprep.mubr.msk.f32.mxu0 %vm5690_vm1, %v5689_v12 }
 0xf47   :  { %v5161_v43 = vpop.f32.mrb[14].mxu0 }
 0xf48   :  { %v2122_v44 = vadd.f32 %v5161_v43, %v4737_v42  ;;  %v2116_v45 = vpop.f32.mrb[15].mxu0 }
 0xf49   :  { %v2117_v46 = vadd.f32 %v4737_v42, %v2116_v45 }
 0xf4a   :  { %v2126_v47 = vadd.f32 %v2122_v44, %v1954_v32 }
 0xf4b   :  { %v2125_v9 = vadd.f32 %v2117_v46, %v1953_v31 }
 0xf4c   :  { %v2130_v11 = vsel %vm165_vm0, %v2126_v47, 0.0 }
 0xf4d   :  { %2131 = vadd.xlane.f32.xlu1 %v2130_v11  ;;  %v2127_v48 = vsel %vm165_vm0, %v2125_v9, 0.0 }
 0xf4e   :  { %2128 = vadd.xlane.f32.xlu0 %v2127_v48 }
 0xfda   :  { %v2132_v49 = vpop.xlane.xlu1 %2131 }
 0xfdb   :  { %v2134_v50 = vmul.f32 0.03125, %v2132_v49  ;;  %v2129_v51 = vpop.xlane.xlu0 %2128 }
 0xfdc   :  { %v2133_v52 = vmul.f32 0.03125, %v2129_v51 }
 0xfdd   :  { %v2136_v53 = vsub.f32 %v2126_v47, %v2134_v50 }
 0xfde   :  { %v2135_v54 = vsub.f32 %v2125_v9, %v2133_v52 }
 0xfdf   :  { %v2138_v55 = vmul.f32 %v2136_v53, %v2136_v53 }
 0xfe0   :  { %v2137_v56 = vmul.f32 %v2135_v54, %v2135_v54 }
 0xfe1   :  { %v2142_v57 = vsel %vm165_vm0, %v2138_v55, 0.0 }
 0xfe2   :  { %2143 = vadd.xlane.f32.xlu1 %v2142_v57  ;;  %v2139_v58 = vsel %vm165_vm0, %v2137_v56, 0.0 }
 0xfe3   :  { %2140 = vadd.xlane.f32.xlu0 %v2139_v58 }
0x106f   :  { %v2144_v1 = vpop.xlane.xlu1 %2143 }
0x1070   :  { %v2146_v2 = vmul.f32 0.03125, %v2144_v1  ;;  %v2141_v3 = vpop.xlane.xlu0 %2140 }
0x1071   :  { %v2145_v4 = vmul.f32 0.03125, %v2141_v3 }
0x1072   :  { %v2148_v5 = vadd.f32 1e-05, %v2146_v2 }
0x1073   :  { %v2147_v6 = vadd.f32 1e-05, %v2145_v4 }
0x1074   :  { %5588 = vrsqrt.f32 %v2148_v5 }
0x1075   :  { %5590 = vrsqrt.f32 %v2147_v6 }
0x107e   :  { %v5589_v7 = vpop.eup %5588 }
0x107f   :  { %v5591_v10 = vpop.eup %5590  ;;  %v2152_v15 = vmul.f32 %v5589_v7, %v2136_v53 }
0x1080   :  { %v2151_v16 = vmul.f32 %v5591_v10, %v2135_v54 }
0x1081   :  { %v2160_v18 = vmul.f32 %v4738_v8, %v2152_v15 }
0x1082   :  { %v2159_v19 = vmul.f32 %v4738_v8, %v2151_v16 }
0x1083   :  { %v6087_v21 = vadd.f32 %v4739_v17, %v2160_v18 }
0x1084   :  { %v6085_v20 = vadd.f32 %v4739_v17, %v2159_v19 }
0x1086   :  { %5170 = vmatprep.mubr.msk.f32.mxu1 %vm165_vm0, %v6085_v20 }
0x1087   :  { %5171 = vmatmul.mubr.msk.f32.vlgmr.msra.gmra.mrb[24].mxu1 %vm165_vm0, %v6087_v21 }
0x1088   :  { %5175 = vmatprep.mubr.msk.f32.mxu1 %vm5690_vm1, %v5689_v12 }
0x115a   :  { %v6095_v22 = vpop.f32.mrb[24].mxu1 }
0x115b   :  { %2363 = vrot.lane.b32.xlu1 %v6095_v22, %s5691_s0  ;;  %v6099_v23 = vpop.f32.mrb[25].mxu1 }
0x115c   :  { %2286 = vrot.lane.b32.xlu0 %v6099_v23, %s5691_s0 }
0x11cd   :  { %v2364_v25 = vpop.permute.xlu1 %2363 }
0x11ce   :  { %v2287_v24 = vpop.permute.xlu0 %2286 }
0x11cf   :  { %5174 = vmatpush3.xpose.msk.msra.mxu1 %vm250_vm2, %v2287_v24 }
0x11d0   :  { %5178 = vmatprep.subr.mxu1 %v5689_v12 }
0x11d2   :  { %5176 = vmatmul.mubr.msk.f32.vlgmr.msra.gmra.mrb[26].mxu1 %vm250_vm2, %v6099_v23 }
0x11d3   :  { %5179 = vmatpush3.xpose.msk.msra.mxu1 %vm250_vm2, %v2364_v25  ;;  %5180 = vmatprep.mubr.msk.f32.mxu1 %vm5690_vm1, %v5689_v12 }
0x11d4   :  { %5183 = vmatprep.subr.mxu1 %v5689_v12 }
0x11d6   :  { %5181 = vmatmul.mubr.msk.f32.vlgmr.msra.gmra.mrb[28].mxu1 %vm250_vm2, %v6095_v22 }
0x11d7   :  { %5185 = vmatprep.mubr.msk.f32.mxu1 %vm5690_vm1, %v5689_v12 }
0x12a5   :  { %v2358_v14 = vpop.f32.mrb[26].mxu1 }
0x12a6   :  { %v2439_v26 = vmul.f32 0.17677669, %v2358_v14  ;;  %v5177_v27 = vpop.f32.mrb[27].mxu1 }
0x12a8   :  { %v2441_v28 = vsel %vm250_vm2, %v2439_v26, -inf }
0x12a9   :  { %2442 = vmax.xlane.f32.xlu1 %v2441_v28  ;;  %v2435_v29 = vpop.f32.mrb[28].mxu1 }
0x12aa   :  { %v2440_v30 = vmul.f32 0.17677669, %v2435_v29  ;;  %v5182_v31 = vpop.f32.mrb[29].mxu1 }
0x12ac   :  { %v2444_v32 = vsel %vm250_vm2, %v2440_v30, -inf }
0x12ad   :  { %2445 = vmax.xlane.f32.xlu0 %v2444_v32 }
0x12ba   :  { %2539 = vrot.lane.b32.xlu1 %v6095_v22, %s5692_s5 }
0x12be   :  { %2617 = vrot.lane.b32.xlu1 %v6099_v23, %s5694_s13 }
0x1336   :  { %v2443_v33 = vpop.xlane.xlu1 %2442 }
0x1337   :  { %v2447_v13 = vsub.f32 %v2439_v26, %v2443_v33 }
0x1339   :  { %v2449_v34 = vmul.f32 1.442695, %v2447_v13 }
0x133a   :  { %v2446_v35 = vpop.xlane.xlu0 %2445  ;;  %v2540_v42 = vpop.permute.xlu1 %2539 }
0x133b   :  { %5592 = vpow2.f32 %v2449_v34  ;;  %v2448_v36 = vsub.f32 %v2440_v30, %v2446_v35 }
0x133d   :  { %v2451_v37 = vmul.f32 1.442695, %v2448_v36 }
0x133e   :  { %v2618_v43 = vpop.permute.xlu1 %2617 }
0x133f   :  { %5594 = vpow2.f32 %v2451_v37 }
0x1345   :  { %v5593_v38 = vpop.eup %5592 }
0x1346   :  { %v2453_v39 = vsel %vm250_vm2, %v5593_v38, 0.0 }
0x1347   :  { %2454 = vadd.xlane.f32.xlu0 %v2453_v39  ;;  %v2174_v39 = vld [vmem:[%s6416_s17 + $0x8] sm:$0xff] }
0x1349   :  { %v5595_v40 = vpop.eup %5594 }
0x134a   :  { %v2456_v41 = vsel %vm250_vm2, %v5595_v40, 0.0 }
0x134b   :  { %2457 = vadd.xlane.f32.xlu1 %v2456_v41 }
0x135c   :  { %2695 = vrot.lane.b32.xlu1 %v6095_v22, %s5694_s13 }
0x135d   :  { %2463 = vrot.lane.b32.xlu0 %v6099_v23, %s5692_s5 }
0x1361   :  { %2615 = vrot.lane.b32.xlu0 %v6099_v23, %s5693_s9 }
0x1365   :  { %2693 = vrot.lane.b32.xlu0 %v6095_v22, %s5693_s9 }
0x13d4   :  { %v2455_v44 = vpop.xlane.xlu0 %2454 }
0x13d5   :  { %5596 = vrcp.f32 %v2455_v44 }
0x13d8   :  { %v2458_v45 = vpop.xlane.xlu1 %2457  ;;  %v2464_v46 = vpop.permute.xlu0 %2463 }
0x13d9   :  { %5598 = vrcp.f32 %v2458_v45  ;;  %5184 = vmatpush3.msra.mxu1 %v2464_v46 }
0x13da   :  { %5188 = vmatprep.subr.mxu1 %v5689_v12 }
0x13dc   :  { %v2616_v49 = vpop.permute.xlu0 %2615  ;;  %v2696_v50 = vpop.permute.xlu1 %2695 }
0x13df   :  { %v5597_v47 = vpop.eup %5596 }
0x13e0   :  { %v2461_v9 = vmul.f32 %v5597_v47, %v5593_v38  ;;  %v2694_v51 = vpop.permute.xlu0 %2693 }
0x13e2   :  { %5186 = vmatmul.mubr.msk.f32.vlgmr.msra.gmra.mrb[30].mxu1 %vm250_vm2, %v2461_v9 }
0x13e3   :  { %v5599_v11 = vpop.eup %5598  ;;  %5189 = vmatpush3.msra.mxu1 %v2540_v42  ;;  %5190 = vmatprep.mubr.msk.f32.mxu1 %vm5690_vm1, %v5689_v12 }
0x13e4   :  { %v2462_v48 = vmul.f32 %v5599_v11, %v5595_v40  ;;  %5193 = vmatprep.subr.mxu1 %v5689_v12  ;;  %v2173_v40 = vld [vmem:[%s6416_s17] sm:$0xff] }
0x13e6   :  { %5191 = vmatmul.mubr.msk.f32.vlgmr.msra.gmra.mrb[32].mxu1 %vm250_vm2, %v2462_v48 }
0x13e7   :  { %5195 = vmatprep.mubr.msk.f32.mxu1 %vm5690_vm1, %v5689_v12 }
0x13ea   :  { %5194 = vmatpush3.xpose.msk.msra.mxu1 %vm250_vm2, %v2618_v43 }
0x13eb   :  { %5198 = vmatprep.subr.mxu1 %v5689_v12 }
0x13ed   :  { %5196 = vmatmul.mubr.msk.f32.vlgmr.msra.gmra.mrb[34].mxu1 %vm250_vm2, %v2616_v49 }
0x13ee   :  { %5199 = vmatpush3.xpose.msk.msra.mxu1 %vm250_vm2, %v2696_v50  ;;  %5200 = vmatprep.mubr.msk.f32.mxu1 %vm5690_vm1, %v5689_v12 }
0x13ef   :  { %5208 = vmatprep.subr.mxu1 %v5689_v12 }
0x13f1   :  { %5201 = vmatmul.mubr.msk.f32.vlgmr.msra.gmra.mrb[36].mxu1 %vm250_vm2, %v2694_v51  ;;  %v2175_v51 = vld [vmem:[%s6416_s17 + $0x10] sm:$0xff] }
0x13f2   :  { %5210 = vmatprep.mubr.msk.f32.mxu1 %vm5690_vm1, %v5689_v12 }
0x14b5   :  { %v6149_v52 = vpop.f32.mrb[30].mxu1 }
0x14b6   :  { %v5187_v53 = vpop.f32.mrb[31].mxu1 }
0x14b9   :  { %v6151_v54 = vpop.f32.mrb[32].mxu1 }
0x14ba   :  { %v5192_v55 = vpop.f32.mrb[33].mxu1 }
0x14c0   :  { %v2689_v56 = vpop.f32.mrb[34].mxu1 }
0x14c1   :  { %v5197_v57 = vpop.f32.mrb[35].mxu1  ;;  %v2771_v3 = vmul.f32 0.17677669, %v2689_v56 }
0x14c3   :  { %v2773_v4 = vsel %vm250_vm2, %v2771_v3, -inf }
0x14c4   :  { %v2767_v58 = vpop.f32.mrb[36].mxu1 }
0x14c5   :  { %v2772_v59 = vmul.f32 0.17677669, %v2767_v58  ;;  %v5202_v60 = vpop.f32.mrb[37].mxu1 }
0x14c7   :  { %v2776_v61 = vsel %vm250_vm2, %v2772_v59, -inf }
0x14c8   :  { %2777 = vmax.xlane.f32.xlu1 %v2776_v61 }
0x14d9   :  { %3111 = vrot.lane.b32.xlu1 %v6099_v23, %s5695_s12 }
0x14dd   :  { %3109 = vrot.lane.b32.xlu1 %v6099_v23, %s5697_s10 }
0x14e1   :  { %3187 = vrot.lane.b32.xlu1 %v6095_v22, %s5697_s10 }
0x1555   :  { %v2778_v62 = vpop.xlane.xlu1 %2777 }
0x1556   :  { %v2780_v63 = vsub.f32 %v2772_v59, %v2778_v62 }
0x1558   :  { %v2783_v0 = vmul.f32 1.442695, %v2780_v63 }
0x1559   :  { %v3112_v7 = vpop.permute.xlu1 %3111 }
0x155a   :  { %5600 = vpow2.f32 %v2783_v0 }
0x155d   :  { %v3110_v15 = vpop.permute.xlu1 %3109 }
0x1561   :  { %v3188_v17 = vpop.permute.xlu1 %3187 }
0x1564   :  { %v5601_v1 = vpop.eup %5600 }
0x1565   :  { %v2788_v2 = vsel %vm250_vm2, %v5601_v1, 0.0 }
0x1566   :  { %2789 = vadd.xlane.f32.xlu0 %v2788_v2 }
0x157c   :  { %2871 = vrot.lane.b32.xlu0 %v6095_v22, %s5696_s7 }
0x1580   :  { %3189 = vrot.lane.b32.xlu0 %v6095_v22, %s5695_s12 }
0x159f   :  { %2774 = vmax.xlane.f32.xlu0 %v2773_v4 }
0x15b5   :  { %2795 = vrot.lane.b32.xlu0 %v6099_v23, %s5696_s7 }
0x15b9   :  { %3289 = vrot.lane.b32.xlu0 %v6099_v23, %s5698_s11 }
0x15bd   :  { %3526 = vrot.lane.b32.xlu0 %v6099_v23, %s5699_s16 }
0x15c1   :  { %3604 = vrot.lane.b32.xlu0 %v6095_v22, %s5699_s16 }
0x15c5   :  { %3524 = vrot.lane.b32.xlu0 %v6099_v23, %s5700_s15 }
0x15c9   :  { %3602 = vrot.lane.b32.xlu0 %v6095_v22, %s5700_s15 }
0x15f3   :  { %v2790_v5 = vpop.xlane.xlu0 %2789 }
0x15f4   :  { %5602 = vrcp.f32 %v2790_v5 }
0x15f7   :  { %v2872_v6 = vpop.permute.xlu0 %2871 }
0x15f8   :  { %5209 = vmatpush3.msra.mxu1 %v2872_v6 }
0x15f9   :  { %5223 = vmatprep.subr.mxu1 %v5689_v12 }
0x15fb   :  { %v3190_v16 = vpop.permute.xlu0 %3189 }
0x15fe   :  { %v5603_v8 = vpop.eup %5602 }
0x15ff   :  { %v2794_v10 = vmul.f32 %v5603_v8, %v5601_v1 }
0x1601   :  { %5211 = vmatmul.mubr.msk.f32.vlgmr.msra.gmra.mrb[38].mxu1 %vm250_vm2, %v2794_v10 }
0x1602   :  { %5224 = vmatpush3.xpose.msk.msra.mxu1 %vm250_vm2, %v3112_v7  ;;  %5225 = vmatprep.mubr.msk.f32.mxu1 %vm5690_vm1, %v5689_v12 }
0x1603   :  { %5228 = vmatprep.subr.mxu1 %v5689_v12 }
0x1605   :  { %5226 = vmatmul.mubr.msk.f32.vlgmr.msra.gmra.mrb[40].mxu1 %vm250_vm2, %v3110_v15 }
0x1606   :  { %5229 = vmatpush3.xpose.msk.msra.mxu1 %vm250_vm2, %v3190_v16  ;;  %5230 = vmatprep.mubr.msk.f32.mxu1 %vm5690_vm1, %v5689_v12 }
0x1607   :  { %5238 = vmatprep.subr.mxu1 %v5689_v12 }
0x1609   :  { %5231 = vmatmul.mubr.msk.f32.vlgmr.msra.gmra.mrb[42].mxu1 %vm250_vm2, %v3188_v17 }
0x160a   :  { %5240 = vmatprep.mubr.msk.f32.mxu1 %vm5690_vm1, %v5689_v12 }
0x162c   :  { %v2775_v18 = vpop.xlane.xlu0 %2774 }
0x162d   :  { %v2779_v19 = vsub.f32 %v2771_v3, %v2775_v18 }
0x162f   :  { %v2781_v24 = vmul.f32 1.442695, %v2779_v19 }
0x1630   :  { %v2796_v25 = vpop.permute.xlu0 %2795 }
0x1631   :  { %5604 = vpow2.f32 %v2781_v24  ;;  %5204 = vmatpush3.msra.mxu0 %v2796_v25 }
0x1632   :  { %5213 = vmatprep.subr.mxu0 %v2174_v39 }
0x1634   :  { %v3290_v53 = vpop.permute.xlu0 %3289 }
0x1638   :  { %v3527_v58 = vpop.permute.xlu0 %3526 }
0x163b   :  { %v5605_v14 = vpop.eup %5604 }
0x163c   :  { %v2785_v26 = vsel %vm250_vm2, %v5605_v14, 0.0 }
0x163d   :  { %2786 = vadd.xlane.f32.xlu1 %v2785_v26 }
0x16ca   :  { %v2787_v27 = vpop.xlane.xlu1 %2786 }
0x16cb   :  { %5606 = vrcp.f32 %v2787_v27 }
0x16d4   :  { %v2943_v28 = vpop.f32.mrb[38].mxu1 }
0x16d5   :  { %v5607_v29 = vpop.eup %5606  ;;  %v5212_v30 = vpop.f32.mrb[39].mxu1 }
0x16d6   :  { %v2793_v31 = vmul.f32 %v5607_v29, %v5605_v14 }
0x16d8   :  { %5206 = vmatmul.mubr.msk.f32.vlgmr.msra.gmra.mrb[16].mxu0 %vm250_vm2, %v2793_v31  ;;  %v3183_v32 = vpop.f32.mrb[40].mxu1 }
0x16d9   :  { %v3265_v33 = vmul.f32 0.17677669, %v3183_v32  ;;  %v5227_v13 = vpop.f32.mrb[41].mxu1  ;;  %5214 = vmatpush3.msra.mxu0 %v2174_v39 }
0x16da   :  { %5218 = vmatprep.subr.mxu0 %v2173_v40  ;;  %v2176_v13 = vld [vmem:[%s6416_s17 + $0x18] sm:$0xff] }
0x16db   :  { %v3267_v34 = vsel %vm250_vm2, %v3265_v33, -inf }
0x16dc   :  { %3268 = vmax.xlane.f32.xlu1 %v3267_v34  ;;  %v3261_v35 = vpop.f32.mrb[42].mxu1 }
0x16dd   :  { %v3266_v36 = vmul.f32 0.17677669, %v3261_v35  ;;  %v5232_v37 = vpop.f32.mrb[43].mxu1 }
0x16df   :  { %v3270_v38 = vsel %vm250_vm2, %v3266_v36, -inf }
0x16e0   :  { %3271 = vmax.xlane.f32.xlu1 %v3270_v38 }
0x1769   :  { %v3269_v41 = vpop.xlane.xlu1 %3268 }
0x176a   :  { %v3273_v42 = vsub.f32 %v3265_v33, %v3269_v41 }
0x176c   :  { %v3275_v43 = vmul.f32 1.442695, %v3273_v42 }
0x176d   :  { %v3272_v44 = vpop.xlane.xlu1 %3271 }
0x176e   :  { %5608 = vpow2.f32 %v3275_v43  ;;  %v3274_v45 = vsub.f32 %v3266_v36, %v3272_v44 }
0x1770   :  { %v3277_v46 = vmul.f32 1.442695, %v3274_v45 }
0x1772   :  { %5610 = vpow2.f32 %v3277_v46 }
0x1778   :  { %v5609_v47 = vpop.eup %5608 }
0x1779   :  { %v3279_v9 = vsel %vm250_vm2, %v5609_v47, 0.0 }
0x177a   :  { %3280 = vadd.xlane.f32.xlu1 %v3279_v9 }
0x177c   :  { %v5611_v11 = vpop.eup %5610 }
0x177d   :  { %v3282_v48 = vsel %vm250_vm2, %v5611_v11, 0.0 }
0x177e   :  { %3283 = vadd.xlane.f32.xlu1 %v3282_v48 }
0x178f   :  { %3365 = vrot.lane.b32.xlu1 %v6095_v22, %s5698_s11 }
0x17ab   :  { %v2867_v49 = vpop.f32.mrb[16].mxu0 }
0x17ac   :  { %v5207_v50 = vpop.f32.mrb[17].mxu0  ;;  %5215 = vmatprep.mubr.msk.f32.mxu0 %vm250_vm2, %v2867_v49 }
0x17ad   :  { %5216 = vmatmul.mubr.msk.f32.vlgmr.msra.gmra.mrb[18].mxu0 %vm250_vm2, %v2943_v28 }
0x17ae   :  { %5220 = vmatprep.mubr.msk.f32.mxu0 %vm250_vm2, %v6149_v52  ;;  %5219 = vmatpush3.msra.mxu0 %v2173_v40 }
0x17af   :  { %5233 = vmatprep.subr.mxu0 %v5689_v12 }
0x17b5   :  { %5221 = vmatmul.mubr.msk.f32.vlgmr.msra.gmra.mrb[18].mxu0 %vm250_vm2, %v6151_v54  ;;  %v3605_v54 = vpop.permute.xlu0 %3604 }
0x17b6   :  { %5234 = vmatpush3.msra.mxu0 %v3290_v53  ;;  %5235 = vmatprep.mubr.msk.f32.mxu0 %vm5690_vm1, %v5689_v12 }
0x17b7   :  { %5243 = vmatprep.subr.mxu0 %v2175_v51 }
0x17b9   :  { %v3525_v62 = vpop.permute.xlu0 %3524 }
0x17bd   :  { %v3603_v3 = vpop.permute.xlu0 %3602 }
0x1807   :  { %v3281_v55 = vpop.xlane.xlu1 %3280 }
0x1808   :  { %5612 = vrcp.f32 %v3281_v55 }
0x180b   :  { %v3284_v56 = vpop.xlane.xlu1 %3283 }
0x180c   :  { %5614 = vrcp.f32 %v3284_v56 }
0x180f   :  { %v3366_v57 = vpop.permute.xlu1 %3365 }
0x1810   :  { %5239 = vmatpush3.msra.mxu1 %v3366_v57  ;;  %v2180_v57 = vld [vmem:[%s6418_s25] sm:$0xff] }
0x1811   :  { %5248 = vmatprep.subr.mxu1 %v5689_v12 }
0x1812   :  { %v5613_v52 = vpop.eup %5612 }
0x1813   :  { %v3287_v59 = vmul.f32 %v5613_v52, %v5609_v47 }
0x1815   :  { %5236 = vmatmul.mubr.msk.f32.vlgmr.msra.gmra.mrb[20].mxu0 %vm250_vm2, %v3287_v59  ;;  %v2182_v59 = vld [vmem:[%s6418_s25 + $0x10] sm:$0xff] }
0x1816   :  { %v5615_v60 = vpop.eup %5614  ;;  %5244 = vmatpush3.msra.mxu0 %v2175_v51 }
0x1817   :  { %v3288_v61 = vmul.f32 %v5615_v60, %v5611_v11  ;;  %5253 = vmatprep.subr.mxu0 %v5689_v12  ;;  %v2183_v60 = vld [vmem:[%s6418_s25 + $0x18] sm:$0xff] }
0x1819   :  { %5241 = vmatmul.mubr.msk.f32.vlgmr.msra.gmra.mrb[44].mxu1 %vm250_vm2, %v3288_v61  ;;  %v2185_v61 = vld [vmem:[%s6419_s29] sm:$0xff] }
0x181a   :  { %5249 = vmatpush3.xpose.msk.msra.mxu1 %vm250_vm2, %v3527_v58  ;;  %5250 = vmatprep.mubr.msk.f32.mxu1 %vm5690_vm1, %v5689_v12  ;;  %v2181_v58 = vld [vmem:[%s6418_s25 + $0x8] sm:$0xff] }
0x181b   :  { %5258 = vmatprep.subr.mxu1 %v5689_v12  ;;  %v5375_v52 = vpack.c.bf16 %v2181_v58, %v2180_v57 }
0x181d   :  { %5251 = vmatmul.mubr.msk.f32.vlgmr.msra.gmra.mrb[46].mxu1 %vm250_vm2, %v3525_v62  ;;  %v2186_v62 = vld [vmem:[%s6419_s29 + $0x8] sm:$0xff] }
0x181e   :  { %5260 = vmatprep.mubr.msk.f32.mxu1 %vm5690_vm1, %v5689_v12 }
0x18e8   :  { %v3361_v63 = vpop.f32.mrb[20].mxu0 }
0x18e9   :  { %v5237_v0 = vpop.f32.mrb[21].mxu0  ;;  %5245 = vmatprep.mubr.msk.f32.mxu0 %vm250_vm2, %v3361_v63  ;;  %v2187_v63 = vld [vmem:[%s6419_s29 + $0x10] sm:$0xff] }
0x18ea   :  { %v5383_v0 = vpack.c.bf16 %v2186_v62, %v2185_v61 }
0x18ec   :  { %v3437_v1 = vpop.f32.mrb[44].mxu1 }
0x18ed   :  { %v5242_v2 = vpop.f32.mrb[45].mxu1  ;;  %5246 = vmatmul.mubr.msk.f32.vlgmr.msra.gmra.mrb[18].mxu0 %vm250_vm2, %v3437_v1  ;;  %v2188_v1 = vld [vmem:[%s6419_s29 + $0x18] sm:$0xff] }
0x18ee   :  { %5254 = vmatpush3.xpose.msk.msra.mxu0 %vm250_vm2, %v3605_v54  ;;  %5255 = vmatprep.mubr.msk.f32.mxu0 %vm5690_vm1, %v5689_v12  ;;  %v5379_v54 = vpack.c.bf16 %v2183_v60, %v2182_v59  ;;  %v5387_v2 = vpack.c.bf16 %v2188_v1, %v2187_v63  ;;  %v4210_v1 = vld [vmem:[%s6424_s24 + $0x28] sm:$0xff] }
0x18ef   :  { %5263 = vmatprep.subr.mxu0 %v5689_v12 }
0x18f0   :  { %v3598_v4 = vpop.f32.mrb[46].mxu1 }
0x18f1   :  { %v3680_v5 = vmul.f32 0.17677669, %v3598_v4  ;;  %v5252_v6 = vpop.f32.mrb[47].mxu1  ;;  %5256 = vmatmul.mubr.msk.f32.vlgmr.msra.gmra.mrb[22].mxu0 %vm250_vm2, %v3603_v3  ;;  %v2189_v3 = vld [vmem:[%s6419_s29 + $0x20] sm:$0xff]  ;;  %v2190_v4 = vld [vmem:[%s6419_s29 + $0x28] sm:$0xff] }
0x18f2   :  { %5265 = vmatprep.mubr.msk.f32.mxu0 %vm5690_vm1, %v5689_v12  ;;  %v2191_v6 = vld [vmem:[%s6419_s29 + $0x30] sm:$0xff] }
0x18f3   :  { %v3682_v7 = vsel %vm250_vm2, %v3680_v5, -inf }
0x18f4   :  { %3683 = vmax.xlane.f32.xlu1 %v3682_v7  ;;  %v2192_v7 = vld [vmem:[%s6419_s29 + $0x38] sm:$0xff] }
0x1981   :  { %v3684_v8 = vpop.xlane.xlu1 %3683 }
0x1982   :  { %v3688_v10 = vsub.f32 %v3680_v5, %v3684_v8  ;;  %v5391_v5 = vpack.c.bf16 %v2190_v4, %v2189_v3  ;;  %v5395_v8 = vpack.c.bf16 %v2192_v7, %v2191_v6  ;;  %v4209_v4 = vld [vmem:[%s6424_s24 + $0x20] sm:$0xff]  ;;  %v4218_v6 = vld [vmem:[%s6424_s24 + $0x68] sm:$0xff] }
0x1984   :  { %v3690_v15 = vmul.f32 1.442695, %v3688_v10  ;;  %v2193_v10 = vld [vmem:[%s6419_s29 + $0x40] sm:$0xff] }
0x1986   :  { %5616 = vpow2.f32 %v3690_v15  ;;  %v2194_v15 = vld [vmem:[%s6419_s29 + $0x48] sm:$0xff] }
0x1990   :  { %v5617_v24 = vpop.eup %5616 }
0x1991   :  { %v3694_v25 = vsel %vm250_vm2, %v5617_v24, 0.0 }
0x19c4   :  { %v3676_v16 = vpop.f32.mrb[22].mxu0 }
0x19c5   :  { %v3681_v17 = vmul.f32 0.17677669, %v3676_v16  ;;  %v5257_v18 = vpop.f32.mrb[23].mxu0  ;;  %v5399_v16 = vpack.c.bf16 %v2194_v15, %v2193_v10  ;;  %v4213_v10 = vld [vmem:[%s6424_s24 + $0x40] sm:$0xff] }
0x19c6   :  { %v2196_v18 = vld [vmem:[%s6419_s29 + $0x58] sm:$0xff]  ;;  %v4217_v15 = vld [vmem:[%s6424_s24 + $0x60] sm:$0xff] }
0x19c7   :  { %v3685_v19 = vsel %vm250_vm2, %v3681_v17, -inf }
0x19c8   :  { %3686 = vmax.xlane.f32.xlu0 %v3685_v19 }
0x19cc   :  { %3695 = vadd.xlane.f32.xlu0 %v3694_v25  ;;  %v2198_v25 = vld [vmem:[%s6419_s29 + $0x68] sm:$0xff] }
0x19e2   :  { %3704 = vrot.lane.b32.xlu0 %v6099_v23, %s5701_s18 }
0x1a55   :  { %v3687_v14 = vpop.xlane.xlu0 %3686 }
0x1a56   :  { %v3689_v26 = vsub.f32 %v3681_v17, %v3687_v14  ;;  %v2195_v17 = vld [vmem:[%s6419_s29 + $0x50] sm:$0xff] }
0x1a57   :  { %v5403_v19 = vpack.c.bf16 %v2196_v18, %v2195_v17  ;;  %v4212_v17 = vld [vmem:[%s6424_s24 + $0x38] sm:$0xff]  ;;  %v5421_v18 = vpack.c.bf16 %v4217_v15, %v4213_v10  ;;  %v4207_v15 = vld [vmem:[%s6424_s24 + $0x10] sm:$0xff] }
0x1a58   :  { %v3692_v27 = vmul.f32 1.442695, %v3689_v26 }
0x1a59   :  { %v3696_v28 = vpop.xlane.xlu0 %3695 }
0x1a5a   :  { %5618 = vpow2.f32 %v3692_v27 }
0x1a5b   :  { %5620 = vrcp.f32 %v3696_v28 }
0x1a5d   :  { %v3705_v29 = vpop.permute.xlu0 %3704 }
0x1a5e   :  { %5259 = vmatpush3.msra.mxu1 %v3705_v29 }
0x1a5f   :  { %5376 = vmatprep.subr.bf16.mxu1 %v5375_v52 }
0x1a64   :  { %v5619_v30 = vpop.eup %5618 }
0x1a65   :  { %v5621_v31 = vpop.eup %5620  ;;  %v3697_v32 = vsel %vm250_vm2, %v5619_v30, 0.0 }
0x1a66   :  { %v3702_v33 = vmul.f32 %v5621_v31, %v5617_v24  ;;  %3698 = vadd.xlane.f32.xlu1 %v3697_v32  ;;  %v2197_v24 = vld [vmem:[%s6419_s29 + $0x60] sm:$0xff] }
0x1a67   :  { %v5407_v14 = vpack.c.bf16 %v2198_v25, %v2197_v24  ;;  %v4785_v24 = vld [vmem:[#allocation2] ss:$0 sm:$0xff]  ;;  %v5702_v25 = vmov 0  }
0x1a68   :  { %5261 = vmatmul.mubr.msk.f32.vlgmr.msra.gmra.mrb[48].mxu1 %vm250_vm2, %v3702_v33  ;;  %v4775_v33 = vld [vmem:[%s6420_s3] ss:$0 sm:$0xff]  ;;  %5551 = vset.pattern.permute.xlu0 %v5702_v25 }
0x1a69   :  { %5378 = vmatpush3.bf16.msra.mxu1 %v5375_v52 }
0x1a6a   :  { %5380 = vmatprep.subr.bf16.mxu1 %v5379_v54 }
0x1a6d   :  { %5382 = vmatpush3.bf16.msra.mxu1 %v5379_v54 }
0x1a77   :  { %3780 = vrot.lane.b32.xlu1 %v6095_v22, %s5701_s18  ;;  %v4774_v22 = vld [vmem:[%s6417_s21] ss:$0 sm:$0xff] }
0x1af3   :  { %v3699_v23 = vpop.xlane.xlu1 %3698 }
0x1af4   :  { %5622 = vrcp.f32 %v3699_v23 }
0x1af7   :  { %v3781_v34 = vpop.permute.xlu1 %3780 }
0x1af8   :  { %5264 = vmatpush3.msra.mxu0 %v3781_v34 }
0x1af9   :  { %5268 = vmatprep.subr.mxu0 %v2176_v13 }
0x1afe   :  { %v5623_v35 = vpop.eup %5622 }
0x1aff   :  { %v3703_v36 = vmul.f32 %v5623_v35, %v5619_v30  ;;  %v4776_v35 = vld [vmem:[%s6421_s8] ss:$0 sm:$0xff] }
0x1b01   :  { %5266 = vmatmul.mubr.msk.f32.vlgmr.msra.gmra.mrb[24].mxu0 %vm250_vm2, %v3703_v36 }
0x1b02   :  { %5269 = vmatpush3.msra.mxu0 %v2176_v13 }
0x1b03   :  { %5384 = vmatprep.subr.bf16.mxu0 %v5383_v0 }
0x1b3b   :  { %v3776_v37 = vpop.f32.mrb[48].mxu1 }
0x1b3c   :  { %v5262_v38 = vpop.f32.mrb[49].mxu1  ;;  %5270 = vmatprep.mubr.msk.f32.mxu0 %vm250_vm2, %v3776_v37 }
0x1bd4   :  { %v3852_v39 = vpop.f32.mrb[24].mxu0 }
0x1bd5   :  { %v5267_v40 = vpop.f32.mrb[25].mxu0  ;;  %5271 = vmatmul.mubr.msk.f32.vlgmr.msra.gmra.mrb[18].mxu0 %vm250_vm2, %v3852_v39 }
0x1bd6   :  { %5386 = vmatpush3.bf16.msra.mxu0 %v5383_v0  ;;  %v2199_v40 = vld [vmem:[%s6419_s29 + $0x70] sm:$0xff]  ;;  %v4206_v0 = vld [vmem:[%s6424_s24 + $0x8] sm:$0xff] }
0x1bd7   :  { %5388 = vmatprep.subr.bf16.mxu0 %v5387_v2  ;;  %v5415_v3 = vpack.c.bf16 %v4210_v1, %v4206_v0 }
0x1bd9   :  { %5416 = vmatprep.subr.bf16.mxu1 %v5415_v3 }
0x1bda   :  { %5390 = vmatpush3.bf16.msra.mxu0 %v5387_v2  ;;  %v4205_v2 = vld [vmem:[%s6424_s24] sm:$0xff] }
0x1bdb   :  { %5392 = vmatprep.subr.bf16.mxu0 %v5391_v5  ;;  %v5417_v7 = vpack.c.bf16 %v4209_v4, %v4205_v2 }
0x1bde   :  { %5394 = vmatpush3.bf16.msra.mxu0 %v5391_v5  ;;  %v4214_v5 = vld [vmem:[%s6424_s24 + $0x48] sm:$0xff] }
0x1bdf   :  { %5396 = vmatprep.subr.bf16.mxu0 %v5395_v8 }
0x1be2   :  { %5398 = vmatpush3.bf16.msra.mxu0 %v5395_v8  ;;  %v5419_v8 = vpack.c.bf16 %v4218_v6, %v4214_v5 }
0x1be3   :  { %5400 = vmatprep.subr.bf16.mxu0 %v5399_v16 }
0x1be6   :  { %5402 = vmatpush3.bf16.msra.mxu0 %v5399_v16  ;;  %v4208_v16 = vld [vmem:[%s6424_s24 + $0x18] sm:$0xff] }
0x1be7   :  { %5404 = vmatprep.subr.bf16.mxu0 %v5403_v19 }
0x1bea   :  { %5406 = vmatpush3.bf16.msra.mxu0 %v5403_v19  ;;  %v5423_v19 = vpack.c.bf16 %v4212_v17, %v4208_v16  ;;  %v4211_v16 = vld [vmem:[%s6424_s24 + $0x30] sm:$0xff] }
0x1beb   :  { %5408 = vmatprep.subr.bf16.mxu0 %v5407_v14 }
0x1bee   :  { %5410 = vmatpush3.bf16.msra.mxu0 %v5407_v14  ;;  %v4271_v14 = vld [vmem:[%s5845_s20 + $0x180] sm:$0xff] }
0x1ca8   :  { %v5272_v41 = vpop.f32.mrb[18].mxu0 }
0x1ca9   :  { %v3946_v42 = vadd.f32 %v5272_v41, %v4774_v22  ;;  %v3928_v43 = vpop.f32.mrb[19].mxu0 }
0x1caa   :  { %v3945_v44 = vadd.f32 %v4774_v22, %v3928_v43  ;;  %v2200_v22 = vld [vmem:[%s6419_s29 + $0x78] sm:$0xff] }
0x1cab   :  { %v3948_v45 = vadd.f32 %v3946_v42, %v6087_v21  ;;  %v5411_v41 = vpack.c.bf16 %v2200_v22, %v2199_v40  ;;  %v4777_v42 = vld [vmem:[%s6422_s14] ss:$0 sm:$0xff]  ;;  %v4277_v22 = vld [vmem:[%s5845_s20 + $0x1b0] sm:$0xff] }
0x1cac   :  { %v3947_v46 = vadd.f32 %v3945_v44, %v6085_v20 }
0x1cad   :  { %v3952_v47 = vsel %vm165_vm0, %v3948_v45, 0.0  ;;  %5412 = vmatprep.subr.bf16.mxu0 %v5411_v41 }
0x1cae   :  { %3953 = vadd.xlane.f32.xlu0 %v3952_v47  ;;  %v3949_v9 = vsel %vm165_vm0, %v3947_v46, 0.0  ;;  %5414 = vmatpush3.bf16.msra.mxu0 %v5411_v41  ;;  %v4278_v41 = vld [vmem:[%s5845_s20 + $0x1b8] sm:$0xff] }
0x1caf   :  { %3950 = vadd.xlane.f32.xlu1 %v3949_v9 }
0x1d3b   :  { %v3954_v11 = vpop.xlane.xlu0 %3953 }
0x1d3c   :  { %v3956_v48 = vmul.f32 0.03125, %v3954_v11  ;;  %v3951_v49 = vpop.xlane.xlu1 %3950  ;;  %v4780_v11 = vld [vmem:[%s6423_s19] ss:$0 sm:$0xff] }
0x1d3d   :  { %v3955_v50 = vmul.f32 0.03125, %v3951_v49 }
0x1d3e   :  { %v6250_v51 = vsub.f32 %v3948_v45, %v3956_v48 }
0x1d3f   :  { %v6252_v53 = vsub.f32 %v3947_v46, %v3955_v50 }
0x1d40   :  { %v3960_v20 = vmul.f32 %v6250_v51, %v6250_v51 }
0x1d41   :  { %v3959_v21 = vmul.f32 %v6252_v53, %v6252_v53 }
0x1d42   :  { %v3964_v55 = vsel %vm165_vm0, %v3960_v20, 0.0 }
0x1d43   :  { %3965 = vadd.xlane.f32.xlu1 %v3964_v55  ;;  %v3961_v56 = vsel %vm165_vm0, %v3959_v21, 0.0 }
0x1d44   :  { %3962 = vadd.xlane.f32.xlu0 %v3961_v56 }
0x1dd0   :  { %v3966_v26 = vpop.xlane.xlu1 %3965 }
0x1dd1   :  { %v3968_v27 = vmul.f32 0.03125, %v3966_v26  ;;  %v3963_v28 = vpop.xlane.xlu0 %3962  ;;  %v4272_v26 = vld [vmem:[%s5845_s20 + $0x188] sm:$0xff] }
0x1dd2   :  { %v3967_v29 = vmul.f32 0.03125, %v3963_v28  ;;  %v4255_v28 = vld [vmem:[%s5845_s20 + $0x100] sm:$0xff] }
0x1dd3   :  { %v3970_v30 = vadd.f32 1e-05, %v3968_v27  ;;  %v5463_v27 = vpack.c.bf16 %v4272_v26, %v4271_v14  ;;  %v5425_v14 = vpack.c.bf16 %v4211_v16, %v4207_v15  ;;  %v4266_v16 = vld [vmem:[%s5845_s20 + $0x158] sm:$0xff] }
0x1dd4   :  { %v3969_v31 = vadd.f32 1e-05, %v3967_v29  ;;  %v4256_v29 = vld [vmem:[%s5845_s20 + $0x108] sm:$0xff] }
0x1dd5   :  { %5624 = vrsqrt.f32 %v3970_v30  ;;  %v5465_v30 = vpack.c.bf16 %v4256_v29, %v4255_v28  ;;  %5464 = vmatprep.subr.bf16.mxu0 %v5463_v27  ;;  %v4215_v27 = vld [vmem:[%s6424_s24 + $0x50] sm:$0xff] }
0x1dd6   :  { %5626 = vrsqrt.f32 %v3969_v31  ;;  %v4273_v31 = vld [vmem:[%s5845_s20 + $0x190] sm:$0xff] }
0x1dd7   :  { %v4219_v28 = vld [vmem:[%s6424_s24 + $0x70] sm:$0xff] }
0x1ddf   :  { %v5625_v32 = vpop.eup %5624 }
0x1de0   :  { %v5627_v23 = vpop.eup %5626  ;;  %v3974_v13 = vmul.f32 %v5625_v32, %v6250_v51  ;;  %v4274_v32 = vld [vmem:[%s5845_s20 + $0x198] sm:$0xff] }
0x1de1   :  { %v3973_v34 = vmul.f32 %v5627_v23, %v6252_v53  ;;  %v4257_v23 = vld [vmem:[%s5845_s20 + $0x110] sm:$0xff] }
0x1de2   :  { %v3982_v36 = vmul.f32 %v4775_v33, %v3974_v13  ;;  %v4258_v13 = vld [vmem:[%s5845_s20 + $0x118] sm:$0xff] }
0x1de3   :  { %v3981_v37 = vmul.f32 %v4775_v33, %v3973_v34  ;;  %v5467_v33 = vpack.c.bf16 %v4274_v32, %v4273_v31  ;;  %v5469_v34 = vpack.c.bf16 %v4258_v13, %v4257_v23  ;;  %v4240_v31 = vld [vmem:[%s5845_s20 + $0x88] sm:$0xff]  ;;  %v5429_v32 = vpack.c.bf16 %v4219_v28, %v4215_v27  ;;  %v4223_v23 = vld [vmem:[%s5845_s20] sm:$0xff] }
0x1de4   :  { %v3990_v39 = vadd.f32 %v4776_v35, %v3982_v36  ;;  %v4276_v36 = vld [vmem:[%s5845_s20 + $0x1a8] sm:$0xff]  ;;  %v4267_v27 = vld [vmem:[%s5845_s20 + $0x160] sm:$0xff] }
0x1de5   :  { %v3989_v38 = vadd.f32 %v4776_v35, %v3981_v37  ;;  %v4275_v35 = vld [vmem:[%s5845_s20 + $0x1a0] sm:$0xff]  ;;  %v4224_v13 = vld [vmem:[%s5845_s20 + $0x8] sm:$0xff] }
0x1de6   :  { %v5471_v37 = vpack.c.bf16 %v4276_v36, %v4275_v35  ;;  %v4242_v35 = vld [vmem:[%s5845_s20 + $0x98] sm:$0xff]  ;;  %v5433_v36 = vpack.c.bf16 %v4224_v13, %v4223_v23  ;;  %v4268_v28 = vld [vmem:[%s5845_s20 + $0x168] sm:$0xff] }
0x1de7   :  { %5281 = vmatprep.mubr.msk.f32.mxu1 %vm165_vm0, %v3989_v38  ;;  %v4270_v23 = vld [vmem:[%s5845_s20 + $0x178] sm:$0xff] }
0x1de8   :  { %5282 = vmatmul.mubr.msk.f32.vlgmr.msra.gmra.mrb[50].mxu1 %vm165_vm0, %v3990_v39 }
0x1de9   :  { %4396 = vmatprep.mubr.f32.mxu1 %v5689_v12  ;;  %5418 = vmatpush1.bf16.msra.mxu1 %v5417_v7 }
0x1dea   :  { %5420 = vmatprep.subr.bf16.mxu1 %v5419_v8 }
0x1ded   :  { %5422 = vmatpush1.bf16.msra.mxu1 %v5421_v18  ;;  %v4216_v18 = vld [vmem:[%s6424_s24 + $0x58] sm:$0xff] }
0x1dee   :  { %5424 = vmatprep.subr.bf16.mxu1 %v5423_v19  ;;  %v4220_v19 = vld [vmem:[%s6424_s24 + $0x78] sm:$0xff] }
0x1def   :  { %v5427_v26 = vpack.c.bf16 %v4220_v19, %v4216_v18  ;;  %v4238_v18 = vld [vmem:[%s5845_s20 + $0x78] sm:$0xff] }
0x1ebb   :  { %v5283_v43 = vpop.f32.mrb[50].mxu1 }
0x1ebc   :  { %v4075_v44 = vadd.f32 %v5283_v43, %v4777_v42  ;;  %v4069_v45 = vpop.f32.mrb[51].mxu1  ;;  %v4261_v43 = vld [vmem:[%s5845_s20 + $0x130] sm:$0xff] }
0x1ebd   :  { %v4070_v46 = vadd.f32 %v4777_v42, %v4069_v45  ;;  %v5475_v42 = vpack.c.bf16 %v4278_v41, %v4277_v22 }
0x1ebe   :  { %v4079_v9 = vmax.f32 %v4075_v44, 0.0  ;;  %v4262_v44 = vld [vmem:[%s5845_s20 + $0x138] sm:$0xff] }
0x1ebf   :  { %v4078_v47 = vmax.f32 %v4070_v46, 0.0  ;;  %v5477_v45 = vpack.c.bf16 %v4262_v44, %v4261_v43  ;;  %v4279_v46 = vld [vmem:[%s5845_s20 + $0x1c0] sm:$0xff]  ;;  %v4228_v43 = vld [vmem:[%s5845_s20 + $0x28] sm:$0xff]  ;;  %v4245_v44 = vld [vmem:[%s5845_s20 + $0xb0] sm:$0xff] }
0x1ec1   :  { %5316 = vmatprep.mubr.f32.mxu0 %v4078_v47  ;;  %v4280_v47 = vld [vmem:[%s5845_s20 + $0x1c8] sm:$0xff] }
0x1ec2   :  { %5317 = vmatmul.mubr.f32.vlgmr.msra.gmra.mrb[26].mxu0 %v4079_v9  ;;  %v5479_v9 = vpack.c.bf16 %v4280_v47, %v4279_v46 }
0x1ec3   :  { %5466 = vmatpush3.bf16.msra.mxu0 %v5465_v30  ;;  %v4239_v30 = vld [vmem:[%s5845_s20 + $0x80] sm:$0xff] }
0x1ec4   :  { %5468 = vmatprep.subr.bf16.mxu0 %v5467_v33  ;;  %v5431_v33 = vpack.c.bf16 %v4240_v31, %v4239_v30  ;;  %v4285_v30 = vld [vmem:[%s5845_s20 + $0x1f0] sm:$0xff]  ;;  %v4286_v31 = vld [vmem:[%s5845_s20 + $0x1f8] sm:$0xff] }
0x1ec7   :  { %5470 = vmatpush3.bf16.msra.mxu0 %v5469_v34  ;;  %v4241_v34 = vld [vmem:[%s5845_s20 + $0x90] sm:$0xff] }
0x1ec8   :  { %5472 = vmatprep.subr.bf16.mxu0 %v5471_v37  ;;  %v5435_v37 = vpack.c.bf16 %v4242_v35, %v4241_v34  ;;  %v4306_v34 = vlaneseq }
0x1eca   :  { %v4307_v35 = vshrl.u32 %v4306_v34, 7 }
0x1f95   :  { %v5318_v48 = vpop.f32.mrb[26].mxu0 }
0x1f96   :  { %v4158_v49 = vadd.f32 %v5318_v48, %v4780_v11  ;;  %v4152_v50 = vpop.f32.mrb[27].mxu0 }
0x1f97   :  { %v4153_v51 = vadd.f32 %v4780_v11, %v4152_v50 }
0x1f98   :  { %v4162_v53 = vadd.f32 %v4158_v49, %v3990_v39  ;;  %v4260_v39 = vld [vmem:[%s5845_s20 + $0x128] sm:$0xff] }
0x1f99   :  { %v4161_v20 = vadd.f32 %v4153_v51, %v3989_v38  ;;  %v4259_v38 = vld [vmem:[%s5845_s20 + $0x120] sm:$0xff] }
0x1f9a   :  { %v4166_v21 = vsel %vm165_vm0, %v4162_v53, 0.0  ;;  %v5473_v40 = vpack.c.bf16 %v4260_v39, %v4259_v38  ;;  %v4225_v38 = vld [vmem:[%s5845_s20 + $0x10] sm:$0xff]  ;;  %v4226_v39 = vld [vmem:[%s5845_s20 + $0x18] sm:$0xff] }
0x1f9b   :  { %4167 = vadd.xlane.f32.xlu1 %v4166_v21  ;;  %v4163_v55 = vsel %vm165_vm0, %v4161_v20, 0.0  ;;  %v4781_v21 = vld [vmem:[%s6425_s30] ss:$0 sm:$0xff]  ;;  %v5437_v22 = vpack.c.bf16 %v4226_v39, %v4225_v38  ;;  %v4312_v38 = vsub.s32 1, %v4307_v35 }
0x1f9c   :  { %4164 = vadd.xlane.f32.xlu0 %v4163_v55  ;;  %5474 = vmatpush3.bf16.msra.mxu0 %v5473_v40  ;;  %v4243_v40 = vld [vmem:[%s5845_s20 + $0xa0] sm:$0xff] }
0x1f9d   :  { %5476 = vmatprep.subr.bf16.mxu0 %v5475_v42  ;;  %v4227_v42 = vld [vmem:[%s5845_s20 + $0x20] sm:$0xff] }
0x1f9e   :  { %v5441_v46 = vpack.c.bf16 %v4228_v43, %v4227_v42  ;;  %v4316_v43 = vsub.s32 2, %v4307_v35 }
0x1fa0   :  { %5478 = vmatpush3.bf16.msra.mxu0 %v5477_v45  ;;  %v4246_v45 = vld [vmem:[%s5845_s20 + $0xb8] sm:$0xff] }
0x1fa1   :  { %5480 = vmatprep.subr.bf16.mxu0 %v5479_v9  ;;  %v5443_v47 = vpack.c.bf16 %v4246_v45, %v4245_v44  ;;  %v4229_v9 = vld [vmem:[%s5845_s20 + $0x30] sm:$0xff]  ;;  %v4320_v45 = vsub.s32 3, %v4307_v35 }
0x2028   :  { %v4168_v56 = vpop.xlane.xlu1 %4167 }
0x2029   :  { %v4170_v57 = vmul.f32 0.03125, %v4168_v56  ;;  %v4165_v58 = vpop.xlane.xlu0 %4164 }
0x202a   :  { %v4169_v52 = vmul.f32 0.03125, %v4165_v58 }
0x202b   :  { %v6291_v59 = vsub.f32 %v4162_v53, %v4170_v57  ;;  %v4782_v57 = vld [vmem:[%s6426_s6] ss:$0 sm:$0xff] }
0x202c   :  { %v6293_v60 = vsub.f32 %v4161_v20, %v4169_v52 }
0x202d   :  { %v4174_v54 = vmul.f32 %v6291_v59, %v6291_v59 }
0x202e   :  { %v4173_v61 = vmul.f32 %v6293_v60, %v6293_v60 }
0x202f   :  { %v4178_v62 = vsel %vm165_vm0, %v4174_v54, 0.0 }
0x2030   :  { %4179 = vadd.xlane.f32.xlu1 %v4178_v62  ;;  %v4175_v63 = vsel %vm165_vm0, %v4173_v61, 0.0 }
0x2031   :  { %4176 = vadd.xlane.f32.xlu0 %v4175_v63 }
0x2047   :  { %4484 = vperm.xlu0 %5551, %v4785_v24  }
0x20bd   :  { %v4180_v11 = vpop.xlane.xlu1 %4179 }
0x20be   :  { %v4182_v48 = vmul.f32 0.03125, %v4180_v11  ;;  %v4177_v49 = vpop.xlane.xlu0 %4176  ;;  %v4230_v11 = vld [vmem:[%s5845_s20 + $0x38] sm:$0xff] }
0x20bf   :  { %v4181_v50 = vmul.f32 0.03125, %v4177_v49  ;;  %v4248_v49 = vld [vmem:[%s5845_s20 + $0xc8] sm:$0xff] }
0x20c0   :  { %v4184_v51 = vadd.f32 1e-05, %v4182_v48  ;;  %v4247_v48 = vld [vmem:[%s5845_s20 + $0xc0] sm:$0xff] }
0x20c1   :  { %v4183_v53 = vadd.f32 1e-05, %v4181_v50  ;;  %v5445_v50 = vpack.c.bf16 %v4230_v11, %v4229_v9 }
0x20c2   :  { %5628 = vrsqrt.f32 %v4184_v51  ;;  %v5447_v51 = vpack.c.bf16 %v4248_v49, %v4247_v48 }
0x20c3   :  { %5630 = vrsqrt.f32 %v4183_v53  ;;  %v4231_v53 = vld [vmem:[%s5845_s20 + $0x40] sm:$0xff] }
0x20cc   :  { %v5629_v20 = vpop.eup %5628 }
0x20cd   :  { %v5631_v55 = vpop.eup %5630  ;;  %v4188_v56 = vmul.f32 %v5629_v20, %v6291_v59  ;;  %v4232_v20 = vld [vmem:[%s5845_s20 + $0x48] sm:$0xff] }
0x20ce   :  { %v4187_v58 = vmul.f32 %v5631_v55, %v6293_v60  ;;  %v4250_v55 = vld [vmem:[%s5845_s20 + $0xd8] sm:$0xff] }
0x20cf   :  { %v4196_v52 = vmul.f32 %v4781_v21, %v4188_v56  ;;  %v5449_v56 = vpack.c.bf16 %v4232_v20, %v4231_v53 }
0x20d0   :  { %v4195_v54 = vmul.f32 %v4781_v21, %v4187_v58  ;;  %v4249_v21 = vld [vmem:[%s5845_s20 + $0xd0] sm:$0xff] }
0x20d1   :  { %v4204_v61 = vadd.f32 %v4782_v57, %v4196_v52  ;;  %v4233_v58 = vld [vmem:[%s5845_s20 + $0x50] sm:$0xff]  ;;  %v4234_v52 = vld [vmem:[%s5845_s20 + $0x58] sm:$0xff] }
0x20d2   :  { %v4203_v62 = vadd.f32 %v4782_v57, %v4195_v54  ;;  %v5451_v57 = vpack.c.bf16 %v4250_v55, %v4249_v21  ;;  %v5453_v54 = vpack.c.bf16 %v4234_v52, %v4233_v58 }
0x20d3   :  { %v4295_v63 = vsel %vm165_vm0, %v4204_v61, 0.0  ;;  %v4251_v61 = vld [vmem:[%s5845_s20 + $0xe0] sm:$0xff] }
0x20d4   :  { %v4288_v0 = vsel %vm165_vm0, %v4203_v62, 0.0  ;;  %v4296_v1 = vrot.slane %v4295_v63, 4  ;;  %v4252_v62 = vld [vmem:[%s5845_s20 + $0xe8] sm:$0xff] }
0x20d5   :  { %v4289_v2 = vrot.slane %v4288_v0, 4 }
0x20d6   :  { %v4297_v3 = vadd.f32 %v4296_v1, %v4295_v63  ;;  %v4263_v63 = vld [vmem:[%s5845_s20 + $0x140] sm:$0xff]  ;;  %v4264_v1 = vld [vmem:[%s5845_s20 + $0x148] sm:$0xff] }
0x20d7   :  { %v4290_v4 = vadd.f32 %v4289_v2, %v4288_v0  ;;  %v5455_v0 = vpack.c.bf16 %v4252_v62, %v4251_v61  ;;  %v4235_v2 = vld [vmem:[%s5845_s20 + $0x60] sm:$0xff] }
0x20d8   :  { %v4298_v59 = vrot.slane %v4297_v3, 2  ;;  %v4786_v61 = vld [vmem:[%s5850_s27] ss:$0 sm:$0xff] }
0x20d9   :  { %v4291_v5 = vrot.slane %v4290_v4, 2 }
0x20da   :  { %v4299_v60 = vadd.f32 %v4298_v59, %v4297_v3  ;;  %v4236_v3 = vld [vmem:[%s5845_s20 + $0x68] sm:$0xff] }
0x20db   :  { %v4292_v6 = vadd.f32 %v4291_v5, %v4290_v4  ;;  %v5481_v4 = vpack.c.bf16 %v4264_v1, %v4263_v63  ;;  %v5457_v59 = vpack.c.bf16 %v4236_v3, %v4235_v2  ;;  %v4281_v5 = vld [vmem:[%s5845_s20 + $0x1d0] sm:$0xff] }
0x20dc   :  { %v4300_v7 = vrot.slane %v4299_v60, 1 }
0x20dd   :  { %v4293_v8 = vrot.slane %v4292_v6, 1  ;;  %5482 = vmatpush3.bf16.msra.mxu0 %v5481_v4 }
0x20de   :  { %v4301_v10 = vadd.f32 %v4300_v7, %v4299_v60  ;;  %v4282_v60 = vld [vmem:[%s5845_s20 + $0x1d8] sm:$0xff]  ;;  %v4253_v7 = vld [vmem:[%s5845_s20 + $0xf0] sm:$0xff] }
0x20df   :  { %v4294_v17 = vadd.f32 %v4293_v8, %v4292_v6  ;;  %v5483_v6 = vpack.c.bf16 %v4282_v60, %v4281_v5  ;;  %v4254_v8 = vld [vmem:[%s5845_s20 + $0xf8] sm:$0xff] }
0x20e0   :  { %v4304_v24 = vmul.f32 0.125, %v4301_v10  ;;  %v4265_v10 = vld [vmem:[%s5845_s20 + $0x150] sm:$0xff]  ;;  %v5459_v15 = vpack.c.bf16 %v4254_v8, %v4253_v7 }
0x20e1   :  { %v4303_v25 = vmul.f32 0.125, %v4294_v17  ;;  %v4237_v17 = vld [vmem:[%s5845_s20 + $0x70] sm:$0xff]  ;;  %5484 = vmatprep.subr.bf16.mxu0 %v5483_v6  ;;  %v5485_v19 = vpack.c.bf16 %v4266_v16, %v4265_v10 }
0x20e3   :  { %v4329_v29 = vsel %vm4328_vm3, %v4304_v24, %v4303_v25  ;;  %v5461_v24 = vpack.c.bf16 %v4238_v18, %v4237_v17  ;;  %v4283_v25 = vld [vmem:[%s5845_s20 + $0x1e0] sm:$0xff]  ;;  %5486 = vmatpush3.bf16.msra.mxu0 %v5485_v19 }
0x20e4   :  { %4783 = vmatmul.mubr.msk.f32.vlgmr.msra.gmra.mrb[52].mxu1 %vm165_vm0, %v4329_v29 }
0x20e5   :  { %5426 = vmatpush1.bf16.msra.mxu1 %v5425_v14  ;;  %4467 = vmatprep.mubr.f32.mxu1 %v5689_v12  ;;  %v4244_v12 = vld [vmem:[%s5845_s20 + $0xa8] sm:$0xff] }
0x20e6   :  { %5428 = vmatprep.subr.bf16.mxu1 %v5427_v26  ;;  %v5439_v41 = vpack.c.bf16 %v4244_v12, %v4243_v40  ;;  %v4284_v14 = vld [vmem:[%s5845_s20 + $0x1e8] sm:$0xff] }
0x20e7   :  { %v5487_v26 = vpack.c.bf16 %v4284_v14, %v4283_v25 }
0x20e9   :  { %5430 = vmatpush1.bf16.msra.mxu1 %v5429_v32  ;;  %5488 = vmatprep.subr.bf16.mxu0 %v5487_v26  ;;  %v5491_v32 = vpack.c.bf16 %v4286_v31, %v4285_v30 }
0x20ea   :  { %5432 = vmatprep.subr.bf16.mxu1 %v5431_v33  ;;  %v4269_v33 = vld [vmem:[%s5845_s20 + $0x170] sm:$0xff]  ;;  %s5703_s20 = smov [#allocation3]  }
0x20eb   :  { %v5493_v13 = vpack.c.bf16 %v4270_v23, %v4269_v33  ;;  %s4660_s27 = sshll.u32 %s5703_s20, 4  ;;  %s4661_s27 = int_to_ptr.vmem [resolvable:$true] %s4660_s27 }
0x20ec   :  { %4784 = vmatmul.mubr.msk.f32.vlgmr.msra.gmra.mrb[54].mxu1 %vm165_vm0, %v4329_v29  ;;  %v5489_v29 = vpack.c.bf16 %v4268_v28, %v4267_v27  ;;  %s5636_s22 = scalar_lea.vmem %s4661_s27, 32  ;;  %p5641_p1 = scmp.lt.s32.totalorder %s4661_s27, %s4661_s27 }
0x20ed   :  { %5434 = vmatpush3.bf16.msra.mxu1 %v5433_v36  ;;  %v4308_v36 = vsub.s32 0, %v4307_v35  ;;  %p5637_p0 = scmp.ne.s32.totalorder %s4661_s27, %s5636_s22  ;;  %p5642_p2 = scmp.lt.s32.totalorder %s5636_s22, %s5636_s22 }
0x20ee   :  { %5436 = vmatprep.subr.bf16.mxu1 %v5435_v37  ;;  %5490 = vmatpush3.bf16.msra.mxu0 %v5489_v29  ;;  %v4221_v37 = vld [vmem:[%s6427_s23] sm:$0xf] }
0x20ef   :  { %5492 = vmatprep.subr.bf16.mxu0 %v5491_v32  ;;  %v4309_v39 = vrot.slane %v4221_v37, %v4308_v36  ;;  %v4313_v40 = vrot.slane %v4221_v37, %v4312_v38  ;;  %v4317_v9 = vrot.slane %v4221_v37, %v4316_v43  ;;  %v4321_v48 = vrot.slane %v4221_v37, %v4320_v45  ;;  %p5643_p3 = por %p5642_p2, %p5641_p1 }
0x20f1   :  { %5438 = vmatpush3.bf16.msra.mxu1 %v5437_v22  ;;  %v4485_v22 = vpop.permute.xlu0 %4484  ;;  %p5644_p4 = pnand %p5643_p3, %p5637_p0 }
0x20f2   :  { %5440 = vmatprep.subr.bf16.mxu1 %v5439_v41  ;;  %5494 = vmatpush3.bf16.msra.mxu0 %v5493_v13 }
0x20f5   :  { %5442 = vmatpush3.bf16.msra.mxu1 %v5441_v46 }
0x20f6   :  { %5444 = vmatprep.subr.bf16.mxu1 %v5443_v47 }
0x20f9   :  { %5446 = vmatpush3.bf16.msra.mxu1 %v5445_v50 }
0x20fa   :  { %5448 = vmatprep.subr.bf16.mxu1 %v5447_v51 }
0x20fd   :  { %5450 = vmatpush3.bf16.msra.mxu1 %v5449_v56 }
0x20fe   :  { %5452 = vmatprep.subr.bf16.mxu1 %v5451_v57 }
0x2101   :  { %5454 = vmatpush3.bf16.msra.mxu1 %v5453_v54 }
0x2102   :  { %5456 = vmatprep.subr.bf16.mxu1 %v5455_v0 }
0x2105   :  { %5458 = vmatpush3.bf16.msra.mxu1 %v5457_v59 }
0x2106   :  { %5460 = vmatprep.subr.bf16.mxu1 %v5459_v15 }
0x2109   :  { %5462 = vmatpush3.bf16.msra.mxu1 %v5461_v24 }
0x21b7   :  { %v4398_v12 = vpop.f32.mrb[52].mxu1 }
0x21b8   :  { %v4399_v41 = vadd.f32 %v4398_v12, %v4309_v39  ;;  %v4400_v42 = vpop.f32.mrb[53].mxu1 }
0x21b9   :  { %v4401_v44 = vadd.f32 %v4400_v42, %v4313_v40 }
0x21ba   :  { %v4487_v46 = vmul.f32 %v4485_v22, %v4399_v41  ;;  %vm4474_vm4 = vcmp.gt.f32.partialorder %v4399_v41, 0.0 }
0x21bb   :  { %v4488_v47 = vmul.f32 %v4485_v22, %v4401_v44  ;;  %vm4475_vm5 = vcmp.gt.f32.partialorder %v4401_v44, 0.0 }
0x21bc   :  { %v4491_v49 = vsel %vm4474_vm4, %v4399_v41, %v4487_v46 }
0x21bd   :  { %v4492_v11 = vsel %vm4475_vm5, %v4401_v44, %v4488_v47 }
0x21be   :  { %4565 = vmatprep.mubr.f32.mxu1 %v4492_v11 }
0x21bf   :  { %v4469_v50 = vpop.f32.mrb[54].mxu1  ;;  %4566 = vmatmul.mubr.f32.vlgmr.msra.gmra.mrb[56].mxu1 %v4491_v49 }
0x21c0   :  { %v4470_v51 = vadd.f32 %v4469_v50, %v4317_v9  ;;  %v4471_v53 = vpop.f32.mrb[55].mxu1 }
0x21c1   :  { %v4472_v20 = vadd.f32 %v4471_v53, %v4321_v48 }
0x21c2   :  { %v4489_v21 = vmul.f32 %v4485_v22, %v4470_v51  ;;  %vm4476_vm6 = vcmp.gt.f32.partialorder %v4470_v51, 0.0 }
0x21c3   :  { %v4490_v55 = vmul.f32 %v4485_v22, %v4472_v20  ;;  %vm4477_vm7 = vcmp.gt.f32.partialorder %v4472_v20, 0.0 }
0x21c4   :  { %v4493_v57 = vsel %vm4476_vm6, %v4470_v51, %v4489_v21 }
0x21c5   :  { %v4494_v56 = vsel %vm4477_vm7, %v4472_v20, %v4490_v55 }
0x21c6   :  { %4635 = vmatprep.mubr.f32.mxu0 %v4494_v56 }
0x21c7   :  { %4636 = vmatmul.mubr.f32.vlgmr.msra.gmra.mrb[28].mxu0 %v4493_v57 }
0x2292   :  { %v4967_v58 = vpop.f32.mrb[56].mxu1 }
0x2293   :  { %v4968_v52 = vpop.f32.mrb[57].mxu1 }
0x2294   :  { %v4969_v54 = vadd.f32 %v4968_v52, %v4967_v58 }
0x2296   :  { %v4568_v0 = vadd.f32 %v4969_v54, %v4786_v61 }
0x229a   :  { %v5002_v62 = vpop.f32.mrb[28].mxu0 }
0x229b   :  { %v5003_v63 = vpop.f32.mrb[29].mxu0 }
0x229c   :  { %v5004_v1 = vadd.f32 %v5003_v63, %v5002_v62 }
0x229e   :  { %v4638_v2 = vadd.f32 %v5004_v1, %v4568_v0 }
0x22a0   :  { %v4642_v3 = vsel %vm4641_vm8, %v4638_v2, -inf }
0x22a1   :  { %4643 = vmax.xlane.f32.xlu1 %v4642_v3 }
0x232e   :  { %v4644_v4 = vpop.xlane.xlu1 %4643 }
0x232f   :  { %v4645_v59 = vsub.f32 %v4638_v2, %v4644_v4 }
0x2331   :  { %v4646_v5 = vmul.f32 1.442695, %v4645_v59 }
0x2333   :  { %5632 = vpow2.f32 %v4646_v5 }
0x233d   :  { %v5633_v60 = vpop.eup %5632 }
0x233e   :  { %v4648_v6 = vsel %vm4641_vm8, %v5633_v60, 0.0 }
0x233f   :  { %4649 = vadd.xlane.f32.xlu1 %v4648_v6 }
0x23cc   :  { %v4650_v7 = vpop.xlane.xlu1 %4649 }
0x23cd   :  { %5634 = vrcp.f32 %v4650_v7 }
0x23d7   :  { %v5635_v8 = vpop.eup %5634 }
0x23d8   :  { %v4652_v10 = vmul.f32 %v5635_v8, %v5633_v60 }
0x23da   :  { %4653 = vst.msk [vmem:[#allocation3] sm:$0x3] %vm4641_vm8, %v4652_v10 }
0x23db   :  { %5647 = shalt.err (!%p5644_p4)
}
0x23dc   :  { %s5648_s26 = scalar_lea.hbm %s5855_s4, 32 }
0x23dd   :  { %p5649_p5 = scmp.ne.s32.totalorder %s5855_s4, %s5648_s26  ;;  %p5652_p6 = scmp.lt.u32.totalorder %s5648_s26, %s5855_s4 }
0x23df   :  { %p5654_p7 = pnand %p5652_p6, %p5649_p5 }
0x23e1   :  { %5657 = shalt.err (!%p5654_p7)
}
0x23e2   :  { %4663 = dma.vmem_to_hbm [thread:$0]  %s4661_s27, 32, %s5855_s4, [#allocation4]  }
0x23e3   :  { %5658 = dma.done.wait [#allocation4], 32  }
0x23e4   :  { %5659 = vsyncadd [#allocation4], 4294967264 }
0x23e5   :  { %4667 = vsyncpa [#allocation4], 1 }

</bundles_post_ra>
